<compile_context>
chip_gen: v5e
topology: v5e:2x2
jax: 0.10.0
libtpu: 0.0.40
codegen_flags: <defaults>
</compile_context>

<pallas_src>
import jax
import jax.numpy as jnp
from jax import lax
from jax.experimental import pallas as pl
from jax.experimental.pallas import tpu as pltpu

NEG_SLOPE = 0.01  # torch.nn.LeakyReLU default negative_slope
KS, DIL, PAD = 11, 3, 5


def _leaky(z):
    # identical to where(z>0, z, slope*z) for 0 < slope < 1, but cheaper on the VALU
    return jnp.maximum(z, NEG_SLOPE * z)


# ---------------- fused whole-batch Siamese kernel (flipped, lane-dense layout) -------
def _make_kernel(B, HW, PADP):
    n_img = 2 * B          # x images then y images, batch-ordered
    half = B * PADP        # lane offset of the y half (128-aligned)

    def kernel(pix_ref, pat_ref, upt_ref, w1_ref, w11_ref,
               wm1a_ref, wm1b_ref, wm2_ref, wm3_ref, m_ref, o_ref):
        # 1x1 conv branch: (32, n_img*PADP), channels contracted on sublanes
        f1 = jnp.dot(w1_ref[...], pix_ref[...], preferred_element_type=jnp.float32)

        # dilated 11x11 conv (im2col'd) + bilinear upsample (align_corners=True),
        # per image so the shared (16, PADP) interp matrix needs no block-diag zeros.
        parts = []
        for i in range(n_img):
            f2_i = jnp.dot(w11_ref[...], pat_ref[i],
                           preferred_element_type=jnp.float32)          # (32, n)
            parts.append(jnp.dot(f2_i, upt_ref[...],
                                 preferred_element_type=jnp.float32))   # (32, PADP)
        f2u = jnp.concatenate(parts, axis=1)                             # (32, L), aligned

        # conv_m1(leaky(cat([f1, f2u], ch))) without materializing the 64-row concat
        a = (jnp.dot(wm1a_ref[...], _leaky(f1), preferred_element_type=jnp.float32)
             + jnp.dot(wm1b_ref[...], _leaky(f2u), preferred_element_type=jnp.float32))
        a = jnp.dot(wm2_ref[...], _leaky(a), preferred_element_type=jnp.float32)
        z = jnp.dot(wm3_ref[...], _leaky(a), preferred_element_type=jnp.float32)  # (12, L)

        # Mahalanobis-style per-pixel score between the x and y halves (aligned slices)
        d = jnp.abs(z[:, :half] - z[:, half:])                           # (12, B*PADP)
        q = jnp.dot(m_ref[...], d, preferred_element_type=jnp.float32)   # (12, B*PADP)
        s = jnp.sqrt(1e-8 + jnp.sum(q * d, axis=0, keepdims=True))       # (1, B*PADP)

        # per-batch mean over the HW real pixels (mask the zero-padded lane columns)
        valid = lax.broadcasted_iota(jnp.int32, (1, PADP), 1) < HW
        ocol = lax.broadcasted_iota(jnp.int32, (8, 128), 1)
        acc = jnp.zeros((8, 128), jnp.float32)
        for b in range(B):
            sb = s[:, b * PADP:(b + 1) * PADP]                           # aligned slice
            mean_b = jnp.sum(jnp.where(valid, sb, 0.0)) * (1.0 / HW)
            acc = jnp.where(ocol == b, mean_b, acc)
        o_ref[...] = acc                                                 # lane-dense store

    return kernel


# ---------------- plain-JAX glue (layout prep only) ----------------
def _im2col_dilated(x):
    # x: (B, 3, H, W) -> patches (B*Ho*Wo, 3*11*11);  Ho = H + 2*PAD - DIL*(KS-1)
    B, C, H, W = x.shape
    Ho = H + 2 * PAD - DIL * (KS - 1)
    Wo = W + 2 * PAD - DIL * (KS - 1)
    xp = jnp.pad(x, ((0, 0), (0, 0), (PAD, PAD), (PAD, PAD)))
    rows = []
    for kh in range(KS):
        cols = [xp[:, :, DIL * kh:DIL * kh + Ho, DIL * kw:DIL * kw + Wo] for kw in range(KS)]
        rows.append(jnp.stack(cols, axis=2))                    # (B, C, KS, Ho, Wo)
    patches = jnp.stack(rows, axis=2)                           # (B, C, KS, KS, Ho, Wo)
    patches = patches.transpose(0, 4, 5, 1, 2, 3).reshape(B * Ho * Wo, C * KS * KS)
    return patches, Ho, Wo


def _interp_matrix_1d(out_size, in_size):
    # bilinear interpolation weights, align_corners=True
    # TODO(synk): out_size==1 or in_size<2 edge cases not handled (not hit by these shapes).
    pos = jnp.arange(out_size, dtype=jnp.float32) * (in_size - 1) / (out_size - 1)
    lo = jnp.clip(jnp.floor(pos).astype(jnp.int32), 0, in_size - 2)
    frac = pos - lo.astype(jnp.float32)
    idx = jnp.arange(out_size)
    w = jnp.zeros((out_size, in_size), jnp.float32)
    w = w.at[idx, lo].add(1.0 - frac)
    w = w.at[idx, lo + 1].add(frac)
    return w


def siamese_forward(x, y, matrix, params):
    B, C, H, W = x.shape
    HW = H * W
    PADP = ((HW + 127) // 128) * 128        # per-image pixel columns, 128-lane aligned
    Cpad = 8                                # pad channels to one sublane group
    assert C <= Cpad and B <= 128

    # hoist the (loop-invariant) matrix symmetrization out of the kernel
    msym = jnp.abs(matrix)
    msym = (msym.T + msym) * 0.5

    # pixel-major, channel-on-sublane slab: lanes = [x_b0 | x_b1 | ... | y_b0 | y_b1 | ...]
    def img_cols(z):                        # (B,C,H,W) -> (Cpad, B*PADP)
        t = z.reshape(B, C, HW)
        t = jnp.pad(t, ((0, 0), (0, Cpad - C), (0, PADP - HW)))
        return t.transpose(1, 0, 2).reshape(Cpad, B * PADP)

    pixT = jnp.concatenate([img_cols(x), img_cols(y)], axis=1)          # (Cpad, 2B*PADP)

    # im2col'd dilated 11x11 conv patches, one (363, n) slab per image
    px, Ho, Wo = _im2col_dilated(x)
    py, _, _ = _im2col_dilated(y)
    n = Ho * Wo
    Kp = px.shape[1]
    patx = px.reshape(B, n, Kp).transpose(0, 2, 1)                      # (B, Kp, n)
    paty = py.reshape(B, n, Kp).transpose(0, 2, 1)
    pat = jnp.concatenate([patx, paty], axis=0)                         # (2B, Kp, n)

    # shared bilinear interp matrix (align_corners=True), transposed + lane-padded to PADP
    upT = jnp.kron(_interp_matrix_1d(H, Ho), _interp_matrix_1d(W, Wo)).T   # (n, HW)
    upT = jnp.pad(upT, ((0, 0), (0, PADP - HW)))                           # (n, PADP)

    # weights in flipped (out, in) matmul form; conv_m1 split over the channel concat
    w1f = jnp.pad(params["w1x1"], ((0, Cpad - C), (0, 0))).T            # (32, Cpad)
    w11f = params["w11"].T                                              # (32, Kp)
    wm1aF = params["wm1"][:32].T                                        # (32, 32)
    wm1bF = params["wm1"][32:].T                                        # (32, 32)
    wm2F = params["wm2"].T                                              # (16, 32)
    wm3F = params["wm3"].T                                              # (12, 16)

    kernel = _make_kernel(B, HW, PADP)

    def full(a, nd):
        return pl.BlockSpec(a.shape, lambda i, _nd=nd: (0,) * _nd)

    out = pl.pallas_call(
        kernel,
        out_shape=jax.ShapeDtypeStruct((8, 128), jnp.float32),
        grid=(1,),
        in_specs=[
            full(pixT, 2), full(pat, 3), full(upT, 2), full(w1f, 2), full(w11f, 2),
            full(wm1aF, 2), full(wm1bF, 2), full(wm2F, 2), full(wm3F, 2), full(msym, 2),
        ],
        out_specs=pl.BlockSpec((8, 128), lambda i: (0, 0)),
        compiler_params=pltpu.CompilerParams(dimension_semantics=("arbitrary",)),
    )(pixT, pat, upT, w1f, w11f, wm1aF, wm1bF, wm2F, wm3F, msym)

    return out[0, :B]                                                   # (B,)


# ---------------- pure-JAX reference for sanity check ----------------
def reference_forward(x, y, matrix, params):
    def once(z):
        B, C, H, W = z.shape
        HW = H * W
        f1 = z.transpose(0, 2, 3, 1).reshape(B * HW, C) @ params["w1x1"]
        patches, Ho, Wo = _im2col_dilated(z)
        f2 = (patches @ params["w11"]).reshape(B, Ho, Wo, 32).transpose(0, 3, 1, 2)
        up = jnp.kron(_interp_matrix_1d(H, Ho), _interp_matrix_1d(W, Wo))
        f2u = (f2.reshape(B * 32, Ho * Wo) @ up.T).reshape(B, 32, HW)
        f2u = f2u.transpose(0, 2, 1).reshape(B * HW, 32)
        return jnp.concatenate([f1, f2u], axis=1)

    def chain(f):
        z = _leaky(f)
        z = _leaky(z @ params["wm1"])
        z = _leaky(z @ params["wm2"])
        return z @ params["wm3"]

    B, _, H, W = x.shape
    HW = H * W
    m = jnp.abs(matrix)
    m = (m.T + m) / 2
    d = jnp.abs(chain(once(x)) - chain(once(y)))
    s = jnp.sqrt(1e-8 + jnp.sum((d @ m) * d, axis=-1))
    return s.reshape(B, HW).mean(axis=1)


def _kaiming_uniform(key, shape, fan_in):
    bound = (6.0 / fan_in) ** 0.5
    return jax.random.uniform(key, shape, jnp.float32, -bound, bound)


if __name__ == "__main__":
    key = jax.random.PRNGKey(0)
    kx, ky, km, k1, k2, k3, k4, k5 = jax.random.split(key, 8)
    B, H, W = 2, 24, 24
    x = jax.random.normal(kx, (B, 3, H, W), jnp.float32)
    y = jax.random.normal(ky, (B, 3, H, W), jnp.float32)
    matrix = jax.random.normal(km, (12, 12), jnp.float32)
    # weights stored already transposed into (in_features, out_channels) matmul form
    params = {
        "w1x1": _kaiming_uniform(k1, (3, 32), 3),                      # Conv2d(3,32,k=1)
        "w11": _kaiming_uniform(k2, (3 * KS * KS, 32), 3 * KS * KS),   # Conv2d(3,32,k=11,d=3)
        "wm1": _kaiming_uniform(k3, (64, 32), 64),                     # Conv2d(64,32,k=1)
        "wm2": _kaiming_uniform(k4, (32, 16), 32),                     # Conv2d(32,16,k=1)
        "wm3": _kaiming_uniform(k5, (16, 12), 16),                     # Conv2d(16,12,k=1)
    }

    out = jax.jit(siamese_forward)(x, y, matrix, params)
    out = jax.block_until_ready(out)

    ref = reference_forward(x, y, matrix, params)
    assert out.shape == (B,)
    assert jnp.allclose(out, ref, rtol=1e-4, atol=1e-4), (out, ref)
    print("KERNEL_OK")
</pallas_src>

<mosaic_0001>
module attributes {stable_mosaic.version = 11 : i64} {
  func.func @kernel(%arg0: i32, %arg1: memref<8x2560xf32, #tpu.memory_space<vmem>>, %arg2: memref<4x363x16xf32, #tpu.memory_space<vmem>>, %arg3: memref<16x640xf32, #tpu.memory_space<vmem>>, %arg4: memref<32x8xf32, #tpu.memory_space<vmem>>, %arg5: memref<32x363xf32, #tpu.memory_space<vmem>>, %arg6: memref<32x32xf32, #tpu.memory_space<vmem>>, %arg7: memref<32x32xf32, #tpu.memory_space<vmem>>, %arg8: memref<16x32xf32, #tpu.memory_space<vmem>>, %arg9: memref<12x16xf32, #tpu.memory_space<vmem>>, %arg10: memref<12x12xf32, #tpu.memory_space<vmem>>, %arg11: memref<8x128xf32, #tpu.memory_space<vmem>>) attributes {dimension_semantics = [#tpu.dimension_semantics<arbitrary>], iteration_bounds = array<i64: 1>, scalar_prefetch = 0 : i64, scratch_operands = 0 : i64, tpu.core_type = #tpu.core_type<tc>, window_params = [{pipeline_mode = #tpu.pipeline_mode<synchronous>, transform_indices = @transform_0, window_bounds = array<i64: 8, 2560>}, {pipeline_mode = #tpu.pipeline_mode<synchronous>, transform_indices = @transform_1, window_bounds = array<i64: 4, 363, 16>}, {pipeline_mode = #tpu.pipeline_mode<synchronous>, transform_indices = @transform_2, window_bounds = array<i64: 16, 640>}, {pipeline_mode = #tpu.pipeline_mode<synchronous>, transform_indices = @transform_3, window_bounds = array<i64: 32, 8>}, {pipeline_mode = #tpu.pipeline_mode<synchronous>, transform_indices = @transform_4, window_bounds = array<i64: 32, 363>}, {pipeline_mode = #tpu.pipeline_mode<synchronous>, transform_indices = @transform_5, window_bounds = array<i64: 32, 32>}, {pipeline_mode = #tpu.pipeline_mode<synchronous>, transform_indices = @transform_6, window_bounds = array<i64: 32, 32>}, {pipeline_mode = #tpu.pipeline_mode<synchronous>, transform_indices = @transform_7, window_bounds = array<i64: 16, 32>}, {pipeline_mode = #tpu.pipeline_mode<synchronous>, transform_indices = @transform_8, window_bounds = array<i64: 12, 16>}, {pipeline_mode = #tpu.pipeline_mode<synchronous>, transform_indices = @transform_9, window_bounds = array<i64: 12, 12>}, {pipeline_mode = #tpu.pipeline_mode<synchronous>, transform_indices = @transform_10, window_bounds = array<i64: 8, 128>}]} {
    %c0 = arith.constant 0 : index
    %c0_0 = arith.constant 0 : index
    %0 = vector.load %arg4[%c0, %c0_0] : memref<32x8xf32, #tpu.memory_space<vmem>>, vector<32x8xf32>
    %c0_1 = arith.constant 0 : index
    %c0_2 = arith.constant 0 : index
    %1 = vector.load %arg1[%c0_1, %c0_2] : memref<8x2560xf32, #tpu.memory_space<vmem>>, vector<8x2560xf32>
    %cst = arith.constant dense<0.000000e+00> : vector<32x2560xf32>
    %2 = tpu.matmul %0, %1, %cst {dimension_numbers = #tpu.dot_dimension_numbers<[1], [0], [0], [1], [0, 0, 1, 1], [], []>} : vector<32x8xf32>, vector<8x2560xf32>, vector<32x2560xf32> -> vector<32x2560xf32>
    %c0_3 = arith.constant 0 : index
    %c0_4 = arith.constant 0 : index
    %3 = vector.load %arg5[%c0_3, %c0_4] : memref<32x363xf32, #tpu.memory_space<vmem>>, vector<32x363xf32>
    %c0_5 = arith.constant 0 : index
    %c0_6 = arith.constant 0 : index
    %c0_7 = arith.constant 0 : index
    %4 = vector.load %arg2[%c0_5, %c0_6, %c0_7] : memref<4x363x16xf32, #tpu.memory_space<vmem>>, vector<1x363x16xf32>
    %5 = vector.shape_cast %4 : vector<1x363x16xf32> to vector<363x16xf32>
    %cst_8 = arith.constant dense<0.000000e+00> : vector<32x16xf32>
    %6 = tpu.matmul %3, %5, %cst_8 {dimension_numbers = #tpu.dot_dimension_numbers<[1], [0], [0], [1], [0, 0, 1, 1], [], []>} : vector<32x363xf32>, vector<363x16xf32>, vector<32x16xf32> -> vector<32x16xf32>
    %c0_9 = arith.constant 0 : index
    %c0_10 = arith.constant 0 : index
    %7 = vector.load %arg3[%c0_9, %c0_10] : memref<16x640xf32, #tpu.memory_space<vmem>>, vector<16x640xf32>
    %cst_11 = arith.constant dense<0.000000e+00> : vector<32x640xf32>
    %8 = tpu.matmul %6, %7, %cst_11 {dimension_numbers = #tpu.dot_dimension_numbers<[1], [0], [0], [1], [0, 0, 1, 1], [], []>} : vector<32x16xf32>, vector<16x640xf32>, vector<32x640xf32> -> vector<32x640xf32>
    %c0_12 = arith.constant 0 : index
    %c0_13 = arith.constant 0 : index
    %9 = vector.load %arg5[%c0_12, %c0_13] : memref<32x363xf32, #tpu.memory_space<vmem>>, vector<32x363xf32>
    %c1 = arith.constant 1 : index
    %c0_14 = arith.constant 0 : index
    %c0_15 = arith.constant 0 : index
    %10 = vector.load %arg2[%c1, %c0_14, %c0_15] : memref<4x363x16xf32, #tpu.memory_space<vmem>>, vector<1x363x16xf32>
    %11 = vector.shape_cast %10 : vector<1x363x16xf32> to vector<363x16xf32>
    %cst_16 = arith.constant dense<0.000000e+00> : vector<32x16xf32>
    %12 = tpu.matmul %9, %11, %cst_16 {dimension_numbers = #tpu.dot_dimension_numbers<[1], [0], [0], [1], [0, 0, 1, 1], [], []>} : vector<32x363xf32>, vector<363x16xf32>, vector<32x16xf32> -> vector<32x16xf32>
    %c0_17 = arith.constant 0 : index
    %c0_18 = arith.constant 0 : index
    %13 = vector.load %arg3[%c0_17, %c0_18] : memref<16x640xf32, #tpu.memory_space<vmem>>, vector<16x640xf32>
    %cst_19 = arith.constant dense<0.000000e+00> : vector<32x640xf32>
    %14 = tpu.matmul %12, %13, %cst_19 {dimension_numbers = #tpu.dot_dimension_numbers<[1], [0], [0], [1], [0, 0, 1, 1], [], []>} : vector<32x16xf32>, vector<16x640xf32>, vector<32x640xf32> -> vector<32x640xf32>
    %c0_20 = arith.constant 0 : index
    %c0_21 = arith.constant 0 : index
    %15 = vector.load %arg5[%c0_20, %c0_21] : memref<32x363xf32, #tpu.memory_space<vmem>>, vector<32x363xf32>
    %c2 = arith.constant 2 : index
    %c0_22 = arith.constant 0 : index
    %c0_23 = arith.constant 0 : index
    %16 = vector.load %arg2[%c2, %c0_22, %c0_23] : memref<4x363x16xf32, #tpu.memory_space<vmem>>, vector<1x363x16xf32>
    %17 = vector.shape_cast %16 : vector<1x363x16xf32> to vector<363x16xf32>
    %cst_24 = arith.constant dense<0.000000e+00> : vector<32x16xf32>
    %18 = tpu.matmul %15, %17, %cst_24 {dimension_numbers = #tpu.dot_dimension_numbers<[1], [0], [0], [1], [0, 0, 1, 1], [], []>} : vector<32x363xf32>, vector<363x16xf32>, vector<32x16xf32> -> vector<32x16xf32>
    %c0_25 = arith.constant 0 : index
    %c0_26 = arith.constant 0 : index
    %19 = vector.load %arg3[%c0_25, %c0_26] : memref<16x640xf32, #tpu.memory_space<vmem>>, vector<16x640xf32>
    %cst_27 = arith.constant dense<0.000000e+00> : vector<32x640xf32>
    %20 = tpu.matmul %18, %19, %cst_27 {dimension_numbers = #tpu.dot_dimension_numbers<[1], [0], [0], [1], [0, 0, 1, 1], [], []>} : vector<32x16xf32>, vector<16x640xf32>, vector<32x640xf32> -> vector<32x640xf32>
    %c0_28 = arith.constant 0 : index
    %c0_29 = arith.constant 0 : index
    %21 = vector.load %arg5[%c0_28, %c0_29] : memref<32x363xf32, #tpu.memory_space<vmem>>, vector<32x363xf32>
    %c3 = arith.constant 3 : index
    %c0_30 = arith.constant 0 : index
    %c0_31 = arith.constant 0 : index
    %22 = vector.load %arg2[%c3, %c0_30, %c0_31] : memref<4x363x16xf32, #tpu.memory_space<vmem>>, vector<1x363x16xf32>
    %23 = vector.shape_cast %22 : vector<1x363x16xf32> to vector<363x16xf32>
    %cst_32 = arith.constant dense<0.000000e+00> : vector<32x16xf32>
    %24 = tpu.matmul %21, %23, %cst_32 {dimension_numbers = #tpu.dot_dimension_numbers<[1], [0], [0], [1], [0, 0, 1, 1], [], []>} : vector<32x363xf32>, vector<363x16xf32>, vector<32x16xf32> -> vector<32x16xf32>
    %c0_33 = arith.constant 0 : index
    %c0_34 = arith.constant 0 : index
    %25 = vector.load %arg3[%c0_33, %c0_34] : memref<16x640xf32, #tpu.memory_space<vmem>>, vector<16x640xf32>
    %cst_35 = arith.constant dense<0.000000e+00> : vector<32x640xf32>
    %26 = tpu.matmul %24, %25, %cst_35 {dimension_numbers = #tpu.dot_dimension_numbers<[1], [0], [0], [1], [0, 0, 1, 1], [], []>} : vector<32x16xf32>, vector<16x640xf32>, vector<32x640xf32> -> vector<32x640xf32>
    %27 = tpu.concatenate %8, %14, %20, %26 in 1 : vector<32x640xf32>, vector<32x640xf32>, vector<32x640xf32>, vector<32x640xf32> -> vector<32x2560xf32>
    %c0_36 = arith.constant 0 : index
    %c0_37 = arith.constant 0 : index
    %28 = vector.load %arg6[%c0_36, %c0_37] : memref<32x32xf32, #tpu.memory_space<vmem>>, vector<32x32xf32>
    %cst_38 = arith.constant 0.00999999977 : f32
    %29 = vector.broadcast %cst_38 : f32 to vector<32x2560xf32>
    %30 = arith.mulf %29, %2 : vector<32x2560xf32>
    %31 = arith.maximumf %2, %30 : vector<32x2560xf32>
    %cst_39 = arith.constant dense<0.000000e+00> : vector<32x2560xf32>
    %32 = tpu.matmul %28, %31, %cst_39 {dimension_numbers = #tpu.dot_dimension_numbers<[1], [0], [0], [1], [0, 0, 1, 1], [], []>} : vector<32x32xf32>, vector<32x2560xf32>, vector<32x2560xf32> -> vector<32x2560xf32>
    %c0_40 = arith.constant 0 : index
    %c0_41 = arith.constant 0 : index
    %33 = vector.load %arg7[%c0_40, %c0_41] : memref<32x32xf32, #tpu.memory_space<vmem>>, vector<32x32xf32>
    %cst_42 = arith.constant 0.00999999977 : f32
    %34 = vector.broadcast %cst_42 : f32 to vector<32x2560xf32>
    %35 = arith.mulf %34, %27 : vector<32x2560xf32>
    %36 = arith.maximumf %27, %35 : vector<32x2560xf32>
    %cst_43 = arith.constant dense<0.000000e+00> : vector<32x2560xf32>
    %37 = tpu.matmul %33, %36, %cst_43 {dimension_numbers = #tpu.dot_dimension_numbers<[1], [0], [0], [1], [0, 0, 1, 1], [], []>} : vector<32x32xf32>, vector<32x2560xf32>, vector<32x2560xf32> -> vector<32x2560xf32>
    %38 = arith.addf %32, %37 : vector<32x2560xf32>
    %c0_44 = arith.constant 0 : index
    %c0_45 = arith.constant 0 : index
    %39 = vector.load %arg8[%c0_44, %c0_45] : memref<16x32xf32, #tpu.memory_space<vmem>>, vector<16x32xf32>
    %cst_46 = arith.constant 0.00999999977 : f32
    %40 = vector.broadcast %cst_46 : f32 to vector<32x2560xf32>
    %41 = arith.mulf %40, %38 : vector<32x2560xf32>
    %42 = arith.maximumf %38, %41 : vector<32x2560xf32>
    %cst_47 = arith.constant dense<0.000000e+00> : vector<16x2560xf32>
    %43 = tpu.matmul %39, %42, %cst_47 {dimension_numbers = #tpu.dot_dimension_numbers<[1], [0], [0], [1], [0, 0, 1, 1], [], []>} : vector<16x32xf32>, vector<32x2560xf32>, vector<16x2560xf32> -> vector<16x2560xf32>
    %c0_48 = arith.constant 0 : index
    %c0_49 = arith.constant 0 : index
    %44 = vector.load %arg9[%c0_48, %c0_49] : memref<12x16xf32, #tpu.memory_space<vmem>>, vector<12x16xf32>
    %cst_50 = arith.constant 0.00999999977 : f32
    %45 = vector.broadcast %cst_50 : f32 to vector<16x2560xf32>
    %46 = arith.mulf %45, %43 : vector<16x2560xf32>
    %47 = arith.maximumf %43, %46 : vector<16x2560xf32>
    %cst_51 = arith.constant dense<0.000000e+00> : vector<12x2560xf32>
    %48 = tpu.matmul %44, %47, %cst_51 {dimension_numbers = #tpu.dot_dimension_numbers<[1], [0], [0], [1], [0, 0, 1, 1], [], []>} : vector<12x16xf32>, vector<16x2560xf32>, vector<12x2560xf32> -> vector<12x2560xf32>
    %49 = vector.extract_strided_slice %48 {offsets = [0, 0], sizes = [12, 1280], strides = [1, 1]} : vector<12x2560xf32> to vector<12x1280xf32>
    %50 = vector.extract_strided_slice %48 {offsets = [0, 1280], sizes = [12, 1280], strides = [1, 1]} : vector<12x2560xf32> to vector<12x1280xf32>
    %51 = arith.subf %49, %50 : vector<12x1280xf32>
    %52 = math.absf %51 : vector<12x1280xf32>
    %c0_52 = arith.constant 0 : index
    %c0_53 = arith.constant 0 : index
    %53 = vector.load %arg10[%c0_52, %c0_53] : memref<12x12xf32, #tpu.memory_space<vmem>>, vector<12x12xf32>
    %cst_54 = arith.constant dense<0.000000e+00> : vector<12x1280xf32>
    %54 = tpu.matmul %53, %52, %cst_54 {dimension_numbers = #tpu.dot_dimension_numbers<[1], [0], [0], [1], [0, 0, 1, 1], [], []>} : vector<12x12xf32>, vector<12x1280xf32>, vector<12x1280xf32> -> vector<12x1280xf32>
    %55 = arith.mulf %54, %52 : vector<12x1280xf32>
    %cst_55 = arith.constant dense<0.000000e+00> : vector<1280xf32>
    %56 = vector.multi_reduction <add>, %55, %cst_55 [0] : vector<12x1280xf32> to vector<1280xf32>
    %57 = vector.shape_cast %56 : vector<1280xf32> to vector<1x1280xf32>
    %cst_56 = arith.constant 9.99999993E-9 : f32
    %58 = vector.broadcast %cst_56 : f32 to vector<1x1280xf32>
    %59 = arith.addf %58, %57 : vector<1x1280xf32>
    %60 = math.sqrt %59 : vector<1x1280xf32>
    %61 = tpu.iota {dimensions = array<i32: 1>} : vector<1x640xi32>
    %c576_i32 = arith.constant 576 : i32
    %62 = vector.broadcast %c576_i32 : i32 to vector<1x640xi32>
    %63 = arith.cmpi slt, %61, %62 : vector<1x640xi32>
    %64 = tpu.iota {dimensions = array<i32: 1>} : vector<8x128xi32>
    %cst_57 = arith.constant 0.000000e+00 : f32
    %65 = vector.broadcast %cst_57 : f32 to vector<8x128xf32>
    %66 = vector.extract_strided_slice %60 {offsets = [0, 0], sizes = [1, 640], strides = [1, 1]} : vector<1x1280xf32> to vector<1x640xf32>
    %cst_58 = arith.constant 0.000000e+00 : f32
    %67 = vector.broadcast %cst_58 : f32 to vector<1x640xf32>
    %68 = arith.select %63, %66, %67 : vector<1x640xi1>, vector<1x640xf32>
    %69 = vector.shape_cast %68 : vector<1x640xf32> to vector<1x1x640xf32>
    %cst_59 = arith.constant dense<0.000000e+00> : vector<1xf32>
    %70 = vector.multi_reduction <add>, %69, %cst_59 [1, 2] : vector<1x1x640xf32> to vector<1xf32>
    %71 = vector.shape_cast %70 : vector<1xf32> to vector<1x1x1xf32>
    %72 = vector.extract %71[0, 0, 0] : f32 from vector<1x1x1xf32>
    %cst_60 = arith.constant 0.00173611112 : f32
    %73 = arith.mulf %72, %cst_60 : f32
    %c0_i32 = arith.constant 0 : i32
    %74 = vector.broadcast %c0_i32 : i32 to vector<8x128xi32>
    %75 = arith.cmpi eq, %64, %74 : vector<8x128xi32>
    %76 = vector.broadcast %73 : f32 to vector<8x128xf32>
    %77 = arith.select %75, %76, %65 : vector<8x128xi1>, vector<8x128xf32>
    %78 = vector.extract_strided_slice %60 {offsets = [0, 640], sizes = [1, 640], strides = [1, 1]} : vector<1x1280xf32> to vector<1x640xf32>
    %cst_61 = arith.constant 0.000000e+00 : f32
    %79 = vector.broadcast %cst_61 : f32 to vector<1x640xf32>
    %80 = arith.select %63, %78, %79 : vector<1x640xi1>, vector<1x640xf32>
    %81 = vector.shape_cast %80 : vector<1x640xf32> to vector<1x1x640xf32>
    %cst_62 = arith.constant dense<0.000000e+00> : vector<1xf32>
    %82 = vector.multi_reduction <add>, %81, %cst_62 [1, 2] : vector<1x1x640xf32> to vector<1xf32>
    %83 = vector.shape_cast %82 : vector<1xf32> to vector<1x1x1xf32>
    %84 = vector.extract %83[0, 0, 0] : f32 from vector<1x1x1xf32>
    %cst_63 = arith.constant 0.00173611112 : f32
    %85 = arith.mulf %84, %cst_63 : f32
    %c1_i32 = arith.constant 1 : i32
    %86 = vector.broadcast %c1_i32 : i32 to vector<8x128xi32>
    %87 = arith.cmpi eq, %64, %86 : vector<8x128xi32>
    %88 = vector.broadcast %85 : f32 to vector<8x128xf32>
    %89 = arith.select %87, %88, %77 : vector<8x128xi1>, vector<8x128xf32>
    %c0_64 = arith.constant 0 : index
    %c0_65 = arith.constant 0 : index
    %90 = vector.load %arg11[%c0_64, %c0_65] : memref<8x128xf32, #tpu.memory_space<vmem>>, vector<8x128xf32>
    tpu.vector_store %arg11[%c0_64, %c0_65], %89 {strides = array<i32>} : memref<8x128xf32, #tpu.memory_space<vmem>>, vector<8x128xf32>,
    return
  }
  func.func @transform_0(%arg0: i32) -> (i32, i32) {
    %c0_i32 = arith.constant 0 : i32
    %c0_i32_0 = arith.constant 0 : i32
    %c0_i32_1 = arith.constant 0 : i32
    return %c0_i32, %c0_i32_0 : i32, i32
  }
  func.func @transform_1(%arg0: i32) -> (i32, i32, i32) {
    %c0_i32 = arith.constant 0 : i32
    %c0_i32_0 = arith.constant 0 : i32
    %c0_i32_1 = arith.constant 0 : i32
    %c0_i32_2 = arith.constant 0 : i32
    return %c0_i32, %c0_i32_0, %c0_i32_1 : i32, i32, i32
  }
  func.func @transform_2(%arg0: i32) -> (i32, i32) {
    %c0_i32 = arith.constant 0 : i32
    %c0_i32_0 = arith.constant 0 : i32
    %c0_i32_1 = arith.constant 0 : i32
    return %c0_i32, %c0_i32_0 : i32, i32
  }
  func.func @transform_3(%arg0: i32) -> (i32, i32) {
    %c0_i32 = arith.constant 0 : i32
    %c0_i32_0 = arith.constant 0 : i32
    %c0_i32_1 = arith.constant 0 : i32
    return %c0_i32, %c0_i32_0 : i32, i32
  }
  func.func @transform_4(%arg0: i32) -> (i32, i32) {
    %c0_i32 = arith.constant 0 : i32
    %c0_i32_0 = arith.constant 0 : i32
    %c0_i32_1 = arith.constant 0 : i32
    return %c0_i32, %c0_i32_0 : i32, i32
  }
  func.func @transform_5(%arg0: i32) -> (i32, i32) {
    %c0_i32 = arith.constant 0 : i32
    %c0_i32_0 = arith.constant 0 : i32
    %c0_i32_1 = arith.constant 0 : i32
    return %c0_i32, %c0_i32_0 : i32, i32
  }
  func.func @transform_6(%arg0: i32) -> (i32, i32) {
    %c0_i32 = arith.constant 0 : i32
    %c0_i32_0 = arith.constant 0 : i32
    %c0_i32_1 = arith.constant 0 : i32
    return %c0_i32, %c0_i32_0 : i32, i32
  }
  func.func @transform_7(%arg0: i32) -> (i32, i32) {
    %c0_i32 = arith.constant 0 : i32
    %c0_i32_0 = arith.constant 0 : i32
    %c0_i32_1 = arith.constant 0 : i32
    return %c0_i32, %c0_i32_0 : i32, i32
  }
  func.func @transform_8(%arg0: i32) -> (i32, i32) {
    %c0_i32 = arith.constant 0 : i32
    %c0_i32_0 = arith.constant 0 : i32
    %c0_i32_1 = arith.constant 0 : i32
    return %c0_i32, %c0_i32_0 : i32, i32
  }
  func.func @transform_9(%arg0: i32) -> (i32, i32) {
    %c0_i32 = arith.constant 0 : i32
    %c0_i32_0 = arith.constant 0 : i32
    %c0_i32_1 = arith.constant 0 : i32
    return %c0_i32, %c0_i32_0 : i32, i32
  }
  func.func @transform_10(%arg0: i32) -> (i32, i32) {
    %c0_i32 = arith.constant 0 : i32
    %c0_i32_0 = arith.constant 0 : i32
    %c0_i32_1 = arith.constant 0 : i32
    return %c0_i32, %c0_i32_0 : i32, i32
  }
}

</mosaic_0001>

<bundles_post_ra>
// kernel: siamese_forward.1
= control target key start
LH: loop header
LB: loop body
LE: loop exit
PB: predicated region body
PF: predicated region fallthrough
CT: control target
= control target key end

     0   :  { %vm59_vm0 = vcmask 64512   ;;  %vm723_vm1 = vcmask 1042432   ;;  %vm710_vm2 = vcmask 875520   ;;  %vm824_vm3 = vcmask 130048   ;;  %s8692_s0 = inlined_call_operand.vmem [shape: f32[8,2560], index: 0, kind: input, shape index: {}]   ;;  %s8693_s3 = inlined_call_operand.vmem [shape: f32[32,8], index: 3, kind: input, shape index: {}]   ;;  %s8694_s1 = inlined_call_operand.vmem [shape: f32[4,363,16], index: 1, kind: input, shape index: {}]   ;;  %s8695_s4 = inlined_call_operand.vmem [shape: f32[32,363], index: 4, kind: input, shape index: {}]   ;;  %s8696_s2 = inlined_call_operand.vmem [shape: f32[16,640], index: 2, kind: input, shape index: {}]   ;;  %s8697_s6 = inlined_call_operand.vmem [shape: f32[32,32], index: 6, kind: input, shape index: {}]   ;;  %s8698_s5 = inlined_call_operand.vmem [shape: f32[32,32], index: 5, kind: input, shape index: {}]   ;;  %s8699_s7 = inlined_call_operand.vmem [shape: f32[16,32], index: 7, kind: input, shape index: {}]   ;;  %s8700_s8 = inlined_call_operand.vmem [shape: f32[12,16], index: 8, kind: input, shape index: {}]   ;;  %s8701_s9 = inlined_call_operand.vmem [shape: f32[12,12], index: 9, kind: input, shape index: {}]   ;;  %s8702_s10 = inlined_call_operand.vmem [shape: f32[8,128], index: 10, kind: output, shape index: {}]  }
   0x1   :  { %v39_v0 = vld [vmem:[%s8692_s0] sm:$0xff]  ;;  %v5851_v1 = vld [vmem:[%s8693_s3 + $0x18] sm:$0xff]  ;;  %v41_v2 = vld [vmem:[%s8692_s0 + $0x10] sm:$0xff]  ;;  %vm2192_vm4 = vcmask 261120   ;;  %vm4602_vm5 = vcmask 1043456   ;;  %vm4595_vm6 = vcmask 97280  }
   0x2   :  { %5752 = vmatpush.msra.mxu2 %v39_v0  ;;  %87 = vmatpush.msra.mxu0 %v39_v0  ;;  %v40_v3 = vld [vmem:[%s8692_s0 + $0x8] sm:$0xff]  ;;  %v5864_v4 = vld [vmem:[%s8693_s3] sm:$0xff]  ;;  %v45_v5 = vld [vmem:[%s8692_s0 + $0x30] sm:$0xff]  ;;  %vm5109_vm9 = vcmask 1040384  }
   0x3   :  { %5167 = vmatmul.msk.f32.vlgmr.msra.gmra.mxu2 %vm59_vm0, %v5851_v1  ;;  %116 = vmatpush.msra.mxu1 %v40_v3  ;;  %v5880_v6 = vld [vmem:[%s8693_s3 + $0x8] sm:$0xff]  ;;  %v43_v7 = vld [vmem:[%s8692_s0 + $0x20] sm:$0xff]  ;;  %v5897_v9 = vld [vmem:[%s8693_s3 + $0x10] sm:$0xff] }
   0x4   :  { %145 = vmatpush.msrb.mxu2 %v41_v2  ;;  %5164 = vmatmul.msk.f32.vlgmr.msra.gmra.mxu0 %vm59_vm0, %v5864_v4  ;;  %v44_v8 = vld [vmem:[%s8692_s0 + $0x28] sm:$0xff]  ;;  %v49_v10 = vld [vmem:[%s8692_s0 + $0x50] sm:$0xff]  ;;  %v47_v11 = vld [vmem:[%s8692_s0 + $0x40] sm:$0xff] }
   0x5   :  { %5168 = vmatmul.msk.f32.vlgmr.msra.gmra.mxu1 %vm59_vm0, %v5864_v4  ;;  %5753 = vmatpush.msra.mxu3 %v40_v3  ;;  %v48_v12 = vld [vmem:[%s8692_s0 + $0x48] sm:$0xff]  ;;  %v53_v13 = vld [vmem:[%s8692_s0 + $0x70] sm:$0xff]  ;;  %v51_v14 = vld [vmem:[%s8692_s0 + $0x60] sm:$0xff] }
   0x6   :  { %261 = vmatpush.msra.mxu2 %v45_v5  ;;  %5171 = vmatmul.msk.f32.vlgmr.msra.gmra.mxu3 %vm59_vm0, %v5851_v1  ;;  %v52_v15 = vld [vmem:[%s8692_s0 + $0x68] sm:$0xff]  ;;  %v57_v16 = vld [vmem:[%s8692_s0 + $0x90] sm:$0xff]  ;;  %v55_v17 = vld [vmem:[%s8692_s0 + $0x80] sm:$0xff] }
   0x7   :  { %232 = vmatpush.msrb.mxu1 %v44_v8  ;;  %203 = vmatpush.msrb.mxu0 %v43_v7  ;;  %v56_v18 = vld [vmem:[%s8692_s0 + $0x88] sm:$0xff]  ;;  %v42_v19 = vld [vmem:[%s8692_s0 + $0x18] sm:$0xff]  ;;  %v678_v23 = vld [vmem:[%s8694_s1 + $0x70] sm:$0xff] }
   0x8   :  { %v679_v20 = vld [vmem:[%s8694_s1 + $0x78] sm:$0xff]  ;;  %174 = vmatpush.msrb.mxu3 %v42_v19  ;;  %v709_v22 = vld [vmem:[%s8694_s1 + $0x168] sm:$0x7]  ;;  %v694_v24 = vld [vmem:[%s8694_s1 + $0xf0] sm:$0xff] }
   0x9   :  { %319 = vmatpush.msra.mxu0 %v47_v11  ;;  %348 = vmatpush.msra.mxu1 %v48_v12  ;;  %v695_v21 = vld [vmem:[%s8694_s1 + $0xf8] sm:$0xff]  ;;  %v708_v25 = vld [vmem:[%s8694_s1 + $0x160] sm:$0xff]  ;;  %v677_v26 = vld [vmem:[%s8694_s1 + $0x68] sm:$0xff] }
   0xa   :  { %v693_v27 = vld [vmem:[%s8694_s1 + $0xe8] sm:$0xff]  ;;  %v707_v28 = vld [vmem:[%s8694_s1 + $0x158] sm:$0xff]  ;;  %v676_v29 = vld [vmem:[%s8694_s1 + $0x60] sm:$0xff] }
   0xb   :  { %5172 = vmatmul.msk.f32.vlgmr.msrb.gmra.mxu2 %vm59_vm0, %v5864_v4  ;;  %v692_v30 = vld [vmem:[%s8694_s1 + $0xe0] sm:$0xff]  ;;  %v706_v31 = vld [vmem:[%s8694_s1 + $0x150] sm:$0xff]  ;;  %v675_v32 = vld [vmem:[%s8694_s1 + $0x58] sm:$0xff] }
   0xc   :  { %5165 = vmatmul.msk.f32.gmra.mxu0 %vm59_vm0, %v5880_v6  ;;  %377 = vmatpush.msrb.mxu2 %v49_v10  ;;  %v691_v33 = vld [vmem:[%s8694_s1 + $0xd8] sm:$0xff]  ;;  %v705_v34 = vld [vmem:[%s8694_s1 + $0x148] sm:$0xff]  ;;  %v690_v35 = vld [vmem:[%s8694_s1 + $0xd0] sm:$0xff] }
   0xd   :  { %5169 = vmatmul.msk.f32.gmra.mxu1 %vm59_vm0, %v5880_v6  ;;  %v674_v36 = vld [vmem:[%s8694_s1 + $0x50] sm:$0xff]  ;;  %v704_v37 = vld [vmem:[%s8694_s1 + $0x140] sm:$0xff]  ;;  %v689_v38 = vld [vmem:[%s8694_s1 + $0xc8] sm:$0xff] }
   0xe   :  { %5176 = vmatmul.msk.f32.vlgmr.msrb.gmra.mxu3 %vm59_vm0, %v5864_v4  ;;  %v673_v39 = vld [vmem:[%s8694_s1 + $0x48] sm:$0xff]  ;;  %v703_v40 = vld [vmem:[%s8694_s1 + $0x138] sm:$0xff]  ;;  %v688_v41 = vld [vmem:[%s8694_s1 + $0xc0] sm:$0xff] }
   0xf   :  { %v672_v42 = vld [vmem:[%s8694_s1 + $0x40] sm:$0xff]  ;;  %v702_v43 = vld [vmem:[%s8694_s1 + $0x130] sm:$0xff]  ;;  %v687_v44 = vld [vmem:[%s8694_s1 + $0xb8] sm:$0xff] }
  0x10   :  { %v671_v45 = vld [vmem:[%s8694_s1 + $0x38] sm:$0xff]  ;;  %v701_v47 = vld [vmem:[%s8694_s1 + $0x128] sm:$0xff]  ;;  %v670_v49 = vld [vmem:[%s8694_s1 + $0x30] sm:$0xff] }
  0x11   :  { %v686_v50 = vld [vmem:[%s8694_s1 + $0xb0] sm:$0xff]  ;;  %v700_v51 = vld [vmem:[%s8694_s1 + $0x120] sm:$0xff]  ;;  %v669_v52 = vld [vmem:[%s8694_s1 + $0x28] sm:$0xff] }
  0x12   :  { %v685_v53 = vld [vmem:[%s8694_s1 + $0xa8] sm:$0xff]  ;;  %v699_v55 = vld [vmem:[%s8694_s1 + $0x118] sm:$0xff]  ;;  %v668_v56 = vld [vmem:[%s8694_s1 + $0x20] sm:$0xff] }
  0x13   :  { %5173 = vmatmul.msk.f32.gmra.mxu2 %vm59_vm0, %v5880_v6  ;;  %v684_v57 = vld [vmem:[%s8694_s1 + $0xa0] sm:$0xff]  ;;  %v698_v59 = vld [vmem:[%s8694_s1 + $0x110] sm:$0xff]  ;;  %v667_v61 = vld [vmem:[%s8694_s1 + $0x18] sm:$0xff] }
  0x14   :  { %5166 = vmatmul.msk.f32.gmra.mxu0 %vm59_vm0, %v5897_v9  ;;  %v683_v62 = vld [vmem:[%s8694_s1 + $0x98] sm:$0xff]  ;;  %v697_v63 = vld [vmem:[%s8694_s1 + $0x108] sm:$0xff]  ;;  %v666_v0 = vld [vmem:[%s8694_s1 + $0x10] sm:$0xff] }
  0x15   :  { %5170 = vmatmul.msk.f32.gmra.mxu1 %vm59_vm0, %v5897_v9  ;;  %v682_v2 = vld [vmem:[%s8694_s1 + $0x90] sm:$0xff]  ;;  %v696_v3 = vld [vmem:[%s8694_s1 + $0x100] sm:$0xff]  ;;  %v665_v7 = vld [vmem:[%s8694_s1 + $0x8] sm:$0xff] }
  0x16   :  { %5177 = vmatmul.msk.f32.gmra.mxu3 %vm59_vm0, %v5880_v6  ;;  %v681_v8 = vld [vmem:[%s8694_s1 + $0x88] sm:$0xff]  ;;  %v46_v10 = vld [vmem:[%s8692_s0 + $0x38] sm:$0xff]  ;;  %v664_v11 = vld [vmem:[%s8694_s1] sm:$0xff] }
  0x17   :  { %290 = vmatpush.msra.mxu3 %v46_v10  ;;  %v6211_v19 = vld [vmem:[%s8695_s4 + $0x8] sm:$0xff] }
  0x1b   :  { %5174 = vmatmul.msk.f32.gmra.mxu2 %vm59_vm0, %v5897_v9 }
  0x1c   :  { %5180 = vmatmul.msk.f32.vlgmr.msrb.gmra.mxu0 %vm59_vm0, %v5864_v4 }
  0x1d   :  { %5184 = vmatmul.msk.f32.vlgmr.msrb.gmra.mxu1 %vm59_vm0, %v5864_v4  ;;  %435 = vmatpush.msrb.mxu0 %v51_v14 }
  0x1e   :  { %464 = vmatpush.msrb.mxu1 %v52_v15  ;;  %5178 = vmatmul.msk.f32.gmra.mxu3 %vm59_vm0, %v5897_v9 }
  0x23   :  { %5175 = vmatmul.msk.f32.gmra.mxu2 %vm59_vm0, %v5851_v1 }
  0x24   :  { %5181 = vmatmul.msk.f32.gmra.mxu0 %vm59_vm0, %v5880_v6 }
  0x25   :  { %5185 = vmatmul.msk.f32.gmra.mxu1 %vm59_vm0, %v5880_v6 }
  0x26   :  { %5179 = vmatmul.msk.f32.gmra.mxu3 %vm59_vm0, %v5851_v1 }
  0x2b   :  { %5188 = vmatmul.msk.f32.vlgmr.msra.gmra.mxu2 %vm59_vm0, %v5864_v4 }
  0x2c   :  { %5182 = vmatmul.msk.f32.gmra.mxu0 %vm59_vm0, %v5897_v9  ;;  %493 = vmatpush.msra.mxu2 %v53_v13  ;;  %v680_v13 = vld [vmem:[%s8694_s1 + $0x80] sm:$0xff] }
  0x2d   :  { %5186 = vmatmul.msk.f32.gmra.mxu1 %vm59_vm0, %v5897_v9 }
  0x2e   :  { %5192 = vmatmul.msk.f32.vlgmr.msra.gmra.mxu3 %vm59_vm0, %v5864_v4 }
  0x33   :  { %5189 = vmatmul.msk.f32.gmra.mxu2 %vm59_vm0, %v5880_v6 }
  0x34   :  { %5183 = vmatmul.msk.f32.gmra.mxu0 %vm59_vm0, %v5851_v1 }
  0x35   :  { %5187 = vmatmul.msk.f32.gmra.mxu1 %vm59_vm0, %v5851_v1 }
  0x36   :  { %5193 = vmatmul.msk.f32.gmra.mxu3 %vm59_vm0, %v5880_v6 }
  0x3b   :  { %5190 = vmatmul.msk.f32.gmra.mxu2 %vm59_vm0, %v5897_v9 }
  0x3c   :  { %5196 = vmatmul.msk.f32.vlgmr.msra.gmra.mxu0 %vm59_vm0, %v5864_v4 }
  0x3d   :  { %5200 = vmatmul.msk.f32.vlgmr.msra.gmra.mxu1 %vm59_vm0, %v5864_v4  ;;  %551 = vmatpush.msra.mxu0 %v55_v17  ;;  %v6204_v17 = vld [vmem:[%s8695_s4] sm:$0xff] }
  0x3e   :  { %580 = vmatpush.msra.mxu1 %v56_v18  ;;  %5194 = vmatmul.msk.f32.gmra.mxu3 %vm59_vm0, %v5897_v9 }
  0x43   :  { %5191 = vmatmul.msk.f32.gmra.mxu2 %vm59_vm0, %v5851_v1 }
  0x44   :  { %5197 = vmatmul.msk.f32.gmra.mxu0 %vm59_vm0, %v5880_v6 }
  0x45   :  { %5201 = vmatmul.msk.f32.gmra.mxu1 %vm59_vm0, %v5880_v6 }
  0x46   :  { %5195 = vmatmul.msk.f32.gmra.mxu3 %vm59_vm0, %v5851_v1 }
  0x4b   :  { %5204 = vmatmul.msk.f32.vlgmr.msrb.gmra.mxu2 %vm59_vm0, %v5864_v4 }
  0x4c   :  { %5198 = vmatmul.msk.f32.gmra.mxu0 %vm59_vm0, %v5897_v9  ;;  %609 = vmatpush.msrb.mxu2 %v57_v16 }
  0x4d   :  { %5202 = vmatmul.msk.f32.gmra.mxu1 %vm59_vm0, %v5897_v9 }
  0x53   :  { %5205 = vmatmul.msk.f32.gmra.mxu2 %vm59_vm0, %v5880_v6 }
  0x54   :  { %5199 = vmatmul.msk.f32.gmra.mxu0 %vm59_vm0, %v5851_v1 }
  0x55   :  { %5203 = vmatmul.msk.f32.gmra.mxu1 %vm59_vm0, %v5851_v1 }
  0x5b   :  { %5206 = vmatmul.msk.f32.gmra.mxu2 %vm59_vm0, %v5897_v9 }
  0x5c   :  { %5212 = vmatmul.msk.f32.vlgmr.msrb.gmra.mxu0 %vm59_vm0, %v5864_v4 }
  0x5d   :  { %5216 = vmatmul.msk.f32.vlgmr.msrb.gmra.mxu1 %vm59_vm0, %v5864_v4  ;;  %727 = vmatpush.msrb.mxu0 %v679_v20 }
  0x5e   :  { %756 = vmatpush.msrb.mxu1 %v695_v21 }
  0x5f   :  { %728 = vmatpush.msrb.mxu0 %v678_v23 }
  0x60   :  { %757 = vmatpush.msrb.mxu1 %v694_v24  ;;  %v6233_v24 = vld [vmem:[%s8695_s4 + $0x20] sm:$0xff] }
  0x61   :  { %729 = vmatpush.msrb.mxu0 %v677_v26  ;;  %v6246_v26 = vld [vmem:[%s8695_s4 + $0x10] sm:$0xff] }
  0x62   :  { %758 = vmatpush.msrb.mxu1 %v693_v27 }
  0x63   :  { %5207 = vmatmul.msk.f32.gmra.mxu2 %vm59_vm0, %v5851_v1  ;;  %730 = vmatpush.msrb.mxu0 %v676_v29 }
  0x64   :  { %5213 = vmatmul.msk.f32.gmra.mxu0 %vm59_vm0, %v5880_v6  ;;  %759 = vmatpush.msrb.mxu1 %v692_v30  ;;  %v6260_v30 = vld [vmem:[%s8695_s4 + $0x38] sm:$0xff] }
  0x65   :  { %5217 = vmatmul.msk.f32.gmra.mxu1 %vm59_vm0, %v5880_v6  ;;  %731 = vmatpush.msrb.mxu0 %v675_v32  ;;  %v50_v32 = vld [vmem:[%s8692_s0 + $0x58] sm:$0xff] }
  0x66   :  { %760 = vmatpush.msrb.mxu1 %v691_v33  ;;  %v6276_v33 = vld [vmem:[%s8695_s4 + $0x28] sm:$0xff]  ;;  %406 = vmatpush.msrb.mxu3 %v50_v32 }
  0x67   :  { %732 = vmatpush.msrb.mxu0 %v674_v36  ;;  %5208 = vmatmul.msk.f32.vlgmr.msrb.gmra.mxu3 %vm59_vm0, %v5864_v4 }
  0x68   :  { %761 = vmatpush.msrb.mxu1 %v690_v35  ;;  %v6283_v35 = vld [vmem:[%s8695_s4 + $0x48] sm:$0xff] }
  0x69   :  { %733 = vmatpush.msrb.mxu0 %v673_v39  ;;  %v6303_v39 = vld [vmem:[%s8695_s4 + $0x40] sm:$0xff] }
  0x6a   :  { %762 = vmatpush.msrb.mxu1 %v689_v38 }
  0x6b   :  { %5220 = vmatmul.msk.f32.vlgmr.msra.gmra.mxu2 %vm59_vm0, %v5864_v4  ;;  %734 = vmatpush.msrb.mxu0 %v672_v42 }
  0x6c   :  { %5214 = vmatmul.msk.f32.gmra.mxu0 %vm59_vm0, %v5897_v9  ;;  %5244 = vmatpush.msk.msra.mxu2 %vm723_vm1, %v709_v22  ;;  %v6226_v22 = vld [vmem:[%s8695_s4 + $0x18] sm:$0xff] }
  0x6d   :  { %5218 = vmatmul.msk.f32.gmra.mxu1 %vm59_vm0, %v5897_v9  ;;  %735 = vmatpush.msrb.mxu0 %v671_v45 }
  0x6e   :  { %788 = vmatpush.msra.mxu2 %v708_v25  ;;  %763 = vmatpush.msrb.mxu1 %v688_v41 }
  0x6f   :  { %736 = vmatpush.msrb.mxu0 %v670_v49  ;;  %5209 = vmatmul.msk.f32.gmra.mxu3 %vm59_vm0, %v5880_v6 }
  0x70   :  { %789 = vmatpush.msra.mxu2 %v707_v28  ;;  %764 = vmatpush.msrb.mxu1 %v687_v44  ;;  %v6253_v28 = vld [vmem:[%s8695_s4 + $0x30] sm:$0xff] }
  0x71   :  { %737 = vmatpush.msrb.mxu0 %v669_v52  ;;  %v54_v52 = vld [vmem:[%s8692_s0 + $0x78] sm:$0xff] }
  0x72   :  { %790 = vmatpush.msra.mxu2 %v706_v31  ;;  %765 = vmatpush.msrb.mxu1 %v686_v50 }
  0x73   :  { %5221 = vmatmul.msk.f32.gmra.mxu2 %vm59_vm0, %v5880_v6  ;;  %738 = vmatpush.msrb.mxu0 %v668_v56 }
  0x74   :  { %5215 = vmatmul.msk.f32.gmra.mxu0 %vm59_vm0, %v5851_v1  ;;  %791 = vmatpush.msra.mxu2 %v705_v34 }
  0x75   :  { %5219 = vmatmul.msk.f32.gmra.mxu1 %vm59_vm0, %v5851_v1  ;;  %739 = vmatpush.msrb.mxu0 %v667_v61 }
  0x76   :  { %792 = vmatpush.msra.mxu2 %v704_v37  ;;  %766 = vmatpush.msrb.mxu1 %v685_v53  ;;  %v6290_v37 = vld [vmem:[%s8695_s4 + $0x50] sm:$0xff] }
  0x77   :  { %740 = vmatpush.msrb.mxu0 %v666_v0  ;;  %5210 = vmatmul.msk.f32.gmra.mxu3 %vm59_vm0, %v5897_v9 }
  0x78   :  { %793 = vmatpush.msra.mxu2 %v703_v40  ;;  %767 = vmatpush.msrb.mxu1 %v684_v57 }
  0x79   :  { %741 = vmatpush.msrb.mxu0 %v665_v7  ;;  %522 = vmatpush.msra.mxu3 %v54_v52 }
  0x7a   :  { %794 = vmatpush.msra.mxu2 %v702_v43  ;;  %768 = vmatpush.msrb.mxu1 %v683_v62  ;;  %v6318_v43 = vld [vmem:[%s8695_s4 + $0x58] sm:$0xff] }
  0x7b   :  { %5222 = vmatmul.msk.f32.gmra.mxu2 %vm59_vm0, %v5897_v9  ;;  %742 = vmatpush.msrb.mxu0 %v664_v11 }
  0x7c   :  { %5228 = vmatmul.msk.f32.vlgmr.msra.gmra.mxu0 %vm59_vm0, %v5864_v4  ;;  %795 = vmatpush.msra.mxu2 %v701_v47 }
  0x7d   :  { %5232 = vmatmul.msk.f32.vlgmr.msra.gmra.mxu1 %vm59_vm0, %v5864_v4 }
  0x7e   :  { %796 = vmatpush.msra.mxu2 %v700_v51  ;;  %769 = vmatpush.msrb.mxu1 %v682_v2 }
  0x7f   :  { %5211 = vmatmul.msk.f32.gmra.mxu3 %vm59_vm0, %v5851_v1 }
  0x80   :  { %797 = vmatpush.msra.mxu2 %v699_v55  ;;  %770 = vmatpush.msrb.mxu1 %v681_v8  ;;  %v58_v8 = vld [vmem:[%s8692_s0 + $0x98] sm:$0xff] }
  0x81   :  { %v6094_v46 = vpop.f32.mrf.mxu0  ;;  %638 = vmatpush.msrb.mxu3 %v58_v8 }
  0x82   :  { %8781 = vst [vmem:[#allocation2_spill] sm:$0xff] %v6094_v46  ;;  %v6099_v48 = vpop.f32.mrf.mxu1  ;;  %798 = vmatpush.msra.mxu2 %v698_v59  ;;  %771 = vmatpush.msrb.mxu1 %v680_v13 }
  0x83   :  { %8782 = vst [vmem:[#allocation3_spill] sm:$0xff] %v6099_v48  ;;  %5223 = vmatmul.msk.f32.gmra.mxu2 %vm59_vm0, %v5851_v1 }
  0x84   :  { %5229 = vmatmul.msk.f32.gmra.mxu0 %vm59_vm0, %v5880_v6  ;;  %799 = vmatpush.msra.mxu2 %v697_v63 }
  0x85   :  { %5233 = vmatmul.msk.f32.gmra.mxu1 %vm59_vm0, %v5880_v6 }
  0x86   :  { %v6124_v54 = vpop.f32.mrf.mxu2  ;;  %800 = vmatpush.msra.mxu2 %v696_v3 }
  0x87   :  { %5224 = vmatmul.msk.f32.vlgmr.msra.gmra.mxu3 %vm59_vm0, %v5864_v4 }
  0x89   :  { %v6135_v58 = vpop.f32.mrf.mxu0 }
  0x8a   :  { %8783 = vst [vmem:[#allocation4_spill] sm:$0xff] %v6135_v58  ;;  %v6140_v60 = vpop.f32.mrf.mxu1 }
  0x8b   :  { %8784 = vst [vmem:[#allocation5_spill] sm:$0xff] %v6140_v60  ;;  %5236 = vmatmul.msk.f32.vlgmr.msrb.gmra.mxu2 %vm59_vm0, %v5864_v4 }
  0x8c   :  { %5230 = vmatmul.msk.f32.gmra.mxu0 %vm59_vm0, %v5897_v9 }
  0x8d   :  { %5234 = vmatmul.msk.f32.gmra.mxu1 %vm59_vm0, %v5897_v9 }
  0x8e   :  { %v6166_v5 = vpop.f32.mrf.mxu2 }
  0x8f   :  { %8785 = vst [vmem:[#allocation6_spill] sm:$0xff] %v6166_v5  ;;  %5225 = vmatmul.msk.f32.gmra.mxu3 %vm59_vm0, %v5880_v6  ;;  %v5342_v5 = vld [vmem:[%s8694_s1 + $0x2f0] sm:$0xff] }
  0x91   :  { %v6182_v12 = vpop.f32.mrf.mxu0 }
  0x92   :  { %8786 = vst [vmem:[#allocation7_spill] sm:$0xff] %v6182_v12  ;;  %v6187_v14 = vpop.f32.mrf.mxu1 }
  0x93   :  { %8787 = vst [vmem:[#allocation8_spill] sm:$0xff] %v6187_v14  ;;  %5237 = vmatmul.msk.f32.gmra.mxu2 %vm59_vm0, %v5880_v6 }
  0x94   :  { %5231 = vmatmul.msk.f32.gmra.mxu0 %vm59_vm0, %v5851_v1 }
  0x95   :  { %5235 = vmatmul.msk.f32.gmra.mxu1 %vm59_vm0, %v5851_v1 }
  0x96   :  { %v6195_v15 = vpop.f32.mrf.mxu2 }
  0x97   :  { %8788 = vst [vmem:[#allocation9_spill] sm:$0xff] %v6195_v15  ;;  %5226 = vmatmul.msk.f32.gmra.mxu3 %vm59_vm0, %v5897_v9 }
  0x99   :  { %v6199_v16 = vpop.f32.mrf.mxu0 }
  0x9a   :  { %8789 = vst [vmem:[#allocation10_spill] sm:$0xff] %v6199_v16  ;;  %v6206_v18 = vpop.f32.mrf.mxu1 }
  0x9b   :  { %8790 = vst [vmem:[#allocation11_spill] sm:$0xff] %v6206_v18  ;;  %5238 = vmatmul.msk.f32.gmra.mxu2 %vm59_vm0, %v5897_v9 }
  0x9c   :  { %743 = vmatmul.f32.vlgmr.msrb.gmra.mxu0 %v6204_v17 }
  0x9d   :  { %772 = vmatmul.f32.vlgmr.msrb.gmra.mxu1 %v6211_v19 }
  0x9e   :  { %v6217_v20 = vpop.f32.mrf.mxu2 }
  0x9f   :  { %8791 = vst [vmem:[#allocation12_spill] sm:$0xff] %v6217_v20  ;;  %5227 = vmatmul.msk.f32.gmra.mxu3 %vm59_vm0, %v5851_v1 }
  0xa1   :  { %v6221_v21 = vpop.f32.mrf.mxu0 }
  0xa2   :  { %8792 = vst [vmem:[#allocation13_spill] sm:$0xff] %v6221_v21  ;;  %v6228_v23 = vpop.f32.mrf.mxu1 }
  0xa3   :  { %8793 = vst [vmem:[#allocation14_spill] sm:$0xff] %v6228_v23  ;;  %5239 = vmatmul.msk.f32.gmra.mxu2 %vm59_vm0, %v5851_v1  ;;  %v5779_v23 = vld [vmem:[%s8695_s4 + $0x8] sm:$0xff] }
  0xa4   :  { %746 = vmatmul.f32.gmra.mxu0 %v6226_v22 }
  0xa5   :  { %775 = vmatmul.f32.gmra.mxu1 %v6233_v24 }
  0xa6   :  { %v6239_v25 = vpop.f32.mrf.mxu2 }
  0xa7   :  { %8794 = vst [vmem:[#allocation15_spill] sm:$0xff] %v6239_v25  ;;  %5240 = vmatmul.msk.f32.vlgmr.msrb.gmra.mxu3 %vm59_vm0, %v5864_v4  ;;  %v6403_v4 = vld [vmem:[%s8696_s2 + $0x40] sm:$0xff] }
  0xa8   :  { %938 = vmatpush.msrb.mxu2 %v6403_v4 }
  0xa9   :  { %v6248_v27 = vpop.f32.mrf.mxu0 }
  0xaa   :  { %8795 = vst [vmem:[#allocation16_spill] sm:$0xff] %v6248_v27  ;;  %v6255_v29 = vpop.f32.mrf.mxu1 }
  0xab   :  { %8796 = vst [vmem:[#allocation17_spill] sm:$0xff] %v6255_v29  ;;  %5245 = vmatmul.msk.f32.vlgmr.msra.gmra.mxu2 %vm710_vm2, %v6246_v26 }
  0xac   :  { %749 = vmatmul.f32.gmra.mxu0 %v6253_v28 }
  0xad   :  { %778 = vmatmul.f32.gmra.mxu1 %v6260_v30 }
  0xae   :  { %v6266_v31 = vpop.f32.mrf.mxu2 }
  0xaf   :  { %8797 = vst [vmem:[#allocation18_spill] sm:$0xff] %v6266_v31  ;;  %5241 = vmatmul.msk.f32.gmra.mxu3 %vm59_vm0, %v5880_v6  ;;  %v6409_v6 = vld [vmem:[%s8696_s2 + $0x28] sm:$0xff] }
  0xb0   :  { %851 = vmatpush.msra.mxu3 %v6409_v6 }
  0xb1   :  { %v6278_v34 = vpop.f32.mrf.mxu0 }
  0xb2   :  { %8798 = vst [vmem:[#allocation19_spill] sm:$0xff] %v6278_v34  ;;  %v6285_v36 = vpop.f32.mrf.mxu1 }
  0xb3   :  { %8799 = vst [vmem:[#allocation20_spill] sm:$0xff] %v6285_v36  ;;  %5246 = vmatmul.msk.f32.gmra.mxu2 %vm710_vm2, %v6276_v33 }
  0xb4   :  { %752 = vmatmul.f32.gmra.mxu0 %v6283_v35 }
  0xb5   :  { %781 = vmatmul.f32.gmra.mxu1 %v6290_v37 }
  0xb6   :  { %v6296_v38 = vpop.f32.mrf.mxu2 }
  0xb7   :  { %8800 = vst [vmem:[#allocation21_spill] sm:$0xff] %v6296_v38  ;;  %5242 = vmatmul.msk.f32.gmra.mxu3 %vm59_vm0, %v5897_v9  ;;  %v6419_v9 = vld [vmem:[%s8696_s2 + $0x38] sm:$0xff] }
  0xb8   :  { %909 = vmatpush.msra.mxu1 %v6419_v9 }
  0xb9   :  { %v6305_v40 = vpop.f32.mrf.mxu0 }
  0xba   :  { %8801 = vst [vmem:[#allocation22_spill] sm:$0xff] %v6305_v40  ;;  %v6307_v41 = vpop.f32.mrf.mxu1 }
  0xbb   :  { %8802 = vst [vmem:[#allocation23_spill] sm:$0xff] %v6307_v41  ;;  %5247 = vmatmul.msk.f32.gmra.mxu2 %vm710_vm2, %v6303_v39 }
  0xbe   :  { %v6311_v42 = vpop.f32.mrf.mxu2 }
  0xbf   :  { %8803 = vst [vmem:[#allocation24_spill] sm:$0xff] %v6311_v42  ;;  %5243 = vmatmul.msk.f32.gmra.mxu3 %vm59_vm0, %v5851_v1  ;;  %v6452_v1 = vld [vmem:[%s8696_s2 + $0x18] sm:$0xff] }
  0xc0   :  { %939 = vmatpush.msrb.mxu2 %v6452_v1 }
  0xc1   :  { %v6320_v44 = vpop.f32.mrf.mxu0 }
  0xc2   :  { %8804 = vst [vmem:[#allocation25_spill] sm:$0xff] %v6320_v44  ;;  %v6322_v45 = vpop.f32.mrf.mxu1  ;;  %v5384_v44 = vld [vmem:[%s8694_s1 + $0x440] sm:$0xff] }
  0xc3   :  { %8805 = vst [vmem:[#allocation26_spill] sm:$0xff] %v6322_v45  ;;  %5248 = vmatmul.msk.f32.gmra.mxu2 %vm710_vm2, %v6318_v43 }
  0xc6   :  { %v6326_v47 = vpop.f32.mrf.mxu2 }
  0xc7   :  { %8806 = vst [vmem:[#allocation27_spill] sm:$0xff] %v6326_v47  ;;  %v5343_v47 = vld [vmem:[%s8694_s1 + $0x2f8] sm:$0xff] }
  0xc9   :  { %v6330_v49 = vpop.f32.mrf.mxu0 }
  0xca   :  { %8807 = vst [vmem:[#allocation28_spill] sm:$0xff] %v6330_v49  ;;  %v6332_v50 = vpop.f32.mrf.mxu1  ;;  %v5381_v49 = vld [vmem:[%s8694_s1 + $0x428] sm:$0xff] }
  0xcb   :  { %8808 = vst [vmem:[#allocation29_spill] sm:$0xff] %v6332_v50 }
  0xce   :  { %v6334_v51 = vpop.f32.mrf.mxu2 }
  0xcf   :  { %8809 = vst [vmem:[#allocation30_spill] sm:$0xff] %v6334_v51  ;;  %v5306_v51 = vld [vmem:[%s8694_s1 + $0x298] sm:$0xff] }
  0xd1   :  { %v6341_v53 = vpop.f32.mrf.mxu0 }
  0xd2   :  { %8810 = vst [vmem:[#allocation31_spill] sm:$0xff] %v6341_v53  ;;  %v6343_v55 = vpop.f32.mrf.mxu1 }
  0xd3   :  { %8811 = vst [vmem:[#allocation32_spill] sm:$0xff] %v6343_v55 }
  0xd6   :  { %v6345_v56 = vpop.f32.mrf.mxu2 }
  0xd7   :  { %8812 = vst [vmem:[#allocation33_spill] sm:$0xff] %v6345_v56 }
  0xd9   :  { %v6349_v57 = vpop.f32.mrf.mxu0 }
  0xda   :  { %8813 = vst [vmem:[#allocation34_spill] sm:$0xff] %v6349_v57  ;;  %v6351_v59 = vpop.f32.mrf.mxu1 }
  0xdb   :  { %8814 = vst [vmem:[#allocation35_spill] sm:$0xff] %v6351_v59 }
  0xde   :  { %v6353_v61 = vpop.f32.mrf.mxu2 }
  0xdf   :  { %8815 = vst [vmem:[#allocation36_spill] sm:$0xff] %v6353_v61 }
  0xe1   :  { %v6357_v62 = vpop.f32.mrf.mxu0 }
  0xe2   :  { %8816 = vst [vmem:[#allocation37_spill] sm:$0xff] %v6357_v62  ;;  %v6359_v63 = vpop.f32.mrf.mxu1  ;;  %v5283_v62 = vld [vmem:[%s8694_s1 + $0x1e0] sm:$0xff] }
  0xe3   :  { %8817 = vst [vmem:[#allocation38_spill] sm:$0xff] %v6359_v63  ;;  %v5314_v63 = vld [vmem:[%s8694_s1 + $0x2d8] sm:$0x7] }
  0xe4   :  { %5315 = vmatpush.msk.msra.mxu2 %vm723_vm1, %v5314_v63  ;;  %v5297_v63 = vld [vmem:[%s8694_s1 + $0x250] sm:$0xff] }
  0xe6   :  { %v6361_v0 = vpop.f32.mrf.mxu2 }
  0xe7   :  { %8818 = vst [vmem:[#allocation39_spill] sm:$0xff] %v6361_v0 }
  0xe9   :  { %v6365_v2 = vpop.f32.mrf.mxu0 }
  0xea   :  { %8819 = vst [vmem:[#allocation40_spill] sm:$0xff] %v6365_v2  ;;  %v6367_v3 = vpop.f32.mrf.mxu1 }
  0xeb   :  { %8820 = vst [vmem:[#allocation41_spill] sm:$0xff] %v6367_v3  ;;  %v5313_v3 = vld [vmem:[%s8694_s1 + $0x2d0] sm:$0xff] }
  0xec   :  { %1093 = vmatpush.msra.mxu2 %v5313_v3  ;;  %v5311_v3 = vld [vmem:[%s8694_s1 + $0x2c0] sm:$0xff] }
  0xee   :  { %v6369_v7 = vpop.f32.mrf.mxu2 }
  0xef   :  { %8821 = vst [vmem:[#allocation42_spill] sm:$0xff] %v6369_v7 }
  0xf1   :  { %v6376_v10 = vpop.f32.mrf.mxu0 }
  0xf2   :  { %8822 = vst [vmem:[#allocation43_spill] sm:$0xff] %v6376_v10  ;;  %v6378_v11 = vpop.f32.mrf.mxu1  ;;  %v5312_v10 = vld [vmem:[%s8694_s1 + $0x2c8] sm:$0xff] }
  0xf3   :  { %8823 = vst [vmem:[#allocation44_spill] sm:$0xff] %v6378_v11  ;;  %v5298_v11 = vld [vmem:[%s8694_s1 + $0x258] sm:$0xff]  ;;  %1094 = vmatpush.msra.mxu2 %v5312_v10  ;;  %v5279_v10 = vld [vmem:[%s8694_s1 + $0x1c0] sm:$0xff] }
  0xf5   :  { %1095 = vmatpush.msra.mxu2 %v5311_v3 }
  0xf6   :  { %v6380_v13 = vpop.f32.mrf.mxu2 }
  0xf7   :  { %8824 = vst [vmem:[#allocation45_spill] sm:$0xff] %v6380_v13  ;;  %v6443_v13 = vld [vmem:[%s8696_s2 + $0x10] sm:$0xff] }
  0xf8   :  { %910 = vmatpush.msra.mxu1 %v6443_v13 }
  0xf9   :  { %v6384_v32 = vpop.f32.mrf.mxu0 }
  0xfa   :  { %8825 = vst [vmem:[#allocation46_spill] sm:$0xff] %v6384_v32  ;;  %v6386_v52 = vpop.f32.mrf.mxu1 }
  0xfb   :  { %8826 = vst [vmem:[#allocation47_spill] sm:$0xff] %v6386_v52  ;;  %v6414_v52 = vld [vmem:[%s8696_s2 + $0x30] sm:$0xff] }
  0xfc   :  { %880 = vmatpush.msra.mxu0 %v6414_v52 }
  0xfe   :  { %v6388_v7 = vpop.f32.mrf.mxu2 }
  0xff   :  { %8827 = vst [vmem:[#allocation48_spill] sm:$0xff] %v6388_v7 }
 0x101   :  { %v6392_v59 = vpop.f32.mrf.mxu0 }
 0x102   :  { %8828 = vst [vmem:[#allocation49_spill] sm:$0xff] %v6392_v59  ;;  %v6396_v57 = vpop.f32.mrf.mxu1  ;;  %v6433_v59 = vld [vmem:[%s8696_s2] sm:$0xff] }
 0x103   :  { %8830 = vst [vmem:[#allocation51_spill] sm:$0xff] %v6396_v57  ;;  %852 = vmatpush.msra.mxu3 %v6433_v59 }
 0x106   :  { %v6394_v8 = vpop.f32.mrf.mxu2 }
 0x107   :  { %8829 = vst [vmem:[#allocation50_spill] sm:$0xff] %v6394_v8  ;;  %v5284_v8 = vld [vmem:[%s8694_s1 + $0x1e8] sm:$0xff] }
 0x109   :  { %v6425_v57 = vpop.f32.mrf.mxu0 }
 0x10a   :  { %8832 = vst [vmem:[#allocation53_spill] sm:$0xff] %v6425_v57  ;;  %v6445_v57 = vpop.f32.mrf.mxu1 }
 0x10b   :  { %8833 = vst [vmem:[#allocation54_spill] sm:$0xff] %v6445_v57  ;;  %v5300_v57 = vld [vmem:[%s8694_s1 + $0x268] sm:$0xff] }
 0x10c   :  { %1061 = vmatpush.msrb.mxu1 %v5300_v57  ;;  %v5282_v57 = vld [vmem:[%s8694_s1 + $0x1d8] sm:$0xff] }
 0x10e   :  { %v6421_v32 = vpop.f32.mrf.mxu2 }
 0x10f   :  { %8831 = vst [vmem:[#allocation52_spill] sm:$0xff] %v6421_v32  ;;  %v6438_v32 = vld [vmem:[%s8696_s2 + $0x8] sm:$0xff] }
 0x110   :  { %881 = vmatpush.msra.mxu0 %v6438_v32 }
 0x111   :  { %v6477_v2 = vpop.f32.mrf.mxu0 }
 0x112   :  { %1032 = vmatpush.msrb.mxu0 %v5284_v8  ;;  %8835 = vst [vmem:[#allocation56_spill] sm:$0xff] %v6477_v2  ;;  %v6479_v8 = vpop.f32.mrf.mxu1  ;;  %v5308_v2 = vld [vmem:[%s8694_s1 + $0x2a8] sm:$0xff] }
 0x113   :  { %8836 = vst [vmem:[#allocation57_spill] sm:$0xff] %v6479_v8  ;;  %v5310_v8 = vld [vmem:[%s8694_s1 + $0x2b8] sm:$0xff] }
 0x114   :  { %1033 = vmatpush.msrb.mxu0 %v5283_v62  ;;  %v5281_v62 = vld [vmem:[%s8694_s1 + $0x1d0] sm:$0xff]  ;;  %1096 = vmatpush.msra.mxu2 %v5310_v8 }
 0x115   :  { %v5277_v8 = vld [vmem:[%s8694_s1 + $0x1b0] sm:$0xff] }
 0x116   :  { %v6456_v7 = vpop.f32.mrf.mxu2  ;;  %1034 = vmatpush.msrb.mxu0 %v5282_v57  ;;  %v5296_v57 = vld [vmem:[%s8694_s1 + $0x248] sm:$0xff] }
 0x117   :  { %8834 = vst [vmem:[#allocation55_spill] sm:$0xff] %v6456_v7  ;;  %v5299_v7 = vld [vmem:[%s8694_s1 + $0x260] sm:$0xff] }
 0x118   :  { %1062 = vmatpush.msrb.mxu1 %v5299_v7  ;;  %1035 = vmatpush.msrb.mxu0 %v5281_v62  ;;  %v5295_v62 = vld [vmem:[%s8694_s1 + $0x240] sm:$0xff] }
 0x119   :  { %v744_v3 = vpop.f32.mrf.mxu0 }
 0x11a   :  { %1063 = vmatpush.msrb.mxu1 %v5298_v11  ;;  %v5280_v11 = vld [vmem:[%s8694_s1 + $0x1c8] sm:$0xff] }
 0x11b   :  { %1036 = vmatpush.msrb.mxu0 %v5280_v11  ;;  %v5278_v11 = vld [vmem:[%s8694_s1 + $0x1b8] sm:$0xff] }
 0x11c   :  { %1064 = vmatpush.msrb.mxu1 %v5297_v63  ;;  %v5309_v63 = vld [vmem:[%s8694_s1 + $0x2b0] sm:$0xff] }
 0x11d   :  { %1037 = vmatpush.msrb.mxu0 %v5279_v10  ;;  %1097 = vmatpush.msra.mxu2 %v5309_v63  ;;  %v5293_v10 = vld [vmem:[%s8694_s1 + $0x230] sm:$0xff] }
 0x11e   :  { %v6499_v7 = vpop.f32.mrf.mxu2  ;;  %1065 = vmatpush.msrb.mxu1 %v5296_v57  ;;  %v5294_v57 = vld [vmem:[%s8694_s1 + $0x238] sm:$0xff] }
 0x11f   :  { %8837 = vst [vmem:[#allocation58_spill] sm:$0xff] %v6499_v7  ;;  %v773_v7 = vpop.f32.mrf.mxu1  ;;  %1038 = vmatpush.msrb.mxu0 %v5278_v11  ;;  %1098 = vmatpush.msra.mxu2 %v5308_v2  ;;  %v5276_v11 = vld [vmem:[%s8694_s1 + $0x1a8] sm:$0xff]  ;;  %v5275_v2 = vld [vmem:[%s8694_s1 + $0x1a0] sm:$0xff] }
 0x120   :  { %1066 = vmatpush.msrb.mxu1 %v5295_v62  ;;  %v5307_v62 = vld [vmem:[%s8694_s1 + $0x2a0] sm:$0xff] }
 0x121   :  { %1039 = vmatpush.msrb.mxu0 %v5277_v8  ;;  %1099 = vmatpush.msra.mxu2 %v5307_v62  ;;  %v5291_v8 = vld [vmem:[%s8694_s1 + $0x220] sm:$0xff]  ;;  %v5274_v62 = vld [vmem:[%s8694_s1 + $0x198] sm:$0xff]  ;;  %v747_v56 = vpop.f32.mrf.mxu0 }
 0x122   :  { %1067 = vmatpush.msrb.mxu1 %v5294_v57  ;;  %v5292_v57 = vld [vmem:[%s8694_s1 + $0x228] sm:$0xff] }
 0x123   :  { %1040 = vmatpush.msrb.mxu0 %v5276_v11  ;;  %1100 = vmatpush.msra.mxu2 %v5306_v51  ;;  %v5290_v11 = vld [vmem:[%s8694_s1 + $0x218] sm:$0xff]  ;;  %v5273_v51 = vld [vmem:[%s8694_s1 + $0x190] sm:$0xff] }
 0x124   :  { %1068 = vmatpush.msrb.mxu1 %v5293_v10  ;;  %v5305_v10 = vld [vmem:[%s8694_s1 + $0x290] sm:$0xff] }
 0x125   :  { %1041 = vmatpush.msrb.mxu0 %v5275_v2  ;;  %1101 = vmatpush.msra.mxu2 %v5305_v10  ;;  %v5289_v2 = vld [vmem:[%s8694_s1 + $0x210] sm:$0xff] }
 0x126   :  { %v6537_v63 = vpop.f32.mrf.mxu2  ;;  %1069 = vmatpush.msrb.mxu1 %v5292_v57  ;;  %v5304_v57 = vld [vmem:[%s8694_s1 + $0x288] sm:$0xff] }
 0x127   :  { %8838 = vst [vmem:[#allocation59_spill] sm:$0xff] %v6537_v63  ;;  %v774_v63 = vadd.f32 %v773_v7, %v744_v3  ;;  %1042 = vmatpush.msrb.mxu0 %v5274_v62  ;;  %v776_v10 = vpop.f32.mrf.mxu1  ;;  %1102 = vmatpush.msra.mxu2 %v5304_v57  ;;  %v6578_v7 = vld [vmem:[%s8696_s2 + $0x48] sm:$0xff]  ;;  %v6592_v57 = vld [vmem:[%s8696_s2 + $0x20] sm:$0xff] }
 0x128   :  { %1070 = vmatpush.msrb.mxu1 %v5291_v8  ;;  %v5303_v8 = vld [vmem:[%s8694_s1 + $0x280] sm:$0xff]  ;;  %v5272_v3 = vld [vmem:[%s8694_s1 + $0x188] sm:$0xff]  ;;  %967 = vmatpush.msrb.mxu3 %v6578_v7 }
 0x129   :  { %v5288_v62 = vld [vmem:[%s8694_s1 + $0x208] sm:$0xff]  ;;  %1043 = vmatpush.msrb.mxu0 %v5273_v51  ;;  %1103 = vmatpush.msra.mxu2 %v5303_v8  ;;  %v5271_v51 = vld [vmem:[%s8694_s1 + $0x180] sm:$0xff]  ;;  %v5286_v8 = vld [vmem:[%s8694_s1 + $0x1f8] sm:$0xff]  ;;  %v750_v41 = vpop.f32.mrf.mxu0 }
 0x12a   :  { %1071 = vmatpush.msrb.mxu1 %v5290_v11  ;;  %v5302_v11 = vld [vmem:[%s8694_s1 + $0x278] sm:$0xff]  ;;  %968 = vmatpush.msrb.mxu3 %v6592_v57 }
 0x12b   :  { %1044 = vmatpush.msrb.mxu0 %v5272_v3  ;;  %1104 = vmatpush.msra.mxu2 %v5302_v11  ;;  %v777_v3 = vadd.f32 %v776_v10, %v747_v56  ;;  %v5285_v11 = vld [vmem:[%s8694_s1 + $0x1f0] sm:$0xff] }
 0x12c   :  { %1072 = vmatpush.msrb.mxu1 %v5289_v2  ;;  %v5287_v2 = vld [vmem:[%s8694_s1 + $0x200] sm:$0xff] }
 0x12d   :  { %1045 = vmatpush.msrb.mxu0 %v5271_v51 }
 0x12e   :  { %v802_v61 = vpop.f32.mrf.mxu2  ;;  %1073 = vmatpush.msrb.mxu1 %v5288_v62  ;;  %v5269_v62 = vld [vmem:[%s8694_s1 + $0x170] sm:$0xff] }
 0x12f   :  { %v803_v0 = vadd.f32 %v802_v61, %v774_v63  ;;  %v5301_v61 = vld [vmem:[%s8694_s1 + $0x270] sm:$0xff]  ;;  %v5270_v63 = vld [vmem:[%s8694_s1 + $0x178] sm:$0xff]  ;;  %v779_v45 = vpop.f32.mrf.mxu1 }
 0x130   :  { %1074 = vmatpush.msrb.mxu1 %v5287_v2  ;;  %1105 = vmatpush.msra.mxu2 %v5301_v61  ;;  %v780_v10 = vadd.f32 %v779_v45, %v750_v41 }
 0x131   :  { %5249 = vmatmul.msk.f32.vlgmr.msra.gmra.mxu3 %vm824_vm3, %v803_v0  ;;  %5253 = vmatmul.msk.f32.vlgmr.msra.gmra.mxu0 %vm824_vm3, %v803_v0  ;;  %v753_v2 = vpop.f32.mrf.mxu0 }
 0x132   :  { %5257 = vmatmul.msk.f32.vlgmr.msra.gmra.mxu1 %vm824_vm3, %v803_v0  ;;  %5261 = vmatmul.msk.f32.vlgmr.msrb.gmra.mxu2 %vm824_vm3, %v803_v0 }
 0x133   :  { %1145 = vmatpush.msra.mxu3 %v6409_v6  ;;  %1046 = vmatpush.msrb.mxu0 %v5270_v63  ;;  %v6633_v63 = vpop.f32.mrf.mxu3 }
 0x134   :  { %1075 = vmatpush.msrb.mxu1 %v5286_v8  ;;  %1232 = vmatpush.msrb.mxu2 %v6403_v4 }
 0x135   :  { %1146 = vmatpush.msra.mxu3 %v6433_v59  ;;  %1047 = vmatpush.msrb.mxu0 %v5269_v62 }
 0x136   :  { %v805_v40 = vpop.f32.mrf.mxu2  ;;  %1076 = vmatpush.msrb.mxu1 %v5285_v11  ;;  %1233 = vmatpush.msrb.mxu2 %v6452_v1 }
 0x137   :  { %v806_v56 = vadd.f32 %v805_v40, %v777_v3  ;;  %1174 = vmatpush.msra.mxu0 %v6414_v52  ;;  %v782_v61 = vpop.f32.mrf.mxu1 }
 0x138   :  { %1203 = vmatpush.msra.mxu1 %v6419_v9  ;;  %v783_v41 = vadd.f32 %v782_v61, %v753_v2 }
 0x139   :  { %5250 = vmatmul.msk.f32.gmra.mxu3 %vm824_vm3, %v806_v56  ;;  %5254 = vmatmul.msk.f32.gmra.mxu0 %vm824_vm3, %v806_v56 }
 0x13a   :  { %5258 = vmatmul.msk.f32.gmra.mxu1 %vm824_vm3, %v806_v56  ;;  %5262 = vmatmul.msk.f32.gmra.mxu2 %vm824_vm3, %v806_v56 }
 0x13b   :  { %1175 = vmatpush.msra.mxu0 %v6438_v32  ;;  %1204 = vmatpush.msra.mxu1 %v6443_v13  ;;  %v6643_v3 = vpop.f32.mrf.mxu3 }
 0x13c   :  { %8839 = vst [vmem:[#allocation60_spill] sm:$0xff] %v6643_v3 }
 0x13e   :  { %v808_v40 = vpop.f32.mrf.mxu2 }
 0x13f   :  { %v809_v51 = vadd.f32 %v808_v40, %v780_v10 }
 0x141   :  { %5251 = vmatmul.msk.f32.gmra.mxu3 %vm824_vm3, %v809_v51  ;;  %5255 = vmatmul.msk.f32.gmra.mxu0 %vm824_vm3, %v809_v51 }
 0x142   :  { %5259 = vmatmul.msk.f32.gmra.mxu1 %vm824_vm3, %v809_v51  ;;  %5263 = vmatmul.msk.f32.gmra.mxu2 %vm824_vm3, %v809_v51 }
 0x143   :  { %v6651_v62 = vpop.f32.mrf.mxu3 }
 0x144   :  { %8840 = vst [vmem:[#allocation61_spill] sm:$0xff] %v6651_v62 }
 0x146   :  { %v811_v45 = vpop.f32.mrf.mxu2 }
 0x147   :  { %v812_v8 = vadd.f32 %v811_v45, %v783_v41  ;;  %v5355_v41 = vld [vmem:[%s8694_s1 + $0x358] sm:$0xff] }
 0x148   :  { %v5371_v45 = vld [vmem:[%s8694_s1 + $0x3d8] sm:$0xff] }
 0x149   :  { %5252 = vmatmul.msk.f32.gmra.mxu3 %vm824_vm3, %v812_v8  ;;  %5256 = vmatmul.msk.f32.gmra.mxu0 %vm824_vm3, %v812_v8 }
 0x14a   :  { %5260 = vmatmul.msk.f32.gmra.mxu1 %vm824_vm3, %v812_v8  ;;  %5264 = vmatmul.msk.f32.gmra.mxu2 %vm824_vm3, %v812_v8 }
 0x151   :  { %5265 = vmatmul.msk.f32.vlgmr.msrb.gmra.mxu3 %vm824_vm3, %v803_v0  ;;  %1048 = vmatmul.f32.vlgmr.msrb.gmra.mxu0 %v6204_v17  ;;  %v6659_v0 = vpop.f32.mrf.mxu3 }
 0x152   :  { %5316 = vmatmul.msk.f32.vlgmr.msra.gmra.mxu2 %vm710_vm2, %v6246_v26  ;;  %1077 = vmatmul.f32.vlgmr.msrb.gmra.mxu1 %v6211_v19  ;;  %8841 = vst [vmem:[#allocation62_spill] sm:$0xff] %v6659_v0  ;;  %v5354_v0 = vld [vmem:[%s8694_s1 + $0x350] sm:$0xff] }
 0x153   :  { %1261 = vmatpush.msrb.mxu3 %v6578_v7  ;;  %1326 = vmatpush.msrb.mxu0 %v5355_v41  ;;  %v5353_v41 = vld [vmem:[%s8694_s1 + $0x348] sm:$0xff] }
 0x154   :  { %1355 = vmatpush.msrb.mxu1 %v5371_v45  ;;  %v5369_v45 = vld [vmem:[%s8694_s1 + $0x3c8] sm:$0xff] }
 0x155   :  { %1262 = vmatpush.msrb.mxu3 %v6592_v57  ;;  %1327 = vmatpush.msrb.mxu0 %v5354_v0  ;;  %v5352_v0 = vld [vmem:[%s8694_s1 + $0x340] sm:$0xff] }
 0x157   :  { %1328 = vmatpush.msrb.mxu0 %v5353_v41  ;;  %v5351_v41 = vld [vmem:[%s8694_s1 + $0x338] sm:$0xff] }
 0x159   :  { %5266 = vmatmul.msk.f32.gmra.mxu3 %vm824_vm3, %v806_v56  ;;  %1051 = vmatmul.f32.gmra.mxu0 %v6226_v22  ;;  %v6666_v11 = vpop.f32.mrf.mxu3 }
 0x15a   :  { %5317 = vmatmul.msk.f32.gmra.mxu2 %vm710_vm2, %v6276_v33  ;;  %1080 = vmatmul.f32.gmra.mxu1 %v6233_v24  ;;  %8842 = vst [vmem:[#allocation63_spill] sm:$0xff] %v6666_v11  ;;  %v5370_v11 = vld [vmem:[%s8694_s1 + $0x3d0] sm:$0xff] }
 0x15b   :  { %1356 = vmatpush.msrb.mxu1 %v5370_v11  ;;  %v5382_v11 = vld [vmem:[%s8694_s1 + $0x430] sm:$0xff]  ;;  %1329 = vmatpush.msrb.mxu0 %v5352_v0 }
 0x15c   :  { %v5350_v0 = vld [vmem:[%s8694_s1 + $0x330] sm:$0xff] }
 0x15d   :  { %1357 = vmatpush.msrb.mxu1 %v5369_v45  ;;  %v5367_v45 = vld [vmem:[%s8694_s1 + $0x3b8] sm:$0xff]  ;;  %1330 = vmatpush.msrb.mxu0 %v5351_v41  ;;  %v5349_v41 = vld [vmem:[%s8694_s1 + $0x328] sm:$0xff] }
 0x15f   :  { %1331 = vmatpush.msrb.mxu0 %v5350_v0  ;;  %v5348_v0 = vld [vmem:[%s8694_s1 + $0x320] sm:$0xff] }
 0x161   :  { %5267 = vmatmul.msk.f32.gmra.mxu3 %vm824_vm3, %v809_v51  ;;  %1054 = vmatmul.f32.gmra.mxu0 %v6253_v28  ;;  %v6759_v53 = vpop.f32.mrf.mxu3 }
 0x162   :  { %5318 = vmatmul.msk.f32.gmra.mxu2 %vm710_vm2, %v6303_v39  ;;  %1083 = vmatmul.f32.gmra.mxu1 %v6260_v30  ;;  %8843 = vst [vmem:[#allocation64_spill] sm:$0xff] %v6759_v53  ;;  %v5377_v53 = vld [vmem:[%s8694_s1 + $0x408] sm:$0xff] }
 0x163   :  { %1332 = vmatpush.msrb.mxu0 %v5349_v41  ;;  %v5347_v41 = vld [vmem:[%s8694_s1 + $0x318] sm:$0xff] }
 0x165   :  { %1333 = vmatpush.msrb.mxu0 %v5348_v0  ;;  %v5346_v0 = vld [vmem:[%s8694_s1 + $0x310] sm:$0xff] }
 0x167   :  { %1334 = vmatpush.msrb.mxu0 %v5347_v41  ;;  %v5345_v41 = vld [vmem:[%s8694_s1 + $0x308] sm:$0xff] }
 0x169   :  { %5268 = vmatmul.msk.f32.gmra.mxu3 %vm824_vm3, %v812_v8  ;;  %1057 = vmatmul.f32.gmra.mxu0 %v6283_v35  ;;  %v5385_v8 = vld [vmem:[%s8694_s1 + $0x448] sm:$0x7] }
 0x16a   :  { %5319 = vmatmul.msk.f32.gmra.mxu2 %vm710_vm2, %v6318_v43  ;;  %1086 = vmatmul.f32.gmra.mxu1 %v6290_v37 }
 0x16b   :  { %5386 = vmatpush.msk.msra.mxu2 %vm723_vm1, %v5385_v8  ;;  %v5383_v8 = vld [vmem:[%s8694_s1 + $0x438] sm:$0xff]  ;;  %1335 = vmatpush.msrb.mxu0 %v5346_v0  ;;  %v5344_v0 = vld [vmem:[%s8694_s1 + $0x300] sm:$0xff] }
 0x16d   :  { %1387 = vmatpush.msra.mxu2 %v5384_v44  ;;  %v5368_v44 = vld [vmem:[%s8694_s1 + $0x3c0] sm:$0xff]  ;;  %1336 = vmatpush.msrb.mxu0 %v5345_v41  ;;  %v5373_v41 = vld [vmem:[%s8694_s1 + $0x3e8] sm:$0xff] }
 0x16e   :  { %1358 = vmatpush.msrb.mxu1 %v5368_v44  ;;  %v5366_v44 = vld [vmem:[%s8694_s1 + $0x3b0] sm:$0xff] }
 0x16f   :  { %1388 = vmatpush.msra.mxu2 %v5383_v8  ;;  %1337 = vmatpush.msrb.mxu0 %v5344_v0  ;;  %v5358_v0 = vld [vmem:[%s8694_s1 + $0x370] sm:$0xff] }
 0x170   :  { %1359 = vmatpush.msrb.mxu1 %v5367_v45  ;;  %v5379_v45 = vld [vmem:[%s8694_s1 + $0x418] sm:$0xff] }
 0x171   :  { %1389 = vmatpush.msra.mxu2 %v5382_v11  ;;  %v5380_v11 = vld [vmem:[%s8694_s1 + $0x420] sm:$0xff]  ;;  %1338 = vmatpush.msrb.mxu0 %v5343_v47  ;;  %v5341_v47 = vld [vmem:[%s8694_s1 + $0x2e8] sm:$0xff] }
 0x172   :  { %1360 = vmatpush.msrb.mxu1 %v5366_v44  ;;  %v5364_v44 = vld [vmem:[%s8694_s1 + $0x3a0] sm:$0xff] }
 0x173   :  { %1390 = vmatpush.msra.mxu2 %v5381_v49  ;;  %v5365_v49 = vld [vmem:[%s8694_s1 + $0x3a8] sm:$0xff]  ;;  %1339 = vmatpush.msrb.mxu0 %v5342_v5 }
 0x174   :  { %1361 = vmatpush.msrb.mxu1 %v5365_v49  ;;  %v5363_v49 = vld [vmem:[%s8694_s1 + $0x398] sm:$0xff] }
 0x175   :  { %1391 = vmatpush.msra.mxu2 %v5380_v11  ;;  %v5378_v11 = vld [vmem:[%s8694_s1 + $0x410] sm:$0xff]  ;;  %1340 = vmatpush.msrb.mxu0 %v5341_v47 }
 0x176   :  { %1362 = vmatpush.msrb.mxu1 %v5364_v44  ;;  %v5362_v44 = vld [vmem:[%s8694_s1 + $0x390] sm:$0xff] }
 0x177   :  { %1392 = vmatpush.msra.mxu2 %v5379_v45 }
 0x178   :  { %1363 = vmatpush.msrb.mxu1 %v5363_v49  ;;  %v5375_v49 = vld [vmem:[%s8694_s1 + $0x3f8] sm:$0xff] }
 0x179   :  { %1393 = vmatpush.msra.mxu2 %v5378_v11  ;;  %v5376_v11 = vld [vmem:[%s8694_s1 + $0x400] sm:$0xff] }
 0x17a   :  { %1364 = vmatpush.msrb.mxu1 %v5362_v44  ;;  %v5360_v44 = vld [vmem:[%s8694_s1 + $0x380] sm:$0xff] }
 0x17b   :  { %1394 = vmatpush.msra.mxu2 %v5377_v53  ;;  %v5361_v53 = vld [vmem:[%s8694_s1 + $0x388] sm:$0xff] }
 0x17c   :  { %1365 = vmatpush.msrb.mxu1 %v5361_v53 }
 0x17d   :  { %1395 = vmatpush.msra.mxu2 %v5376_v11  ;;  %v5374_v11 = vld [vmem:[%s8694_s1 + $0x3f0] sm:$0xff] }
 0x17e   :  { %1366 = vmatpush.msrb.mxu1 %v5360_v44  ;;  %v5357_v44 = vld [vmem:[%s8694_s1 + $0x368] sm:$0xff] }
 0x17f   :  { %1396 = vmatpush.msra.mxu2 %v5375_v49 }
 0x181   :  { %1397 = vmatpush.msra.mxu2 %v5374_v11 }
 0x183   :  { %1398 = vmatpush.msra.mxu2 %v5373_v41  ;;  %v5356_v41 = vld [vmem:[%s8694_s1 + $0x360] sm:$0xff] }
 0x1ae   :  { %v6673_v56 = vpop.f32.mrf.mxu0 }
 0x1af   :  { %v6675_v10 = vpop.f32.mrf.mxu1 }
 0x1b5   :  { %v6677_v40 = vpop.f32.mrf.mxu2 }
 0x1b6   :  { %v6679_v51 = vpop.f32.mrf.mxu0  ;;  %v2035_v20 = vmul.f32 0.01, %v6677_v40 }
 0x1b7   :  { %v6681_v2 = vpop.f32.mrf.mxu1 }
 0x1bd   :  { %v6683_v61 = vpop.f32.mrf.mxu2 }
 0x1be   :  { %v6694_v3 = vpop.f32.mrf.mxu0 }
 0x1bf   :  { %v6696_v62 = vpop.f32.mrf.mxu1 }
 0x1c5   :  { %v6726_v50 = vpop.f32.mrf.mxu2 }
 0x1c6   :  { %v6737_v55 = vpop.f32.mrf.mxu0  ;;  %v2075_v15 = vmul.f32 0.01, %v6726_v50 }
 0x1c7   :  { %v6739_v8 = vpop.f32.mrf.mxu1 }
 0x1cd   :  { %v6770_v31 = vpop.f32.mrf.mxu2 }
 0x1ce   :  { %v1049_v38 = vpop.f32.mrf.mxu0 }
 0x1cf   :  { %v1078_v45 = vpop.f32.mrf.mxu1 }
 0x1d0   :  { %v1079_v42 = vadd.f32 %v1078_v45, %v1049_v38  ;;  %v5359_v38 = vld [vmem:[%s8694_s1 + $0x378] sm:$0xff]  ;;  %v6814_v45 = vpop.f32.mrf.mxu3 }
 0x1d1   :  { %8844 = vst [vmem:[#allocation65_spill] sm:$0xff] %v6814_v45  ;;  %1367 = vmatpush.msrb.mxu1 %v5359_v38  ;;  %v5340_v38 = vld [vmem:[%s8694_s1 + $0x2e0] sm:$0xff]  ;;  %v5443_v45 = vld [vmem:[%s8694_s1 + $0x550] sm:$0xff] }
 0x1d2   :  { %1341 = vmatpush.msrb.mxu0 %v5340_v38 }
 0x1d3   :  { %1368 = vmatpush.msrb.mxu1 %v5358_v0 }
 0x1d5   :  { %v1107_v53 = vpop.f32.mrf.mxu2  ;;  %1369 = vmatpush.msrb.mxu1 %v5357_v44 }
 0x1d6   :  { %v1108_v18 = vadd.f32 %v1107_v53, %v1079_v42  ;;  %v1052_v49 = vpop.f32.mrf.mxu0  ;;  %v5372_v42 = vld [vmem:[%s8694_s1 + $0x3e0] sm:$0xff] }
 0x1d7   :  { %v1081_v16 = vpop.f32.mrf.mxu1  ;;  %1399 = vmatpush.msra.mxu2 %v5372_v42  ;;  %1370 = vmatpush.msrb.mxu1 %v5356_v41 }
 0x1d8   :  { %5320 = vmatmul.msk.f32.vlgmr.msra.gmra.mxu3 %vm824_vm3, %v1108_v18  ;;  %5324 = vmatmul.msk.f32.vlgmr.msra.gmra.mxu0 %vm824_vm3, %v1108_v18  ;;  %v1082_v11 = vadd.f32 %v1081_v16, %v1052_v49  ;;  %v6847_v5 = vpop.f32.mrf.mxu3 }
 0x1d9   :  { %5328 = vmatmul.msk.f32.vlgmr.msra.gmra.mxu1 %vm824_vm3, %v1108_v18  ;;  %5332 = vmatmul.msk.f32.vlgmr.msrb.gmra.mxu2 %vm824_vm3, %v1108_v18  ;;  %8845 = vst [vmem:[#allocation66_spill] sm:$0xff] %v6847_v5 }
 0x1da   :  { %1439 = vmatpush.msra.mxu3 %v6409_v6  ;;  %1526 = vmatpush.msrb.mxu2 %v6403_v4 }
 0x1db   :  { %1468 = vmatpush.msra.mxu0 %v6414_v52  ;;  %1497 = vmatpush.msra.mxu1 %v6419_v9 }
 0x1dc   :  { %1440 = vmatpush.msra.mxu3 %v6433_v59  ;;  %1527 = vmatpush.msrb.mxu2 %v6452_v1 }
 0x1dd   :  { %v1110_v53 = vpop.f32.mrf.mxu2  ;;  %1469 = vmatpush.msra.mxu0 %v6438_v32  ;;  %1498 = vmatpush.msra.mxu1 %v6443_v13 }
 0x1de   :  { %v1111_v16 = vadd.f32 %v1110_v53, %v1082_v11  ;;  %v1055_v49 = vpop.f32.mrf.mxu0 }
 0x1df   :  { %v1084_v0 = vpop.f32.mrf.mxu1 }
 0x1e0   :  { %5321 = vmatmul.msk.f32.gmra.mxu3 %vm824_vm3, %v1111_v16  ;;  %5325 = vmatmul.msk.f32.gmra.mxu0 %vm824_vm3, %v1111_v16  ;;  %v1085_v42 = vadd.f32 %v1084_v0, %v1055_v49  ;;  %v6858_v41 = vpop.f32.mrf.mxu3 }
 0x1e1   :  { %5329 = vmatmul.msk.f32.gmra.mxu1 %vm824_vm3, %v1111_v16  ;;  %5333 = vmatmul.msk.f32.gmra.mxu2 %vm824_vm3, %v1111_v16  ;;  %8846 = vst [vmem:[#allocation67_spill] sm:$0xff] %v6858_v41 }
 0x1e5   :  { %v1113_v47 = vpop.f32.mrf.mxu2 }
 0x1e6   :  { %v1114_v44 = vadd.f32 %v1113_v47, %v1085_v42  ;;  %v1058_v11 = vpop.f32.mrf.mxu0 }
 0x1e7   :  { %v1087_v38 = vpop.f32.mrf.mxu1 }
 0x1e8   :  { %5322 = vmatmul.msk.f32.gmra.mxu3 %vm824_vm3, %v1114_v44  ;;  %5326 = vmatmul.msk.f32.gmra.mxu0 %vm824_vm3, %v1114_v44  ;;  %v1088_v53 = vadd.f32 %v1087_v38, %v1058_v11  ;;  %v6868_v42 = vpop.f32.mrf.mxu3  ;;  %v5425_v11 = vld [vmem:[%s8694_s1 + $0x4c0] sm:$0xff] }
 0x1e9   :  { %5330 = vmatmul.msk.f32.gmra.mxu1 %vm824_vm3, %v1114_v44  ;;  %5334 = vmatmul.msk.f32.gmra.mxu2 %vm824_vm3, %v1114_v44  ;;  %8847 = vst [vmem:[#allocation68_spill] sm:$0xff] %v6868_v42  ;;  %v5441_v38 = vld [vmem:[%s8694_s1 + $0x540] sm:$0xff] }
 0x1ed   :  { %v1116_v49 = vpop.f32.mrf.mxu2 }
 0x1ee   :  { %v1117_v0 = vadd.f32 %v1116_v49, %v1088_v53  ;;  %v5424_v53 = vld [vmem:[%s8694_s1 + $0x4b8] sm:$0xff] }
 0x1ef   :  { %v5440_v49 = vld [vmem:[%s8694_s1 + $0x538] sm:$0xff] }
 0x1f0   :  { %5323 = vmatmul.msk.f32.gmra.mxu3 %vm824_vm3, %v1117_v0  ;;  %5327 = vmatmul.msk.f32.gmra.mxu0 %vm824_vm3, %v1117_v0  ;;  %v6876_v47 = vpop.f32.mrf.mxu3 }
 0x1f1   :  { %5331 = vmatmul.msk.f32.gmra.mxu1 %vm824_vm3, %v1117_v0  ;;  %5335 = vmatmul.msk.f32.gmra.mxu2 %vm824_vm3, %v1117_v0  ;;  %8848 = vst [vmem:[#allocation69_spill] sm:$0xff] %v6876_v47  ;;  %v5414_v47 = vld [vmem:[%s8694_s1 + $0x468] sm:$0xff] }
 0x1f8   :  { %5336 = vmatmul.msk.f32.vlgmr.msrb.gmra.mxu3 %vm824_vm3, %v1108_v18  ;;  %1342 = vmatmul.f32.vlgmr.msrb.gmra.mxu0 %v6204_v17  ;;  %v6884_v17 = vpop.f32.mrf.mxu3 }
 0x1f9   :  { %5387 = vmatmul.msk.f32.vlgmr.msra.gmra.mxu2 %vm710_vm2, %v6246_v26  ;;  %1371 = vmatmul.f32.vlgmr.msrb.gmra.mxu1 %v6211_v19  ;;  %8849 = vst [vmem:[#allocation70_spill] sm:$0xff] %v6884_v17 }
 0x1fa   :  { %1555 = vmatpush.msrb.mxu3 %v6578_v7 }
 0x1fc   :  { %1556 = vmatpush.msrb.mxu3 %v6592_v57 }
 0x200   :  { %5337 = vmatmul.msk.f32.gmra.mxu3 %vm824_vm3, %v1111_v16  ;;  %1345 = vmatmul.f32.gmra.mxu0 %v6226_v22  ;;  %v6891_v18 = vpop.f32.mrf.mxu3 }
 0x201   :  { %5388 = vmatmul.msk.f32.gmra.mxu2 %vm710_vm2, %v6276_v33  ;;  %1374 = vmatmul.f32.gmra.mxu1 %v6233_v24  ;;  %8850 = vst [vmem:[#allocation71_spill] sm:$0xff] %v6891_v18 }
 0x208   :  { %5338 = vmatmul.msk.f32.gmra.mxu3 %vm824_vm3, %v1114_v44  ;;  %1348 = vmatmul.f32.gmra.mxu0 %v6253_v28  ;;  %v6898_v19 = vpop.f32.mrf.mxu3 }
 0x209   :  { %5389 = vmatmul.msk.f32.gmra.mxu2 %vm710_vm2, %v6303_v39  ;;  %1377 = vmatmul.f32.gmra.mxu1 %v6260_v30  ;;  %8851 = vst [vmem:[#allocation72_spill] sm:$0xff] %v6898_v19  ;;  %v5438_v19 = vld [vmem:[%s8694_s1 + $0x528] sm:$0xff] }
 0x210   :  { %5339 = vmatmul.msk.f32.gmra.mxu3 %vm824_vm3, %v1117_v0  ;;  %1351 = vmatmul.f32.gmra.mxu0 %v6283_v35  ;;  %v6900_v22 = vpop.f32.mrf.mxu3  ;;  %v5456_v0 = vld [vmem:[%s8694_s1 + $0x5b8] sm:$0x7] }
 0x211   :  { %5390 = vmatmul.msk.f32.gmra.mxu2 %vm710_vm2, %v6318_v43  ;;  %1380 = vmatmul.f32.gmra.mxu1 %v6290_v37  ;;  %8852 = vst [vmem:[#allocation73_spill] sm:$0xff] %v6900_v22  ;;  %v5426_v37 = vld [vmem:[%s8694_s1 + $0x4c8] sm:$0xff] }
 0x212   :  { %v5442_v43 = vld [vmem:[%s8694_s1 + $0x548] sm:$0xff]  ;;  %1620 = vmatpush.msrb.mxu0 %v5426_v37  ;;  %5457 = vmatpush.msk.msra.mxu2 %vm723_vm1, %v5456_v0  ;;  %v5423_v37 = vld [vmem:[%s8694_s1 + $0x4b0] sm:$0xff] }
 0x213   :  { %1649 = vmatpush.msrb.mxu1 %v5442_v43  ;;  %v5439_v43 = vld [vmem:[%s8694_s1 + $0x530] sm:$0xff] }
 0x214   :  { %1621 = vmatpush.msrb.mxu0 %v5425_v11  ;;  %v5455_v11 = vld [vmem:[%s8694_s1 + $0x5b0] sm:$0xff] }
 0x215   :  { %1650 = vmatpush.msrb.mxu1 %v5441_v38  ;;  %1681 = vmatpush.msra.mxu2 %v5455_v11  ;;  %v5453_v11 = vld [vmem:[%s8694_s1 + $0x5a0] sm:$0xff] }
 0x216   :  { %1622 = vmatpush.msrb.mxu0 %v5424_v53  ;;  %v5454_v53 = vld [vmem:[%s8694_s1 + $0x5a8] sm:$0xff] }
 0x217   :  { %1651 = vmatpush.msrb.mxu1 %v5440_v49  ;;  %1682 = vmatpush.msra.mxu2 %v5454_v53  ;;  %v5452_v53 = vld [vmem:[%s8694_s1 + $0x598] sm:$0xff] }
 0x218   :  { %v6902_v24 = vpop.f32.mrf.mxu3  ;;  %1623 = vmatpush.msrb.mxu0 %v5423_v37  ;;  %v5421_v37 = vld [vmem:[%s8694_s1 + $0x4a0] sm:$0xff] }
 0x219   :  { %8853 = vst [vmem:[#allocation74_spill] sm:$0xff] %v6902_v24  ;;  %1652 = vmatpush.msrb.mxu1 %v5439_v43  ;;  %v5437_v43 = vld [vmem:[%s8694_s1 + $0x520] sm:$0xff]  ;;  %1683 = vmatpush.msra.mxu2 %v5453_v11  ;;  %v5418_v24 = vld [vmem:[%s8694_s1 + $0x488] sm:$0xff] }
 0x21b   :  { %1653 = vmatpush.msrb.mxu1 %v5438_v19  ;;  %v5436_v19 = vld [vmem:[%s8694_s1 + $0x518] sm:$0xff]  ;;  %1684 = vmatpush.msra.mxu2 %v5452_v53 }
 0x21d   :  { %1654 = vmatpush.msrb.mxu1 %v5437_v43  ;;  %v5451_v43 = vld [vmem:[%s8694_s1 + $0x590] sm:$0xff] }
 0x21e   :  { %1685 = vmatpush.msra.mxu2 %v5451_v43  ;;  %v5433_v43 = vld [vmem:[%s8694_s1 + $0x500] sm:$0xff] }
 0x21f   :  { %1655 = vmatpush.msrb.mxu1 %v5436_v19  ;;  %v5450_v19 = vld [vmem:[%s8694_s1 + $0x588] sm:$0xff] }
 0x220   :  { %v6904_v26 = vpop.f32.mrf.mxu3  ;;  %1686 = vmatpush.msra.mxu2 %v5450_v19  ;;  %v5448_v19 = vld [vmem:[%s8694_s1 + $0x578] sm:$0xff] }
 0x221   :  { %8854 = vst [vmem:[#allocation75_spill] sm:$0xff] %v6904_v26  ;;  %v5449_v26 = vld [vmem:[%s8694_s1 + $0x580] sm:$0xff] }
 0x222   :  { %1687 = vmatpush.msra.mxu2 %v5449_v26 }
 0x224   :  { %1688 = vmatpush.msra.mxu2 %v5448_v19  ;;  %v5429_v19 = vld [vmem:[%s8694_s1 + $0x4e0] sm:$0xff] }
 0x228   :  { %v6906_v28 = vpop.f32.mrf.mxu3 }
 0x229   :  { %8855 = vst [vmem:[#allocation76_spill] sm:$0xff] %v6906_v28 }
 0x230   :  { %v6912_v35 = vpop.f32.mrf.mxu3 }
 0x231   :  { %8856 = vst [vmem:[#allocation77_spill] sm:$0xff] %v6912_v35  ;;  %v5422_v35 = vld [vmem:[%s8694_s1 + $0x4a8] sm:$0xff] }
 0x232   :  { %1624 = vmatpush.msrb.mxu0 %v5422_v35  ;;  %v5420_v35 = vld [vmem:[%s8694_s1 + $0x498] sm:$0xff] }
 0x234   :  { %1625 = vmatpush.msrb.mxu0 %v5421_v37  ;;  %v5435_v37 = vld [vmem:[%s8694_s1 + $0x510] sm:$0xff] }
 0x235   :  { %1656 = vmatpush.msrb.mxu1 %v5435_v37  ;;  %v5417_v37 = vld [vmem:[%s8694_s1 + $0x480] sm:$0xff] }
 0x236   :  { %1626 = vmatpush.msrb.mxu0 %v5420_v35  ;;  %v5434_v35 = vld [vmem:[%s8694_s1 + $0x508] sm:$0xff] }
 0x237   :  { %1657 = vmatpush.msrb.mxu1 %v5434_v35  ;;  %v5432_v35 = vld [vmem:[%s8694_s1 + $0x4f8] sm:$0xff] }
 0x238   :  { %v6953_v0 = vpop.f32.mrf.mxu3 }
 0x239   :  { %8857 = vst [vmem:[#allocation78_spill] sm:$0xff] %v6953_v0  ;;  %v5419_v0 = vld [vmem:[%s8694_s1 + $0x490] sm:$0xff]  ;;  %1658 = vmatpush.msrb.mxu1 %v5433_v43 }
 0x23a   :  { %1627 = vmatpush.msrb.mxu0 %v5419_v0  ;;  %v5447_v43 = vld [vmem:[%s8694_s1 + $0x570] sm:$0xff] }
 0x23b   :  { %1659 = vmatpush.msrb.mxu1 %v5432_v35  ;;  %1689 = vmatpush.msra.mxu2 %v5447_v43  ;;  %v5446_v35 = vld [vmem:[%s8694_s1 + $0x568] sm:$0xff]  ;;  %v5428_v43 = vld [vmem:[%s8694_s1 + $0x4d8] sm:$0xff] }
 0x23c   :  { %1628 = vmatpush.msrb.mxu0 %v5418_v24  ;;  %v5416_v24 = vld [vmem:[%s8694_s1 + $0x478] sm:$0xff] }
 0x23d   :  { %1690 = vmatpush.msra.mxu2 %v5446_v35 }
 0x23e   :  { %1629 = vmatpush.msrb.mxu0 %v5417_v37  ;;  %v5431_v37 = vld [vmem:[%s8694_s1 + $0x4f0] sm:$0xff] }
 0x23f   :  { %1660 = vmatpush.msrb.mxu1 %v5431_v37  ;;  %v5445_v37 = vld [vmem:[%s8694_s1 + $0x560] sm:$0xff] }
 0x240   :  { %v7010_v0 = vpop.f32.mrf.mxu3  ;;  %1630 = vmatpush.msrb.mxu0 %v5416_v24  ;;  %v5430_v24 = vld [vmem:[%s8694_s1 + $0x4e8] sm:$0xff]  ;;  %1691 = vmatpush.msra.mxu2 %v5445_v37 }
 0x241   :  { %8858 = vst [vmem:[#allocation79_spill] sm:$0xff] %v7010_v0  ;;  %v5415_v0 = vld [vmem:[%s8694_s1 + $0x470] sm:$0xff]  ;;  %1661 = vmatpush.msrb.mxu1 %v5430_v24  ;;  %v5444_v24 = vld [vmem:[%s8694_s1 + $0x558] sm:$0xff] }
 0x242   :  { %1631 = vmatpush.msrb.mxu0 %v5415_v0  ;;  %v5413_v0 = vld [vmem:[%s8694_s1 + $0x460] sm:$0xff]  ;;  %1692 = vmatpush.msra.mxu2 %v5444_v24 }
 0x243   :  { %1662 = vmatpush.msrb.mxu1 %v5429_v19  ;;  %v5427_v19 = vld [vmem:[%s8694_s1 + $0x4d0] sm:$0xff] }
 0x244   :  { %1632 = vmatpush.msrb.mxu0 %v5414_v47  ;;  %v5412_v47 = vld [vmem:[%s8694_s1 + $0x458] sm:$0xff]  ;;  %1693 = vmatpush.msra.mxu2 %v5443_v45 }
 0x245   :  { %1663 = vmatpush.msrb.mxu1 %v5428_v43 }
 0x246   :  { %1633 = vmatpush.msrb.mxu0 %v5413_v0  ;;  %v5411_v0 = vld [vmem:[%s8694_s1 + $0x450] sm:$0xff] }
 0x247   :  { %1664 = vmatpush.msrb.mxu1 %v5427_v19 }
 0x248   :  { %v7068_v35 = vpop.f32.mrf.mxu3  ;;  %1634 = vmatpush.msrb.mxu0 %v5412_v47 }
 0x24a   :  { %1635 = vmatpush.msrb.mxu0 %v5411_v0 }
 0x255   :  { %v6908_v30 = vpop.f32.mrf.mxu0 }
 0x256   :  { %v6910_v33 = vpop.f32.mrf.mxu1  ;;  %v2038_v14 = vmul.f32 0.01, %v6908_v30 }
 0x25c   :  { %v6914_v39 = vpop.f32.mrf.mxu2 }
 0x25d   :  { %v6922_v16 = vpop.f32.mrf.mxu0 }
 0x25e   :  { %v6924_v44 = vpop.f32.mrf.mxu1 }
 0x264   :  { %v6951_v38 = vpop.f32.mrf.mxu2 }
 0x265   :  { %v6955_v28 = vpop.f32.mrf.mxu0 }
 0x266   :  { %v6966_v49 = vpop.f32.mrf.mxu1  ;;  %v2078_v36 = vmul.f32 0.01, %v6955_v28 }
 0x26c   :  { %v6995_v22 = vpop.f32.mrf.mxu2 }
 0x26d   :  { %v6997_v11 = vpop.f32.mrf.mxu0 }
 0x26e   :  { %v7008_v53 = vpop.f32.mrf.mxu1 }
 0x274   :  { %v7039_v42 = vpop.f32.mrf.mxu2 }
 0x275   :  { %v1343_v26 = vpop.f32.mrf.mxu0 }
 0x276   :  { %v1372_v17 = vpop.f32.mrf.mxu1 }
 0x277   :  { %v1373_v18 = vadd.f32 %v1372_v17, %v1343_v26 }
 0x27c   :  { %v1401_v5 = vpop.f32.mrf.mxu2 }
 0x27d   :  { %v1402_v17 = vadd.f32 %v1401_v5, %v1373_v18  ;;  %v1346_v26 = vpop.f32.mrf.mxu0  ;;  %v7087_v5 = vpop.f32.mrf.mxu3 }
 0x27e   :  { %v1375_v37 = vpop.f32.mrf.mxu1 }
 0x27f   :  { %5391 = vmatmul.msk.f32.vlgmr.msra.gmra.mxu3 %vm824_vm3, %v1402_v17  ;;  %5395 = vmatmul.msk.f32.vlgmr.msra.gmra.mxu0 %vm824_vm3, %v1402_v17  ;;  %v1376_v47 = vadd.f32 %v1375_v37, %v1346_v26  ;;  %v2093_v26 = vmul.f32 0.01, %v6737_v55 }
 0x280   :  { %5399 = vmatmul.msk.f32.vlgmr.msra.gmra.mxu1 %vm824_vm3, %v1402_v17  ;;  %5403 = vmatmul.msk.f32.vlgmr.msrb.gmra.mxu2 %vm824_vm3, %v1402_v17 }
 0x281   :  { %1762 = vmatpush.msra.mxu0 %v6414_v52  ;;  %1791 = vmatpush.msra.mxu1 %v6419_v9 }
 0x282   :  { %1820 = vmatpush.msrb.mxu2 %v6403_v4  ;;  %1733 = vmatpush.msra.mxu3 %v6409_v6 }
 0x283   :  { %1763 = vmatpush.msra.mxu0 %v6438_v32  ;;  %1792 = vmatpush.msra.mxu1 %v6443_v13 }
 0x284   :  { %v1404_v45 = vpop.f32.mrf.mxu2  ;;  %1821 = vmatpush.msrb.mxu2 %v6452_v1  ;;  %1734 = vmatpush.msra.mxu3 %v6433_v59 }
 0x285   :  { %v7093_v18 = vadd.f32 %v1404_v45, %v1376_v47  ;;  %v1349_v52 = vpop.f32.mrf.mxu0  ;;  %v860_v4 = vpop.f32.mrf.mxu3  ;;  %v2094_v47 = vmul.f32 0.01, %v6739_v8  ;;  %v2073_v45 = vmul.f32 0.01, %v6694_v3 }
 0x286   :  { %v1378_v43 = vpop.f32.mrf.mxu1 }
 0x287   :  { %5392 = vmatmul.msk.f32.gmra.mxu3 %vm824_vm3, %v7093_v18  ;;  %5396 = vmatmul.msk.f32.gmra.mxu0 %vm824_vm3, %v7093_v18  ;;  %v1379_v13 = vadd.f32 %v1378_v43, %v1349_v52  ;;  %v2072_v52 = vmul.f32 0.01, %v860_v4  ;;  %v2074_v43 = vmul.f32 0.01, %v6696_v62  ;;  %v2174_v41 = vmax.f32 %v6739_v8, %v2094_v47 }
 0x288   :  { %5400 = vmatmul.msk.f32.gmra.mxu1 %vm824_vm3, %v7093_v18  ;;  %5404 = vmatmul.msk.f32.gmra.mxu2 %vm824_vm3, %v7093_v18  ;;  %v2034_v8 = vmul.f32 0.01, %v6675_v10 }
 0x289   :  { %v2154_v47 = vmax.f32 %v6696_v62, %v2074_v43 }
 0x28a   :  { %v2114_v62 = vmax.f32 %v6675_v10, %v2034_v8  ;;  %v5783_v10 = vld [vmem:[%s8695_s4 + $0x20] sm:$0xff] }
 0x28c   :  { %v1407_v32 = vpop.f32.mrf.mxu2 }
 0x28d   :  { %v7103_v59 = vadd.f32 %v1407_v32, %v1379_v13  ;;  %v1352_v6 = vpop.f32.mrf.mxu0  ;;  %v863_v19 = vpop.f32.mrf.mxu3  ;;  %v2053_v13 = vmul.f32 0.01, %v6679_v51  ;;  %v2052_v32 = vmul.f32 0.01, %v7087_v5 }
 0x28e   :  { %v1381_v9 = vpop.f32.mrf.mxu1  ;;  %v2092_v37 = vmul.f32 0.01, %v863_v19 }
 0x28f   :  { %5393 = vmatmul.msk.f32.gmra.mxu3 %vm824_vm3, %v7103_v59  ;;  %5397 = vmatmul.msk.f32.gmra.mxu0 %vm824_vm3, %v7103_v59  ;;  %v1382_v1 = vadd.f32 %v1381_v9, %v1352_v6  ;;  %v2173_v6 = vmax.f32 %v6737_v55, %v2093_v26  ;;  %v5780_v55 = vld [vmem:[%s8695_s4 + $0x10] sm:$0xff]  ;;  %v2153_v26 = vmax.f32 %v6694_v3, %v2073_v45 }
 0x290   :  { %5401 = vmatmul.msk.f32.gmra.mxu1 %vm824_vm3, %v7103_v59  ;;  %5405 = vmatmul.msk.f32.gmra.mxu2 %vm824_vm3, %v7103_v59  ;;  %v2172_v9 = vmax.f32 %v863_v19, %v2092_v37  ;;  %v2032_v19 = vmul.f32 0.01, %v7068_v35  ;;  %v2152_v37 = vmax.f32 %v860_v4, %v2072_v52 }
 0x292   :  { %v2112_v4 = vmax.f32 %v7068_v35, %v2032_v19 }
 0x294   :  { %v1410_v24 = vpop.f32.mrf.mxu2 }
 0x295   :  { %v7113_v0 = vadd.f32 %v1410_v24, %v1382_v1  ;;  %v5778_v1 = vld [vmem:[%s8695_s4] sm:$0xff]  ;;  %v2054_v24 = vmul.f32 0.01, %v6681_v2 }
 0x297   :  { %5394 = vmatmul.msk.f32.gmra.mxu3 %vm824_vm3, %v7113_v0  ;;  %5398 = vmatmul.msk.f32.gmra.mxu0 %vm824_vm3, %v7113_v0 }
 0x298   :  { %5402 = vmatmul.msk.f32.gmra.mxu1 %vm824_vm3, %v7113_v0  ;;  %5406 = vmatmul.msk.f32.gmra.mxu2 %vm824_vm3, %v7113_v0 }
 0x29f   :  { %5407 = vmatmul.msk.f32.vlgmr.msrb.gmra.mxu3 %vm824_vm3, %v1402_v17  ;;  %1636 = vmatmul.f32.vlgmr.msrb.gmra.mxu0 %v5778_v1  ;;  %v2033_v17 = vmul.f32 0.01, %v6673_v56  ;;  %v2132_v1 = vmax.f32 %v7087_v5, %v2052_v32  ;;  %v5787_v5 = vld [vmem:[%s8695_s4 + $0x58] sm:$0xff] }
 0x2a0   :  { %1665 = vmatmul.f32.vlgmr.msrb.gmra.mxu1 %v5779_v23  ;;  %5458 = vmatmul.msk.f32.vlgmr.msra.gmra.mxu2 %vm710_vm2, %v5780_v55  ;;  %v2133_v23 = vmax.f32 %v6679_v51, %v2053_v13  ;;  %v2134_v55 = vmax.f32 %v6681_v2, %v2054_v24  ;;  %v5784_v51 = vld [vmem:[%s8695_s4 + $0x40] sm:$0xff]  ;;  %v5785_v2 = vld [vmem:[%s8695_s4 + $0x30] sm:$0xff] }
 0x2a1   :  { %2217 = vmatpush.msrb.mxu0 %v2172_v9  ;;  %2246 = vmatpush.msrb.mxu1 %v2173_v6  ;;  %v2113_v3 = vmax.f32 %v6673_v56, %v2033_v17  ;;  %v7165_v56 = vpop.f32.mrf.mxu3 }
 0x2a2   :  { %2275 = vmatpush.msra.mxu2 %v2174_v41  ;;  %1849 = vmatpush.msrb.mxu3 %v6578_v7  ;;  %v5781_v7 = vld [vmem:[%s8695_s4 + $0x28] sm:$0xff]  ;;  %v5786_v41 = vld [vmem:[%s8695_s4 + $0x38] sm:$0xff] }
 0x2a3   :  { %2218 = vmatpush.msrb.mxu0 %v2152_v37  ;;  %2247 = vmatpush.msrb.mxu1 %v2153_v26 }
 0x2a4   :  { %2276 = vmatpush.msra.mxu2 %v2154_v47  ;;  %1850 = vmatpush.msrb.mxu3 %v6592_v57  ;;  %v5782_v57 = vld [vmem:[%s8695_s4 + $0x18] sm:$0xff] }
 0x2a5   :  { %2219 = vmatpush.msrb.mxu0 %v2132_v1  ;;  %2248 = vmatpush.msrb.mxu1 %v2133_v23 }
 0x2a6   :  { %2277 = vmatpush.msra.mxu2 %v2134_v55 }
 0x2a7   :  { %2220 = vmatpush.msrb.mxu0 %v2112_v4  ;;  %2249 = vmatpush.msrb.mxu1 %v2113_v3 }
 0x2a8   :  { %2278 = vmatpush.msra.mxu2 %v2114_v62  ;;  %5408 = vmatmul.msk.f32.gmra.mxu3 %vm824_vm3, %v7093_v18  ;;  %v5788_v18 = vld [vmem:[%s8695_s4 + $0x48] sm:$0xff] }
 0x2a9   :  { %5459 = vmatmul.msk.f32.gmra.mxu2 %vm710_vm2, %v5781_v7  ;;  %1639 = vmatmul.f32.gmra.mxu0 %v5782_v57  ;;  %v7182_v35 = vpop.f32.mrf.mxu3 }
 0x2aa   :  { %1668 = vmatmul.f32.gmra.mxu1 %v5783_v10  ;;  %v2056_v25 = vmul.f32 0.01, %v7182_v35 }
 0x2b0   :  { %5409 = vmatmul.msk.f32.gmra.mxu3 %vm824_vm3, %v7103_v59  ;;  %v5789_v59 = vld [vmem:[%s8695_s4 + $0x50] sm:$0xff] }
 0x2b1   :  { %5460 = vmatmul.msk.f32.gmra.mxu2 %vm710_vm2, %v5784_v51  ;;  %1642 = vmatmul.f32.gmra.mxu0 %v5785_v2  ;;  %v7196_v45 = vpop.f32.mrf.mxu3 }
 0x2b2   :  { %1671 = vmatmul.f32.gmra.mxu1 %v5786_v41  ;;  %v2095_v41 = vmul.f32 0.01, %v6770_v31  ;;  %v2076_v29 = vmul.f32 0.01, %v7196_v45 }
 0x2b8   :  { %5410 = vmatmul.msk.f32.gmra.mxu3 %vm824_vm3, %v7113_v0 }
 0x2b9   :  { %5461 = vmatmul.msk.f32.gmra.mxu2 %vm710_vm2, %v5787_v5  ;;  %1645 = vmatmul.f32.gmra.mxu0 %v5788_v18  ;;  %v979_v52 = vpop.f32.mrf.mxu3  ;;  %v2098_v18 = vmul.f32 0.01, %v6997_v11 }
 0x2ba   :  { %1674 = vmatmul.f32.gmra.mxu1 %v5789_v59  ;;  %v2096_v5 = vmul.f32 0.01, %v979_v52 }
 0x2bb   :  { %v2178_v60 = vmax.f32 %v6997_v11, %v2098_v18 }
 0x2bc   :  { %v2176_v48 = vmax.f32 %v979_v52, %v2096_v5  ;;  %v2155_v52 = vmax.f32 %v6726_v50, %v2075_v15  ;;  %v2156_v5 = vmax.f32 %v7196_v45, %v2076_v29  ;;  %v2136_v50 = vmax.f32 %v7182_v35, %v2056_v25 }
 0x2c1   :  { %v7198_v0 = vpop.f32.mrf.mxu3 }
 0x2c2   :  { %v2037_v11 = vmul.f32 0.01, %v7198_v0 }
 0x2c9   :  { %v7200_v43 = vpop.f32.mrf.mxu3 }
 0x2ca   :  { %v2057_v46 = vmul.f32 0.01, %v7200_v43 }
 0x2cc   :  { %v2137_v45 = vmax.f32 %v7200_v43, %v2057_v46 }
 0x2d1   :  { %v7202_v13 = vpop.f32.mrf.mxu3 }
 0x2d2   :  { %v2077_v34 = vmul.f32 0.01, %v7202_v13 }
 0x2d4   :  { %v2157_v18 = vmax.f32 %v7202_v13, %v2077_v34  ;;  %v2117_v34 = vmax.f32 %v7198_v0, %v2037_v11  ;;  %v2099_v13 = vmul.f32 0.01, %v7008_v53 }
 0x2d9   :  { %v1157_v32 = vpop.f32.mrf.mxu3 }
 0x2da   :  { %v2097_v59 = vmul.f32 0.01, %v1157_v32 }
 0x2dc   :  { %v2177_v58 = vmax.f32 %v1157_v32, %v2097_v59  ;;  %v2158_v32 = vmax.f32 %v6955_v28, %v2078_v36 }
 0x2e1   :  { %v7204_v6 = vpop.f32.mrf.mxu3 }
 0x2e9   :  { %v7210_v17 = vpop.f32.mrf.mxu3 }
 0x2f1   :  { %v7220_v47 = vpop.f32.mrf.mxu3 }
 0x2f9   :  { %v7232_v62 = vpop.f32.mrf.mxu3 }
 0x2fc   :  { %v7206_v9 = vpop.f32.mrf.mxu0 }
 0x2fd   :  { %v7208_v24 = vpop.f32.mrf.mxu1 }
 0x302   :  { %v7236_v51 = vpop.f32.mrf.mxu3 }
 0x303   :  { %v7212_v19 = vpop.f32.mrf.mxu2 }
 0x304   :  { %v7214_v26 = vpop.f32.mrf.mxu0 }
 0x305   :  { %v7216_v37 = vpop.f32.mrf.mxu1 }
 0x30a   :  { %v7265_v12 = vpop.f32.mrf.mxu3 }
 0x30b   :  { %v7218_v8 = vpop.f32.mrf.mxu2 }
 0x30c   :  { %v7222_v23 = vpop.f32.mrf.mxu0 }
 0x30d   :  { %v7224_v1 = vpop.f32.mrf.mxu1 }
 0x313   :  { %v7226_v55 = vpop.f32.mrf.mxu2 }
 0x314   :  { %v7228_v3 = vpop.f32.mrf.mxu0 }
 0x315   :  { %v7230_v4 = vpop.f32.mrf.mxu1 }
 0x31b   :  { %v7234_v7 = vpop.f32.mrf.mxu2 }
 0x31c   :  { %v1637_v57 = vpop.f32.mrf.mxu0 }
 0x31d   :  { %v1666_v10 = vpop.f32.mrf.mxu1 }
 0x31e   :  { %v1667_v2 = vadd.f32 %v1666_v10, %v1637_v57  ;;  %v2055_v57 = vmul.f32 0.01, %v6683_v61  ;;  %v2175_v10 = vmax.f32 %v6770_v31, %v2095_v41  ;;  %v2036_v41 = vmul.f32 0.01, %v7165_v56 }
 0x320   :  { %v2135_v15 = vmax.f32 %v6683_v61, %v2055_v57  ;;  %v2116_v36 = vmax.f32 %v7165_v56, %v2036_v41  ;;  %v2100_v57 = vmul.f32 0.01, %v7039_v42 }
 0x323   :  { %v1695_v21 = vpop.f32.mrf.mxu2 }
 0x324   :  { %v7242_v27 = vadd.f32 %v1695_v21, %v1667_v2  ;;  %v2058_v2 = vmul.f32 0.01, %v6922_v16 }
 0x326   :  { %5462 = vmatmul.msk.f32.vlgmr.msra.gmra.mxu3 %vm824_vm3, %v7242_v27  ;;  %5466 = vmatmul.msk.f32.vlgmr.msra.gmra.mxu0 %vm824_vm3, %v7242_v27  ;;  %v1640_v21 = vpop.f32.mrf.mxu0  ;;  %v2138_v29 = vmax.f32 %v6922_v16, %v2058_v2  ;;  %v7314_v2 = vld [vmem:[%s8697_s6] sm:$0xff] }
 0x327   :  { %5470 = vmatmul.msk.f32.vlgmr.msra.gmra.mxu1 %vm824_vm3, %v7242_v27  ;;  %5474 = vmatmul.msk.f32.vlgmr.msrb.gmra.mxu2 %vm824_vm3, %v7242_v27  ;;  %v1669_v31 = vpop.f32.mrf.mxu1 }
 0x328   :  { %2304 = vmatpush.msra.mxu3 %v2175_v10  ;;  %2333 = vmatpush.msra.mxu0 %v2176_v48  ;;  %v1670_v59 = vadd.f32 %v1669_v31, %v1640_v21  ;;  %v2115_v48 = vmax.f32 %v6677_v40, %v2035_v20  ;;  %v1448_v20 = vpop.f32.mrf.mxu3  ;;  %v2101_v10 = vmul.f32 0.01, %v7232_v62  ;;  %v2079_v31 = vmul.f32 0.01, %v6966_v49 }
 0x329   :  { %2362 = vmatpush.msra.mxu1 %v2177_v58  ;;  %2391 = vmatpush.msrb.mxu2 %v2178_v60  ;;  %v2118_v60 = vmax.f32 %v6908_v30, %v2038_v14  ;;  %v2082_v11 = vmul.f32 0.01, %v1448_v20 }
 0x32a   :  { %2305 = vmatpush.msra.mxu3 %v2155_v52  ;;  %2334 = vmatpush.msra.mxu0 %v2156_v5  ;;  %v2080_v52 = vmul.f32 0.01, %v6995_v22  ;;  %v2081_v5 = vmul.f32 0.01, %v7220_v47 }
 0x32b   :  { %2363 = vmatpush.msra.mxu1 %v2157_v18  ;;  %2392 = vmatpush.msrb.mxu2 %v2158_v32  ;;  %v2059_v32 = vmul.f32 0.01, %v6924_v44  ;;  %v2060_v18 = vmul.f32 0.01, %v6951_v38 }
 0x32c   :  { %2306 = vmatpush.msra.mxu3 %v2135_v15  ;;  %2335 = vmatpush.msra.mxu0 %v2136_v50  ;;  %v1698_v58 = vpop.f32.mrf.mxu2  ;;  %v2180_v15 = vmax.f32 %v7039_v42, %v2100_v57  ;;  %v2061_v50 = vmul.f32 0.01, %v7210_v17  ;;  %v2039_v42 = vmul.f32 0.01, %v6910_v33 }
 0x32d   :  { %2364 = vmatpush.msra.mxu1 %v2137_v45  ;;  %2393 = vmatpush.msrb.mxu2 %v2138_v29  ;;  %v7278_v25 = vadd.f32 %v1698_v58, %v1670_v59  ;;  %v2179_v59 = vmax.f32 %v7008_v53, %v2099_v13  ;;  %v2181_v29 = vmax.f32 %v7232_v62, %v2101_v10  ;;  %v2062_v45 = vmul.f32 0.01, %v7265_v12 }
 0x32e   :  { %2307 = vmatpush.msra.mxu3 %v2115_v48  ;;  %2336 = vmatpush.msra.mxu0 %v2116_v36  ;;  %v1643_v46 = vpop.f32.mrf.mxu0  ;;  %v2159_v53 = vmax.f32 %v6966_v49, %v2079_v31  ;;  %v2160_v36 = vmax.f32 %v6995_v22, %v2080_v52  ;;  %v2041_v62 = vmul.f32 0.01, %v7204_v6  ;;  %v2161_v58 = vmax.f32 %v7220_v47, %v2081_v5 }
 0x32f   :  { %2365 = vmatpush.msra.mxu1 %v2117_v34  ;;  %2394 = vmatpush.msrb.mxu2 %v2118_v60  ;;  %v1672_v61 = vpop.f32.mrf.mxu1  ;;  %v2042_v60 = vmul.f32 0.01, %v7236_v51  ;;  %v2162_v34 = vmax.f32 %v1448_v20, %v2082_v11  ;;  %v2141_v49 = vmax.f32 %v7210_v17, %v2061_v50  ;;  %v2142_v22 = vmax.f32 %v7265_v12, %v2062_v45 }
 0x330   :  { %5463 = vmatmul.msk.f32.gmra.mxu3 %vm824_vm3, %v7278_v25  ;;  %5467 = vmatmul.msk.f32.gmra.mxu0 %vm824_vm3, %v7278_v25  ;;  %v1673_v14 = vadd.f32 %v1672_v61, %v1643_v46  ;;  %v1451_v35 = vpop.f32.mrf.mxu3  ;;  %v2139_v46 = vmax.f32 %v6924_v44, %v2059_v32  ;;  %v2140_v61 = vmax.f32 %v6951_v38, %v2060_v18  ;;  %v7354_v38 = vld [vmem:[%s8697_s6 + $0x8] sm:$0xff]  ;;  %v2065_v10 = vmul.f32 0.01, %v7218_v8 }
 0x331   :  { %5471 = vmatmul.msk.f32.gmra.mxu1 %vm824_vm3, %v7278_v25  ;;  %5475 = vmatmul.msk.f32.gmra.mxu2 %vm824_vm3, %v7278_v25  ;;  %v2102_v21 = vmul.f32 0.01, %v1451_v35  ;;  %v2121_v20 = vmax.f32 %v7204_v6, %v2041_v62  ;;  %v2122_v44 = vmax.f32 %v7236_v51, %v2042_v60  ;;  %v7382_v6 = vld [vmem:[%s8697_s6 + $0x18] sm:$0xff]  ;;  %v2103_v51 = vmul.f32 0.01, %v7228_v3 }
 0x333   :  { %v2182_v48 = vmax.f32 %v1451_v35, %v2102_v21  ;;  %v2183_v13 = vmax.f32 %v7228_v3, %v2103_v51  ;;  %v2043_v3 = vmul.f32 0.01, %v7206_v9 }
 0x334   :  { %v1701_v40 = vpop.f32.mrf.mxu2 }
 0x335   :  { %v7288_v28 = vadd.f32 %v1701_v40, %v1673_v14  ;;  %v2119_v14 = vmax.f32 %v6910_v33, %v2039_v42  ;;  %v7369_v33 = vld [vmem:[%s8697_s6 + $0x10] sm:$0xff]  ;;  %v2105_v40 = vmul.f32 0.01, %v7234_v7 }
 0x336   :  { %v1646_v30 = vpop.f32.mrf.mxu0 }
 0x337   :  { %v1675_v16 = vpop.f32.mrf.mxu1  ;;  %v2185_v21 = vmax.f32 %v7234_v7, %v2105_v40  ;;  %v2045_v7 = vmul.f32 0.01, %v7212_v19  ;;  %v1929_v40 = vmul.f32 0.01, %v6633_v63 }
 0x338   :  { %5464 = vmatmul.msk.f32.gmra.mxu3 %vm824_vm3, %v7288_v28  ;;  %5468 = vmatmul.msk.f32.gmra.mxu0 %vm824_vm3, %v7288_v28  ;;  %v1676_v56 = vadd.f32 %v1675_v16, %v1646_v30  ;;  %v7318_v41 = vpop.f32.mrf.mxu3  ;;  %v2083_v30 = vmul.f32 0.01, %v7222_v23  ;;  %v2084_v16 = vmul.f32 0.01, %v7224_v1 }
 0x339   :  { %5472 = vmatmul.msk.f32.gmra.mxu1 %vm824_vm3, %v7288_v28  ;;  %5476 = vmatmul.msk.f32.gmra.mxu2 %vm824_vm3, %v7288_v28  ;;  %v2046_v18 = vmul.f32 0.01, %v7318_v41  ;;  %v2125_v45 = vmax.f32 %v7212_v19, %v2045_v7 }
 0x33a   :  { %v2163_v5 = vmax.f32 %v7222_v23, %v2083_v30  ;;  %v2164_v11 = vmax.f32 %v7224_v1, %v2084_v16  ;;  %v2145_v23 = vmax.f32 %v7218_v8, %v2065_v10 }
 0x33c   :  { %v1704_v0 = vpop.f32.mrf.mxu2 }
 0x33d   :  { %v7298_v43 = vadd.f32 %v1704_v0, %v1676_v56  ;;  %v2085_v56 = vmul.f32 0.01, %v7226_v55  ;;  %v2063_v0 = vmul.f32 0.01, %v7214_v26 }
 0x33f   :  { %v2165_v32 = vmax.f32 %v7226_v55, %v2085_v56 }
 0x340   :  { %5465 = vmatmul.msk.f32.gmra.mxu3 %vm824_vm3, %v7298_v43  ;;  %5469 = vmatmul.msk.f32.gmra.mxu0 %vm824_vm3, %v7298_v43  ;;  %v7356_v12 = vpop.f32.mrf.mxu3 }
 0x341   :  { %5473 = vmatmul.msk.f32.gmra.mxu1 %vm824_vm3, %v7298_v43  ;;  %5477 = vmatmul.msk.f32.gmra.mxu2 %vm824_vm3, %v7298_v43  ;;  %v2066_v31 = vmul.f32 0.01, %v7356_v12 }
 0x343   :  { %v2146_v1 = vmax.f32 %v7356_v12, %v2066_v31 }
 0x348   :  { %5478 = vmatmul.msk.f32.vlgmr.msrb.gmra.mxu3 %vm824_vm3, %v7242_v27  ;;  %5482 = vmatmul.msk.f32.vlgmr.msrb.gmra.mxu0 %vm2192_vm4, %v7314_v2  ;;  %v2040_v27 = vmul.f32 0.01, %v6914_v39 }
 0x349   :  { %5486 = vmatmul.msk.f32.vlgmr.msrb.gmra.mxu1 %vm2192_vm4, %v7314_v2  ;;  %5490 = vmatmul.msk.f32.vlgmr.msra.gmra.mxu2 %vm2192_vm4, %v7314_v2 }
 0x34a   :  { %2420 = vmatpush.msrb.mxu3 %v2179_v59  ;;  %2449 = vmatpush.msrb.mxu0 %v2180_v15  ;;  %v2120_v47 = vmax.f32 %v6914_v39, %v2040_v27  ;;  %v1564_v39 = vpop.f32.mrf.mxu3  ;;  %v2143_v15 = vmax.f32 %v7214_v26, %v2063_v0  ;;  %v2126_v26 = vmax.f32 %v7318_v41, %v2046_v18  ;;  %v8861_v18 = vld [vmem:[#allocation4_spill] sm:$0xff] }
 0x34b   :  { %2478 = vmatpush.msrb.mxu1 %v2181_v29  ;;  %2507 = vmatpush.msra.mxu2 %v2182_v48  ;;  %v2086_v35 = vmul.f32 0.01, %v1564_v39  ;;  %v2123_v29 = vmax.f32 %v7206_v9, %v2043_v3 }
 0x34c   :  { %2421 = vmatpush.msrb.mxu3 %v2159_v53  ;;  %2450 = vmatpush.msrb.mxu0 %v2160_v36 }
 0x34d   :  { %2479 = vmatpush.msrb.mxu1 %v2161_v58  ;;  %2508 = vmatpush.msra.mxu2 %v2162_v34  ;;  %v2166_v59 = vmax.f32 %v1564_v39, %v2086_v35 }
 0x34e   :  { %2422 = vmatpush.msrb.mxu3 %v2139_v46  ;;  %2451 = vmatpush.msrb.mxu0 %v2140_v61 }
 0x34f   :  { %2480 = vmatpush.msrb.mxu1 %v2141_v49  ;;  %2509 = vmatpush.msra.mxu2 %v2142_v22 }
 0x350   :  { %2423 = vmatpush.msrb.mxu3 %v2119_v14  ;;  %2452 = vmatpush.msrb.mxu0 %v2120_v47 }
 0x351   :  { %2481 = vmatpush.msrb.mxu1 %v2121_v20  ;;  %2510 = vmatpush.msra.mxu2 %v2122_v44 }
 0x352   :  { %5479 = vmatmul.msk.f32.gmra.mxu3 %vm824_vm3, %v7278_v25  ;;  %5483 = vmatmul.msk.f32.gmra.mxu0 %vm2192_vm4, %v7354_v38  ;;  %v1567_v17 = vpop.f32.mrf.mxu3  ;;  %v2104_v25 = vmul.f32 0.01, %v7230_v4 }
 0x353   :  { %5487 = vmatmul.msk.f32.gmra.mxu1 %vm2192_vm4, %v7354_v38  ;;  %5491 = vmatmul.msk.f32.gmra.mxu2 %vm2192_vm4, %v7354_v38 }
 0x354   :  { %v2184_v57 = vmax.f32 %v7230_v4, %v2104_v25  ;;  %v2044_v4 = vmul.f32 0.01, %v7208_v24  ;;  %v1928_v25 = vmul.f32 0.01, %v6124_v54 }
 0x356   :  { %v2124_v55 = vmax.f32 %v7208_v24, %v2044_v4 }
 0x35a   :  { %5480 = vmatmul.msk.f32.gmra.mxu3 %vm824_vm3, %v7288_v28  ;;  %5484 = vmatmul.msk.f32.gmra.mxu0 %vm2192_vm4, %v7369_v33  ;;  %v2106_v28 = vmul.f32 0.01, %v1567_v17 }
 0x35b   :  { %5488 = vmatmul.msk.f32.gmra.mxu1 %vm2192_vm4, %v7369_v33  ;;  %5492 = vmatmul.msk.f32.gmra.mxu2 %vm2192_vm4, %v7369_v33 }
 0x35c   :  { %v2186_v52 = vmax.f32 %v1567_v17, %v2106_v28 }
 0x362   :  { %5481 = vmatmul.msk.f32.gmra.mxu3 %vm824_vm3, %v7298_v43  ;;  %5485 = vmatmul.msk.f32.gmra.mxu0 %vm2192_vm4, %v7382_v6  ;;  %v2064_v43 = vmul.f32 0.01, %v7216_v37 }
 0x363   :  { %5489 = vmatmul.msk.f32.gmra.mxu1 %vm2192_vm4, %v7382_v6  ;;  %5493 = vmatmul.msk.f32.gmra.mxu2 %vm2192_vm4, %v7382_v6 }
 0x364   :  { %v2144_v50 = vmax.f32 %v7216_v37, %v2064_v43 }
 0x36a   :  { %5494 = vmatmul.msk.f32.vlgmr.msra.gmra.mxu3 %vm2192_vm4, %v7314_v2  ;;  %5498 = vmatmul.msk.f32.vlgmr.msra.gmra.mxu0 %vm2192_vm4, %v7314_v2 }
 0x36b   :  { %5502 = vmatmul.msk.f32.vlgmr.msra.gmra.mxu1 %vm2192_vm4, %v7314_v2  ;;  %5506 = vmatmul.msk.f32.vlgmr.msrb.gmra.mxu2 %vm2192_vm4, %v7314_v2 }
 0x36c   :  { %2536 = vmatpush.msra.mxu3 %v2183_v13  ;;  %2565 = vmatpush.msra.mxu0 %v2184_v57  ;;  %v8859_v13 = vld [vmem:[#allocation7_spill] sm:$0xff] }
 0x36d   :  { %2594 = vmatpush.msra.mxu1 %v2185_v21  ;;  %2623 = vmatpush.msrb.mxu2 %v2186_v52  ;;  %v1908_v57 = vmul.f32 0.01, %v8859_v13 }
 0x36e   :  { %2537 = vmatpush.msra.mxu3 %v2163_v5  ;;  %2566 = vmatpush.msra.mxu0 %v2164_v11  ;;  %v2008_v5 = vmax.f32 %v6124_v54, %v1928_v25  ;;  %v8860_v11 = vld [vmem:[#allocation8_spill] sm:$0xff] }
 0x36f   :  { %2595 = vmatpush.msra.mxu1 %v2165_v32  ;;  %2624 = vmatpush.msrb.mxu2 %v2166_v59  ;;  %v1909_v7 = vmul.f32 0.01, %v8860_v11  ;;  %v1888_v59 = vmul.f32 0.01, %v8861_v18  ;;  %v1988_v54 = vmax.f32 %v8859_v13, %v1908_v57  ;;  %v8873_v13 = vld [vmem:[#allocation14_spill] sm:$0xff] }
 0x370   :  { %2538 = vmatpush.msra.mxu3 %v2143_v15  ;;  %2567 = vmatpush.msra.mxu0 %v2144_v50  ;;  %v2009_v15 = vmax.f32 %v6633_v63, %v1929_v40  ;;  %v8870_v40 = vld [vmem:[#allocation17_spill] sm:$0xff]  ;;  %v1893_v57 = vmul.f32 0.01, %v8873_v13 }
 0x371   :  { %2596 = vmatpush.msra.mxu1 %v2145_v23  ;;  %2625 = vmatpush.msrb.mxu2 %v2146_v1  ;;  %v8862_v1 = vld [vmem:[#allocation5_spill] sm:$0xff] }
 0x372   :  { %2539 = vmatpush.msra.mxu3 %v2123_v29  ;;  %2568 = vmatpush.msra.mxu0 %v2124_v55  ;;  %v1889_v29 = vmul.f32 0.01, %v8862_v1 }
 0x373   :  { %2597 = vmatpush.msra.mxu1 %v2125_v45  ;;  %2626 = vmatpush.msrb.mxu2 %v2126_v26 }
 0x374   :  { %5499 = vmatmul.msk.f32.gmra.mxu0 %vm2192_vm4, %v7354_v38  ;;  %5503 = vmatmul.msk.f32.gmra.mxu1 %vm2192_vm4, %v7354_v38 }
 0x375   :  { %5495 = vmatmul.msk.f32.gmra.mxu3 %vm2192_vm4, %v7354_v38  ;;  %5507 = vmatmul.msk.f32.gmra.mxu2 %vm2192_vm4, %v7354_v38 }
 0x37c   :  { %5500 = vmatmul.msk.f32.gmra.mxu0 %vm2192_vm4, %v7369_v33  ;;  %5504 = vmatmul.msk.f32.gmra.mxu1 %vm2192_vm4, %v7369_v33 }
 0x37d   :  { %5496 = vmatmul.msk.f32.gmra.mxu3 %vm2192_vm4, %v7369_v33  ;;  %5508 = vmatmul.msk.f32.gmra.mxu2 %vm2192_vm4, %v7369_v33 }
 0x384   :  { %5501 = vmatmul.msk.f32.gmra.mxu0 %vm2192_vm4, %v7382_v6  ;;  %5505 = vmatmul.msk.f32.gmra.mxu1 %vm2192_vm4, %v7382_v6 }
 0x385   :  { %5497 = vmatmul.msk.f32.gmra.mxu3 %vm2192_vm4, %v7382_v6  ;;  %5509 = vmatmul.msk.f32.gmra.mxu2 %vm2192_vm4, %v7382_v6 }
 0x38c   :  { %5514 = vmatmul.msk.f32.vlgmr.msrb.gmra.mxu0 %vm2192_vm4, %v7314_v2  ;;  %5518 = vmatmul.msk.f32.vlgmr.msrb.gmra.mxu1 %vm2192_vm4, %v7314_v2 }
 0x38d   :  { %5510 = vmatmul.msk.f32.vlgmr.msrb.gmra.mxu3 %vm2192_vm4, %v7314_v2  ;;  %5522 = vmatmul.msk.f32.vlgmr.msra.gmra.mxu2 %vm2192_vm4, %v7314_v2 }
 0x394   :  { %5515 = vmatmul.msk.f32.gmra.mxu0 %vm2192_vm4, %v7354_v38  ;;  %5519 = vmatmul.msk.f32.gmra.mxu1 %vm2192_vm4, %v7354_v38 }
 0x395   :  { %5511 = vmatmul.msk.f32.gmra.mxu3 %vm2192_vm4, %v7354_v38  ;;  %5523 = vmatmul.msk.f32.gmra.mxu2 %vm2192_vm4, %v7354_v38 }
 0x39c   :  { %5516 = vmatmul.msk.f32.gmra.mxu0 %vm2192_vm4, %v7369_v33  ;;  %5520 = vmatmul.msk.f32.gmra.mxu1 %vm2192_vm4, %v7369_v33 }
 0x39d   :  { %5512 = vmatmul.msk.f32.gmra.mxu3 %vm2192_vm4, %v7369_v33  ;;  %5524 = vmatmul.msk.f32.gmra.mxu2 %vm2192_vm4, %v7369_v33 }
 0x3a3   :  { %v7476_v9 = vpop.f32.mrf.mxu0 }
 0x3a4   :  { %5517 = vmatmul.msk.f32.gmra.mxu0 %vm2192_vm4, %v7382_v6  ;;  %5521 = vmatmul.msk.f32.gmra.mxu1 %vm2192_vm4, %v7382_v6  ;;  %v7482_v24 = vpop.f32.mrf.mxu1  ;;  %v2048_v44 = vmul.f32 0.01, %v7476_v9 }
 0x3a5   :  { %5513 = vmatmul.msk.f32.gmra.mxu3 %vm2192_vm4, %v7382_v6  ;;  %5525 = vmatmul.msk.f32.gmra.mxu2 %vm2192_vm4, %v7382_v6  ;;  %v2049_v12 = vmul.f32 0.01, %v7482_v24 }
 0x3a6   :  { %v2128_v31 = vmax.f32 %v7476_v9, %v2048_v44  ;;  %v8863_v9 = vld [vmem:[#allocation2_spill] sm:$0xff]  ;;  %v8868_v44 = vld [vmem:[#allocation12_spill] sm:$0xff] }
 0x3a7   :  { %v2129_v52 = vmax.f32 %v7482_v24, %v2049_v12  ;;  %v1868_v24 = vmul.f32 0.01, %v8863_v9  ;;  %v1910_v12 = vmul.f32 0.01, %v8868_v44 }
 0x3a9   :  { %v7488_v19 = vpop.f32.mrf.mxu3 }
 0x3aa   :  { %v7490_v37 = vpop.f32.mrf.mxu2  ;;  %v2047_v55 = vmul.f32 0.01, %v7488_v19 }
 0x3ab   :  { %v2050_v45 = vmul.f32 0.01, %v7490_v37 }
 0x3ac   :  { %5530 = vmatmul.msk.f32.vlgmr.msra.gmra.mxu0 %vm2192_vm4, %v7314_v2  ;;  %5534 = vmatmul.msk.f32.vlgmr.msra.gmra.mxu1 %vm2192_vm4, %v7314_v2 }
 0x3ad   :  { %v1768_v8 = vpop.f32.mrf.mxu0  ;;  %5526 = vmatmul.msk.f32.vlgmr.msra.gmra.mxu3 %vm2192_vm4, %v7314_v2  ;;  %5538 = vmatmul.msk.f32.vlgmr.msrb.gmra.mxu2 %vm2192_vm4, %v7314_v2 }
 0x3ae   :  { %v1797_v41 = vpop.f32.mrf.mxu1  ;;  %v2068_v14 = vmul.f32 0.01, %v1768_v8 }
 0x3af   :  { %v2069_v47 = vmul.f32 0.01, %v1797_v41 }
 0x3b0   :  { %v2148_v16 = vmax.f32 %v1768_v8, %v2068_v14  ;;  %v1989_v8 = vmax.f32 %v8860_v11, %v1909_v7  ;;  %v2127_v14 = vmax.f32 %v7488_v19, %v2047_v55  ;;  %v8876_v11 = vld [vmem:[#allocation11_spill] sm:$0xff]  ;;  %v8878_v55 = vld [vmem:[#allocation24_spill] sm:$0xff] }
 0x3b1   :  { %v2149_v56 = vmax.f32 %v1797_v41, %v2069_v47  ;;  %v2130_v47 = vmax.f32 %v7490_v37, %v2050_v45  ;;  %v1913_v37 = vmul.f32 0.01, %v8870_v40  ;;  %v1873_v7 = vmul.f32 0.01, %v8876_v11 }
 0x3b3   :  { %v7500_v48 = vpop.f32.mrf.mxu3 }
 0x3b4   :  { %5531 = vmatmul.msk.f32.gmra.mxu0 %vm2192_vm4, %v7354_v38  ;;  %5535 = vmatmul.msk.f32.gmra.mxu1 %vm2192_vm4, %v7354_v38  ;;  %v7506_v42 = vpop.f32.mrf.mxu2  ;;  %v2067_v32 = vmul.f32 0.01, %v7500_v48 }
 0x3b5   :  { %v1771_v27 = vpop.f32.mrf.mxu0  ;;  %5527 = vmatmul.msk.f32.gmra.mxu3 %vm2192_vm4, %v7354_v38  ;;  %5539 = vmatmul.msk.f32.gmra.mxu2 %vm2192_vm4, %v7354_v38  ;;  %v2070_v50 = vmul.f32 0.01, %v7506_v42 }
 0x3b6   :  { %v1800_v53 = vpop.f32.mrf.mxu1  ;;  %v2088_v46 = vmul.f32 0.01, %v1771_v27  ;;  %v2147_v41 = vmax.f32 %v7500_v48, %v2067_v32  ;;  %v1969_v48 = vmax.f32 %v8862_v1, %v1889_v29  ;;  %v1993_v32 = vmax.f32 %v8870_v40, %v1913_v37  ;;  %v8882_v40 = vld [vmem:[#allocation32_spill] sm:$0xff] }
 0x3b7   :  { %v2089_v61 = vmul.f32 0.01, %v1800_v53  ;;  %v1973_v29 = vmax.f32 %v8873_v13, %v1893_v57  ;;  %v1937_v37 = vmul.f32 0.01, %v8882_v40 }
 0x3b8   :  { %v2168_v39 = vmax.f32 %v1771_v27, %v2088_v46  ;;  %v8866_v46 = vld [vmem:[#allocation19_spill] sm:$0xff] }
 0x3b9   :  { %v2169_v17 = vmax.f32 %v1800_v53, %v2089_v61  ;;  %v8864_v53 = vld [vmem:[#allocation3_spill] sm:$0xff]  ;;  %v1932_v61 = vmul.f32 0.01, %v8866_v46 }
 0x3bb   :  { %v7512_v36 = vpop.f32.mrf.mxu3 }
 0x3bc   :  { %5532 = vmatmul.msk.f32.gmra.mxu0 %vm2192_vm4, %v7369_v33  ;;  %5536 = vmatmul.msk.f32.gmra.mxu1 %vm2192_vm4, %v7369_v33  ;;  %v7518_v62 = vpop.f32.mrf.mxu2  ;;  %v2087_v35 = vmul.f32 0.01, %v7512_v36 }
 0x3bd   :  { %v1774_v58 = vpop.f32.mrf.mxu0  ;;  %5528 = vmatmul.msk.f32.gmra.mxu3 %vm2192_vm4, %v7369_v33  ;;  %5540 = vmatmul.msk.f32.gmra.mxu2 %vm2192_vm4, %v7369_v33  ;;  %v2090_v3 = vmul.f32 0.01, %v7518_v62 }
 0x3be   :  { %v2108_v60 = vmul.f32 0.01, %v1774_v58  ;;  %v1803_v34 = vpop.f32.mrf.mxu1  ;;  %v2167_v23 = vmax.f32 %v7512_v36, %v2087_v35  ;;  %v1869_v36 = vmul.f32 0.01, %v8864_v53  ;;  %v2012_v35 = vmax.f32 %v8866_v46, %v1932_v61 }
 0x3bf   :  { %v2109_v49 = vmul.f32 0.01, %v1803_v34  ;;  %v2170_v26 = vmax.f32 %v7518_v62, %v2090_v3  ;;  %v1968_v62 = vmax.f32 %v8861_v18, %v1888_v59  ;;  %v8875_v3 = vld [vmem:[#allocation10_spill] sm:$0xff]  ;;  %v8877_v18 = vld [vmem:[#allocation27_spill] sm:$0xff] }
 0x3c0   :  { %v2188_v22 = vmax.f32 %v1774_v58, %v2108_v60  ;;  %v8865_v58 = vld [vmem:[#allocation15_spill] sm:$0xff]  ;;  %v1949_v19 = vmax.f32 %v8864_v53, %v1869_v36  ;;  %v1934_v59 = vmul.f32 0.01, %v8877_v18 }
 0x3c1   :  { %v2189_v20 = vmax.f32 %v1803_v34, %v2109_v49  ;;  %v1930_v60 = vmul.f32 0.01, %v8865_v58  ;;  %v2150_v34 = vmax.f32 %v7506_v42, %v2070_v50  ;;  %v8867_v49 = vld [vmem:[#allocation20_spill] sm:$0xff]  ;;  %v1948_v42 = vmax.f32 %v8863_v9, %v1868_v24 }
 0x3c2   :  { %2681 = vmatpush.msrb.mxu0 %v2188_v22  ;;  %v1933_v22 = vmul.f32 0.01, %v8867_v49  ;;  %v2014_v36 = vmax.f32 %v8877_v18, %v1934_v59  ;;  %v8888_v18 = vld [vmem:[#allocation22_spill] sm:$0xff] }
 0x3c3   :  { %2710 = vmatpush.msrb.mxu1 %v2189_v20  ;;  %v1745_v51 = vpop.f32.mrf.mxu3  ;;  %v2010_v25 = vmax.f32 %v8865_v58, %v1930_v60  ;;  %v1876_v59 = vmul.f32 0.01, %v8888_v18 }
 0x3c4   :  { %5533 = vmatmul.msk.f32.gmra.mxu0 %vm2192_vm4, %v7382_v6  ;;  %5537 = vmatmul.msk.f32.gmra.mxu1 %vm2192_vm4, %v7382_v6  ;;  %v2107_v28 = vmul.f32 0.01, %v1745_v51  ;;  %v1832_v30 = vpop.f32.mrf.mxu2 }
 0x3c5   :  { %v2110_v0 = vmul.f32 0.01, %v1832_v30  ;;  %2682 = vmatpush.msrb.mxu0 %v2168_v39  ;;  %2711 = vmatpush.msrb.mxu1 %v2169_v17  ;;  %v7533_v43 = vpop.f32.mrf.mxu0  ;;  %v8869_v39 = vld [vmem:[#allocation16_spill] sm:$0xff] }
 0x3c6   :  { %v2187_v10 = vmax.f32 %v1745_v51, %v2107_v28  ;;  %v7536_v21 = vpop.f32.mrf.mxu1  ;;  %5529 = vmatmul.msk.f32.gmra.mxu3 %vm2192_vm4, %v7382_v6  ;;  %5541 = vmatmul.msk.f32.gmra.mxu2 %vm2192_vm4, %v7382_v6  ;;  %v1912_v17 = vmul.f32 0.01, %v8869_v39  ;;  %v8871_v28 = vld [vmem:[#allocation9_spill] sm:$0xff] }
 0x3c7   :  { %v2190_v4 = vmax.f32 %v1832_v30, %v2110_v0  ;;  %2683 = vmatpush.msrb.mxu0 %v2148_v16  ;;  %2712 = vmatpush.msrb.mxu1 %v2149_v56  ;;  %v1890_v30 = vmul.f32 0.01, %v8871_v28  ;;  %v8872_v16 = vld [vmem:[#allocation13_spill] sm:$0xff]  ;;  %v2013_v0 = vmax.f32 %v8867_v49, %v1933_v22 }
 0x3c8   :  { %2652 = vmatpush.msrb.mxu3 %v2187_v10  ;;  %v1892_v56 = vmul.f32 0.01, %v8872_v16  ;;  %v8874_v10 = vld [vmem:[#allocation6_spill] sm:$0xff] }
 0x3c9   :  { %2684 = vmatpush.msrb.mxu0 %v2128_v31  ;;  %2713 = vmatpush.msrb.mxu1 %v2129_v52  ;;  %v1870_v31 = vmul.f32 0.01, %v8874_v10  ;;  %v1990_v52 = vmax.f32 %v8868_v44, %v1910_v12  ;;  %v1970_v50 = vmax.f32 %v8871_v28, %v1890_v30  ;;  %v8883_v30 = vld [vmem:[#allocation28_spill] sm:$0xff] }
 0x3ca   :  { %2739 = vmatpush.msra.mxu2 %v2190_v4  ;;  %2653 = vmatpush.msrb.mxu3 %v2167_v23  ;;  %v1872_v4 = vmul.f32 0.01, %v8875_v3  ;;  %v1972_v23 = vmax.f32 %v8872_v16, %v1892_v56  ;;  %v1916_v16 = vmul.f32 0.01, %v8883_v30 }
 0x3cb   :  { %2809 = vmatpush.msra.mxu0 %v2008_v5  ;;  %2838 = vmatpush.msra.mxu1 %v2009_v15  ;;  %v7557_v63 = vpop.f32.mrf.mxu3  ;;  %v1992_v5 = vmax.f32 %v8869_v39, %v1912_v17  ;;  %v8881_v39 = vld [vmem:[#allocation31_spill] sm:$0xff] }
 0x3cc   :  { %5546 = vmatmul.msk.f32.vlgmr.msrb.gmra.mxu0 %vm2192_vm4, %v7314_v2  ;;  %5550 = vmatmul.msk.f32.vlgmr.msrb.gmra.mxu1 %vm2192_vm4, %v7314_v2  ;;  %v7566_v27 = vpop.f32.mrf.mxu2  ;;  %v1952_v9 = vmax.f32 %v8875_v3, %v1872_v4  ;;  %v1936_v17 = vmul.f32 0.01, %v8881_v39  ;;  %v2051_v57 = vmul.f32 0.01, %v7557_v63  ;;  %v8886_v3 = vld [vmem:[#allocation26_spill] sm:$0xff] }
 0x3cd   :  { %2740 = vmatpush.msra.mxu2 %v2170_v26  ;;  %2810 = vmatpush.msra.mxu0 %v1988_v54  ;;  %v1914_v54 = vmul.f32 0.01, %v8878_v55  ;;  %v1950_v26 = vmax.f32 %v8874_v10, %v1870_v31  ;;  %v8885_v10 = vld [vmem:[#allocation25_spill] sm:$0xff]  ;;  %v1897_v4 = vmul.f32 0.01, %v8886_v3 }
 0x3ce   :  { %2839 = vmatpush.msra.mxu1 %v1989_v8  ;;  %2654 = vmatpush.msrb.mxu3 %v2147_v41  ;;  %v1953_v8 = vmax.f32 %v8876_v11, %v1873_v7  ;;  %v8879_v41 = vld [vmem:[#allocation21_spill] sm:$0xff]  ;;  %v1896_v31 = vmul.f32 0.01, %v8885_v10  ;;  %v8887_v11 = vld [vmem:[#allocation63_spill] sm:$0xff] }
 0x3cf   :  { %2741 = vmatpush.msra.mxu2 %v2150_v34  ;;  %2811 = vmatpush.msra.mxu0 %v1968_v62  ;;  %v7577_v20 = vpop.f32.mrf.mxu0  ;;  %v1894_v53 = vmul.f32 0.01, %v8879_v41  ;;  %v8880_v62 = vld [vmem:[#allocation18_spill] sm:$0xff]  ;;  %v1994_v60 = vmax.f32 %v8878_v55, %v1914_v54  ;;  %v1931_v7 = vmul.f32 0.01, %v8887_v11  ;;  %v8889_v55 = vld [vmem:[#allocation23_spill] sm:$0xff] }
 0x3d0   :  { %2840 = vmatpush.msra.mxu1 %v1969_v48  ;;  %v7582_v51 = vpop.f32.mrf.mxu1  ;;  %2655 = vmatpush.msrb.mxu3 %v2127_v14  ;;  %v1874_v58 = vmul.f32 0.01, %v8880_v62  ;;  %v1877_v54 = vmul.f32 0.01, %v8889_v55 }
 0x3d1   :  { %2742 = vmatpush.msra.mxu2 %v2130_v47  ;;  %5542 = vmatmul.msk.f32.vlgmr.msrb.gmra.mxu3 %vm2192_vm4, %v7314_v2  ;;  %v1974_v34 = vmax.f32 %v8879_v41, %v1894_v53  ;;  %v1976_v41 = vmax.f32 %v8885_v10, %v1896_v31  ;;  %v1977_v53 = vmax.f32 %v8886_v3, %v1897_v4  ;;  %v8898_v31 = vld [vmem:[#allocation66_spill] sm:$0xff] }
 0x3d2   :  { %5554 = vmatmul.msk.f32.vlgmr.msra.gmra.mxu2 %vm2192_vm4, %v7314_v2  ;;  %2812 = vmatpush.msra.mxu0 %v1948_v42  ;;  %v1954_v61 = vmax.f32 %v8880_v62, %v1874_v58  ;;  %v8892_v58 = vld [vmem:[#allocation62_spill] sm:$0xff] }
 0x3d3   :  { %2841 = vmatpush.msra.mxu1 %v1949_v19  ;;  %2867 = vmatpush.msrb.mxu2 %v2010_v25 }
 0x3d4   :  { %2925 = vmatpush.msrb.mxu0 %v2012_v35  ;;  %5551 = vmatmul.msk.f32.gmra.mxu1 %vm2192_vm4, %v7354_v38  ;;  %v7665_v35 = vld [vmem:[%s8698_s5] sm:$0xff] }
 0x3d5   :  { %2954 = vmatpush.msrb.mxu1 %v2013_v0  ;;  %5547 = vmatmul.msk.f32.gmra.mxu0 %vm2192_vm4, %v7354_v38  ;;  %v7607_v15 = vpop.f32.mrf.mxu3  ;;  %v8884_v0 = vld [vmem:[#allocation29_spill] sm:$0xff] }
 0x3d6   :  { %2868 = vmatpush.msrb.mxu2 %v1990_v52  ;;  %2926 = vmatpush.msrb.mxu0 %v1992_v5  ;;  %v7611_v1 = vpop.f32.mrf.mxu2  ;;  %v2071_v28 = vmul.f32 0.01, %v7607_v15  ;;  %v1917_v13 = vmul.f32 0.01, %v8884_v0  ;;  %v2016_v52 = vmax.f32 %v8881_v39, %v1936_v17  ;;  %v2017_v5 = vmax.f32 %v8882_v40, %v1937_v37  ;;  %v8894_v17 = vld [vmem:[#allocation61_spill] sm:$0xff]  ;;  %v7710_v40 = vld [vmem:[%s8698_s5 + $0x8] sm:$0xff] }
 0x3d7   :  { %2955 = vmatpush.msrb.mxu1 %v1993_v32  ;;  %v7615_v45 = vpop.f32.mrf.mxu0 }
 0x3d8   :  { %2869 = vmatpush.msrb.mxu2 %v1970_v50  ;;  %2927 = vmatpush.msrb.mxu0 %v1972_v23  ;;  %v7619_v24 = vpop.f32.mrf.mxu1  ;;  %v2151_v32 = vmax.f32 %v7607_v15, %v2071_v28  ;;  %v1996_v50 = vmax.f32 %v8883_v30, %v1916_v16  ;;  %v8890_v15 = vld [vmem:[#allocation39_spill] sm:$0xff]  ;;  %v8896_v30 = vld [vmem:[#allocation60_spill] sm:$0xff] }
 0x3d9   :  { %2956 = vmatpush.msrb.mxu1 %v1973_v29  ;;  %5543 = vmatmul.msk.f32.gmra.mxu3 %vm2192_vm4, %v7354_v38  ;;  %v1871_v16 = vmul.f32 0.01, %v8896_v30 }
 0x3da   :  { %2870 = vmatpush.msrb.mxu2 %v1950_v26  ;;  %2928 = vmatpush.msrb.mxu0 %v1952_v9  ;;  %v1997_v26 = vmax.f32 %v8884_v0, %v1917_v13  ;;  %v1938_v9 = vmul.f32 0.01, %v8890_v15  ;;  %v8897_v0 = vld [vmem:[#allocation67_spill] sm:$0xff] }
 0x3db   :  { %2957 = vmatpush.msrb.mxu1 %v1953_v8  ;;  %5555 = vmatmul.msk.f32.gmra.mxu2 %vm2192_vm4, %v7354_v38  ;;  %v2131_v8 = vmax.f32 %v7557_v63, %v2051_v57  ;;  %v1956_v63 = vmax.f32 %v8888_v18, %v1876_v59  ;;  %v1935_v13 = vmul.f32 0.01, %v8897_v0  ;;  %v8899_v18 = vld [vmem:[#allocation65_spill] sm:$0xff] }
 0x3dc   :  { %2983 = vmatpush.msra.mxu2 %v2014_v36  ;;  %5552 = vmatmul.msk.f32.gmra.mxu1 %vm2192_vm4, %v7369_v33  ;;  %v8891_v36 = vld [vmem:[#allocation36_spill] sm:$0xff]  ;;  %v2018_v39 = vmax.f32 %v8890_v15, %v1938_v9  ;;  %v1895_v59 = vmul.f32 0.01, %v8899_v18 }
 0x3dd   :  { %5548 = vmatmul.msk.f32.gmra.mxu0 %vm2192_vm4, %v7369_v33  ;;  %v1858_v48 = vpop.f32.mrf.mxu3  ;;  %v1918_v62 = vmul.f32 0.01, %v8891_v36 }
 0x3de   :  { %2984 = vmatpush.msra.mxu2 %v1994_v60  ;;  %v7635_v46 = vpop.f32.mrf.mxu2  ;;  %v2091_v47 = vmul.f32 0.01, %v1858_v48  ;;  %v1911_v60 = vmul.f32 0.01, %v8892_v58  ;;  %v1975_v9 = vmax.f32 %v8899_v18, %v1895_v59  ;;  %v8912_v18 = vld [vmem:[#allocation50_spill] sm:$0xff] }
 0x3df   :  { %v7638_v49 = vpop.f32.mrf.mxu0  ;;  %v1998_v28 = vmax.f32 %v8891_v36, %v1918_v62  ;;  %v7768_v62 = vld [vmem:[%s8698_s5 + $0x18] sm:$0xff]  ;;  %v1942_v59 = vmul.f32 0.01, %v8912_v18 }
 0x3e0   :  { %2985 = vmatpush.msra.mxu2 %v1974_v34  ;;  %v7640_v22 = vpop.f32.mrf.mxu1  ;;  %v2171_v56 = vmax.f32 %v1858_v48, %v2091_v47  ;;  %v2011_v34 = vmax.f32 %v8887_v11, %v1931_v7  ;;  %v8893_v47 = vld [vmem:[#allocation33_spill] sm:$0xff]  ;;  %v1951_v11 = vmax.f32 %v8896_v30, %v1871_v16  ;;  %v8908_v16 = vld [vmem:[#allocation38_spill] sm:$0xff] }
 0x3e1   :  { %5544 = vmatmul.msk.f32.gmra.mxu3 %vm2192_vm4, %v7369_v33 }
 0x3e2   :  { %2986 = vmatpush.msra.mxu2 %v1954_v61 }
 0x3e3   :  { %5556 = vmatmul.msk.f32.gmra.mxu2 %vm2192_vm4, %v7369_v33 }
 0x3e4   :  { %5553 = vmatmul.msk.f32.gmra.mxu1 %vm2192_vm4, %v7382_v6 }
 0x3e5   :  { %5549 = vmatmul.msk.f32.gmra.mxu0 %vm2192_vm4, %v7382_v6  ;;  %v1861_v14 = vpop.f32.mrf.mxu3 }
 0x3e6   :  { %v2111_v42 = vmul.f32 0.01, %v1861_v14  ;;  %v7650_v44 = vpop.f32.mrf.mxu2 }
 0x3e7   :  { %v7652_v12 = vpop.f32.mrf.mxu0 }
 0x3e8   :  { %v2191_v19 = vmax.f32 %v1861_v14, %v2111_v42  ;;  %v7655_v25 = vpop.f32.mrf.mxu1  ;;  %v1957_v14 = vmax.f32 %v8889_v55, %v1877_v54  ;;  %v1898_v42 = vmul.f32 0.01, %v8893_v47  ;;  %v7743_v55 = vld [vmem:[%s8698_s5 + $0x10] sm:$0xff] }
 0x3e9   :  { %5545 = vmatmul.msk.f32.gmra.mxu3 %vm2192_vm4, %v7382_v6  ;;  %v8900_v54 = vld [vmem:[#allocation64_spill] sm:$0xff] }
 0x3ea   :  { %2768 = vmatpush.msra.mxu3 %v2191_v19  ;;  %v1891_v19 = vmul.f32 0.01, %v8894_v17  ;;  %v1978_v57 = vmax.f32 %v8893_v47, %v1898_v42  ;;  %v8904_v47 = vld [vmem:[#allocation44_spill] sm:$0xff] }
 0x3eb   :  { %5557 = vmatmul.msk.f32.gmra.mxu2 %vm2192_vm4, %v7382_v6  ;;  %v1941_v42 = vmul.f32 0.01, %v8904_v47 }
 0x3ec   :  { %2769 = vmatpush.msra.mxu3 %v2171_v56  ;;  %5566 = vmatmul.msk.f32.vlgmr.msra.gmra.mxu1 %vm2192_vm4, %v7665_v35  ;;  %v1991_v56 = vmax.f32 %v8892_v58, %v1911_v60  ;;  %v1971_v10 = vmax.f32 %v8894_v17, %v1891_v19  ;;  %v8906_v19 = vld [vmem:[#allocation41_spill] sm:$0xff] }
 0x3ed   :  { %5562 = vmatmul.msk.f32.vlgmr.msra.gmra.mxu0 %vm2192_vm4, %v7665_v35  ;;  %v7683_v23 = vpop.f32.mrf.mxu3  ;;  %3070 = vmatpush.msra.mxu1 %v2017_v5 }
 0x3ee   :  { %3041 = vmatpush.msra.mxu0 %v2016_v52  ;;  %v7685_v29 = vpop.f32.mrf.mxu2  ;;  %2770 = vmatpush.msra.mxu3 %v2151_v32  ;;  %v1915_v52 = vmul.f32 0.01, %v8898_v31 }
 0x3ef   :  { %3071 = vmatpush.msra.mxu1 %v1997_v26  ;;  %v1875_v26 = vmul.f32 0.01, %v8900_v54 }
 0x3f0   :  { %3042 = vmatpush.msra.mxu0 %v1996_v50  ;;  %2771 = vmatpush.msra.mxu3 %v2131_v8  ;;  %v2015_v50 = vmax.f32 %v8897_v0, %v1935_v13  ;;  %v1995_v15 = vmax.f32 %v8898_v31, %v1915_v52  ;;  %v2021_v0 = vmax.f32 %v8904_v47, %v1941_v42  ;;  %v8909_v13 = vld [vmem:[#allocation34_spill] sm:$0xff]  ;;  %v8911_v52 = vld [vmem:[#allocation35_spill] sm:$0xff] }
 0x3f1   :  { %v7696_v48 = vpop.f32.mrf.mxu0  ;;  %v7698_v61 = vpop.f32.mrf.mxu1  ;;  %5558 = vmatmul.msk.f32.vlgmr.msra.gmra.mxu3 %vm2192_vm4, %v7314_v2  ;;  %3072 = vmatpush.msra.mxu1 %v1977_v53  ;;  %v8895_v2 = vld [vmem:[#allocation30_spill] sm:$0xff] }
 0x3f2   :  { %3043 = vmatpush.msra.mxu0 %v1976_v41  ;;  %2896 = vmatpush.msrb.mxu3 %v2011_v34  ;;  %v1878_v37 = vmul.f32 0.01, %v8895_v2  ;;  %v8901_v34 = vld [vmem:[#allocation43_spill] sm:$0xff]  ;;  %v8916_v47 = vld [vmem:[#allocation70_spill] sm:$0xff] }
 0x3f3   :  { %5570 = vmatmul.msk.f32.vlgmr.msrb.gmra.mxu2 %vm2192_vm4, %v7665_v35  ;;  %3073 = vmatpush.msra.mxu1 %v1957_v14  ;;  %v1919_v42 = vmul.f32 0.01, %v8916_v47 }
 0x3f4   :  { %3044 = vmatpush.msra.mxu0 %v1956_v63  ;;  %3099 = vmatpush.msrb.mxu2 %v2018_v39  ;;  %v1958_v5 = vmax.f32 %v8895_v2, %v1878_v37  ;;  %v8905_v39 = vld [vmem:[#allocation40_spill] sm:$0xff]  ;;  %v1921_v2 = vmul.f32 0.01, %v8906_v19  ;;  %v8907_v37 = vld [vmem:[#allocation37_spill] sm:$0xff] }
 0x3f5   :  { %5563 = vmatmul.msk.f32.gmra.mxu0 %vm2192_vm4, %v7710_v40  ;;  %5567 = vmatmul.msk.f32.gmra.mxu1 %vm2192_vm4, %v7710_v40  ;;  %v1920_v17 = vmul.f32 0.01, %v8905_v39 }
 0x3f6   :  { %2897 = vmatpush.msrb.mxu3 %v1991_v56  ;;  %3100 = vmatpush.msrb.mxu2 %v1998_v28  ;;  %v1900_v28 = vmul.f32 0.01, %v8907_v37  ;;  %v1901_v56 = vmul.f32 0.01, %v8908_v16 }
 0x3f8   :  { %v7726_v3 = vpop.f32.mrf.mxu3  ;;  %v7728_v4 = vpop.f32.mrf.mxu2  ;;  %2898 = vmatpush.msrb.mxu3 %v1971_v10  ;;  %3101 = vmatpush.msrb.mxu2 %v1978_v57  ;;  %v1880_v57 = vmul.f32 0.01, %v8909_v13  ;;  %v8910_v10 = vld [vmem:[#allocation71_spill] sm:$0xff] }
 0x3f9   :  { %v7732_v7 = vpop.f32.mrf.mxu0  ;;  %v7734_v32 = vpop.f32.mrf.mxu1  ;;  %5559 = vmatmul.msk.f32.gmra.mxu3 %vm2192_vm4, %v7354_v38  ;;  %v1955_v38 = vmax.f32 %v8900_v54, %v1875_v26  ;;  %v1939_v31 = vmul.f32 0.01, %v8910_v10  ;;  %v1980_v26 = vmax.f32 %v8907_v37, %v1900_v28  ;;  %v2022_v28 = vmax.f32 %v8912_v18, %v1942_v59 }
 0x3fa   :  { %2899 = vmatpush.msrb.mxu3 %v1951_v11  ;;  %3102 = vmatpush.msrb.mxu2 %v1958_v5  ;;  %v1881_v5 = vmul.f32 0.01, %v8911_v52  ;;  %v2001_v11 = vmax.f32 %v8906_v19, %v1921_v2  ;;  %v8917_v2 = vld [vmem:[#allocation45_spill] sm:$0xff] }
 0x3fb   :  { %5571 = vmatmul.msk.f32.gmra.mxu2 %vm2192_vm4, %v7710_v40  ;;  %v1902_v37 = vmul.f32 0.01, %v8917_v2 }
 0x3fc   :  { %3012 = vmatpush.msra.mxu3 %v2015_v50  ;;  %v1961_v19 = vmax.f32 %v8911_v52, %v1881_v5 }
 0x3fd   :  { %5564 = vmatmul.msk.f32.gmra.mxu0 %vm2192_vm4, %v7743_v55  ;;  %5568 = vmatmul.msk.f32.gmra.mxu1 %vm2192_vm4, %v7743_v55 }
 0x3fe   :  { %3013 = vmatpush.msra.mxu3 %v1995_v15 }
 0x400   :  { %3014 = vmatpush.msra.mxu3 %v1975_v9  ;;  %v7755_v8 = vpop.f32.mrf.mxu3  ;;  %v7757_v41 = vpop.f32.mrf.mxu2 }
 0x401   :  { %v7759_v53 = vpop.f32.mrf.mxu0  ;;  %v7761_v36 = vpop.f32.mrf.mxu1  ;;  %5560 = vmatmul.msk.f32.gmra.mxu3 %vm2192_vm4, %v7369_v33  ;;  %v1940_v33 = vmul.f32 0.01, %v8901_v34 }
 0x402   :  { %3015 = vmatpush.msra.mxu3 %v1955_v38  ;;  %v1981_v38 = vmax.f32 %v8908_v16, %v1901_v56  ;;  %v8919_v56 = vld [vmem:[#allocation42_spill] sm:$0xff] }
 0x403   :  { %5572 = vmatmul.msk.f32.gmra.mxu2 %vm2192_vm4, %v7743_v55  ;;  %v2020_v30 = vmax.f32 %v8901_v34, %v1940_v33  ;;  %v8915_v34 = vld [vmem:[#allocation48_spill] sm:$0xff] }
 0x404   :  { %v1922_v33 = vmul.f32 0.01, %v8915_v34 }
 0x405   :  { %5565 = vmatmul.msk.f32.gmra.mxu0 %vm2192_vm4, %v7768_v62  ;;  %5569 = vmatmul.msk.f32.gmra.mxu1 %vm2192_vm4, %v7768_v62 }
 0x408   :  { %v7776_v58 = vpop.f32.mrf.mxu3  ;;  %v7778_v60 = vpop.f32.mrf.mxu2 }
 0x409   :  { %v7781_v63 = vpop.f32.mrf.mxu0  ;;  %v7783_v14 = vpop.f32.mrf.mxu1  ;;  %5561 = vmatmul.msk.f32.gmra.mxu3 %vm2192_vm4, %v7382_v6  ;;  %v2000_v6 = vmax.f32 %v8905_v39, %v1920_v17  ;;  %v1960_v39 = vmax.f32 %v8909_v13, %v1880_v57  ;;  %v2019_v17 = vmax.f32 %v8910_v10, %v1939_v31  ;;  %v2002_v13 = vmax.f32 %v8915_v34, %v1922_v33  ;;  %v8920_v57 = vld [vmem:[#allocation68_spill] sm:$0xff] }
 0x40a   :  { %8902 = vst [vmem:[#allocation7_spill] sm:$0xff] %v7781_v63  ;;  %v1999_v10 = vmax.f32 %v8916_v47, %v1919_v42  ;;  %v1982_v31 = vmax.f32 %v8917_v2, %v1902_v37  ;;  %v8930_v37 = vld [vmem:[#allocation56_spill] sm:$0xff] }
 0x40b   :  { %8903 = vst [vmem:[#allocation8_spill] sm:$0xff] %v7783_v14  ;;  %5573 = vmatmul.msk.f32.gmra.mxu2 %vm2192_vm4, %v7768_v62 }
 0x40d   :  { %5578 = vmatmul.msk.f32.vlgmr.msrb.gmra.mxu0 %vm2192_vm4, %v7665_v35  ;;  %5582 = vmatmul.msk.f32.vlgmr.msrb.gmra.mxu1 %vm2192_vm4, %v7665_v35 }
 0x40e   :  { %3157 = vmatpush.msrb.mxu0 %v2020_v30  ;;  %3186 = vmatpush.msrb.mxu1 %v2021_v0  ;;  %v8918_v30 = vld [vmem:[#allocation69_spill] sm:$0xff]  ;;  %v1882_v0 = vmul.f32 0.01, %v8919_v56 }
 0x40f   :  { %v1899_v16 = vmul.f32 0.01, %v8918_v30 }
 0x410   :  { %v7806_v50 = vpop.f32.mrf.mxu3  ;;  %v7808_v54 = vpop.f32.mrf.mxu2  ;;  %3158 = vmatpush.msrb.mxu0 %v2000_v6  ;;  %3187 = vmatpush.msrb.mxu1 %v2001_v11  ;;  %v1879_v6 = vmul.f32 0.01, %v8920_v57 }
 0x411   :  { %8913 = vst [vmem:[#allocation4_spill] sm:$0xff] %v7806_v50  ;;  %v7811_v15 = vpop.f32.mrf.mxu0  ;;  %v7813_v9 = vpop.f32.mrf.mxu1  ;;  %5574 = vmatmul.msk.f32.vlgmr.msrb.gmra.mxu3 %vm2192_vm4, %v7665_v35  ;;  %v1979_v52 = vmax.f32 %v8918_v30, %v1899_v16  ;;  %v8931_v30 = vld [vmem:[#allocation57_spill] sm:$0xff] }
 0x412   :  { %8914 = vst [vmem:[#allocation5_spill] sm:$0xff] %v7808_v54  ;;  %3159 = vmatpush.msrb.mxu0 %v1980_v26  ;;  %3188 = vmatpush.msrb.mxu1 %v1981_v38  ;;  %v1962_v26 = vmax.f32 %v8919_v56, %v1882_v0  ;;  %v1959_v38 = vmax.f32 %v8920_v57, %v1879_v6  ;;  %v1945_v16 = vmul.f32 0.01, %v8931_v30  ;;  %v8932_v56 = vld [vmem:[#allocation53_spill] sm:$0xff]  ;;  %v8937_v54 = vld [vmem:[#allocation46_spill] sm:$0xff] }
 0x413   :  { %5586 = vmatmul.msk.f32.vlgmr.msra.gmra.mxu2 %vm2192_vm4, %v7665_v35  ;;  %3128 = vmatpush.msrb.mxu3 %v2019_v17  ;;  %v1924_v0 = vmul.f32 0.01, %v8932_v56  ;;  %v8934_v6 = vld [vmem:[#allocation49_spill] sm:$0xff] }
 0x414   :  { %3160 = vmatpush.msrb.mxu0 %v1960_v39  ;;  %3189 = vmatpush.msrb.mxu1 %v1961_v19 }
 0x415   :  { %3215 = vmatpush.msra.mxu2 %v2022_v28  ;;  %5579 = vmatmul.msk.f32.gmra.mxu0 %vm2192_vm4, %v7710_v40  ;;  %v1944_v28 = vmul.f32 0.01, %v8930_v37 }
 0x416   :  { %5583 = vmatmul.msk.f32.gmra.mxu1 %vm2192_vm4, %v7710_v40  ;;  %3129 = vmatpush.msrb.mxu3 %v1999_v10  ;;  %v1904_v10 = vmul.f32 0.01, %v8934_v6 }
 0x417   :  { %3216 = vmatpush.msra.mxu2 %v2002_v13  ;;  %v8933_v13 = vld [vmem:[#allocation54_spill] sm:$0xff] }
 0x418   :  { %v7838_v5 = vpop.f32.mrf.mxu3  ;;  %v7840_v11 = vpop.f32.mrf.mxu2  ;;  %3130 = vmatpush.msrb.mxu3 %v1979_v52  ;;  %v1925_v57 = vmul.f32 0.01, %v8933_v13  ;;  %v1984_v14 = vmax.f32 %v8934_v6, %v1904_v10  ;;  %v8945_v6 = vld [vmem:[#allocation55_spill] sm:$0xff] }
 0x419   :  { %8921 = vst [vmem:[#allocation2_spill] sm:$0xff] %v7838_v5  ;;  %v7842_v18 = vpop.f32.mrf.mxu0  ;;  %v7844_v59 = vpop.f32.mrf.mxu1  ;;  %3217 = vmatpush.msra.mxu2 %v1982_v31  ;;  %5575 = vmatmul.msk.f32.gmra.mxu3 %vm2192_vm4, %v7710_v40  ;;  %v8935_v31 = vld [vmem:[#allocation51_spill] sm:$0xff]  ;;  %v1906_v10 = vmul.f32 0.01, %v8945_v6 }
 0x41a   :  { %8922 = vst [vmem:[#allocation3_spill] sm:$0xff] %v7840_v11  ;;  %3131 = vmatpush.msrb.mxu3 %v1959_v38  ;;  %v1905_v52 = vmul.f32 0.01, %v8935_v31  ;;  %v2025_v38 = vmax.f32 %v8931_v30, %v1945_v16  ;;  %v8938_v11 = vld [vmem:[#allocation47_spill] sm:$0xff] }
 0x41b   :  { %3218 = vmatpush.msra.mxu2 %v1962_v26  ;;  %v2024_v26 = vmax.f32 %v8930_v37, %v1944_v28  ;;  %v1885_v50 = vmul.f32 0.01, %v8938_v11  ;;  %v8941_v30 = vld [vmem:[#allocation59_spill] sm:$0xff] }
 0x41c   :  { %5587 = vmatmul.msk.f32.gmra.mxu2 %vm2192_vm4, %v7710_v40  ;;  %v1946_v16 = vmul.f32 0.01, %v8941_v30  ;;  %v1985_v63 = vmax.f32 %v8935_v31, %v1905_v52 }
 0x41d   :  { %5580 = vmatmul.msk.f32.gmra.mxu0 %vm2192_vm4, %v7743_v55 }
 0x41e   :  { %5584 = vmatmul.msk.f32.gmra.mxu1 %vm2192_vm4, %v7743_v55 }
 0x420   :  { %v7856_v34 = vpop.f32.mrf.mxu3  ;;  %v7858_v33 = vpop.f32.mrf.mxu2 }
 0x421   :  { %8923 = vst [vmem:[#allocation15_spill] sm:$0xff] %v7856_v34  ;;  %v7860_v47 = vpop.f32.mrf.mxu0  ;;  %v7862_v42 = vpop.f32.mrf.mxu1  ;;  %5576 = vmatmul.msk.f32.gmra.mxu3 %vm2192_vm4, %v7743_v55 }
 0x422   :  { %8924 = vst [vmem:[#allocation19_spill] sm:$0xff] %v7858_v33  ;;  %v2004_v33 = vmax.f32 %v8932_v56, %v1924_v0  ;;  %v8943_v0 = vld [vmem:[#allocation58_spill] sm:$0xff] }
 0x423   :  { %8925 = vst [vmem:[#allocation20_spill] sm:$0xff] %v7862_v42  ;;  %v8942_v42 = vld [vmem:[#allocation74_spill] sm:$0xff] }
 0x424   :  { %5588 = vmatmul.msk.f32.gmra.mxu2 %vm2192_vm4, %v7743_v55  ;;  %v1923_v56 = vmul.f32 0.01, %v8942_v42 }
 0x425   :  { %5581 = vmatmul.msk.f32.gmra.mxu0 %vm2192_vm4, %v7768_v62 }
 0x426   :  { %5585 = vmatmul.msk.f32.gmra.mxu1 %vm2192_vm4, %v7768_v62 }
 0x428   :  { %v7872_v39 = vpop.f32.mrf.mxu3  ;;  %v7874_v17 = vpop.f32.mrf.mxu2 }
 0x429   :  { %8926 = vst [vmem:[#allocation12_spill] sm:$0xff] %v7872_v39  ;;  %v7876_v19 = vpop.f32.mrf.mxu0  ;;  %v7878_v2 = vpop.f32.mrf.mxu1  ;;  %5577 = vmatmul.msk.f32.gmra.mxu3 %vm2192_vm4, %v7768_v62  ;;  %v2005_v39 = vmax.f32 %v8933_v13, %v1925_v57  ;;  %v1926_v13 = vmul.f32 0.01, %v8943_v0 }
 0x42a   :  { %8927 = vst [vmem:[#allocation16_spill] sm:$0xff] %v7874_v17  ;;  %v1884_v17 = vmul.f32 0.01, %v8937_v54 }
 0x42b   :  { %8928 = vst [vmem:[#allocation17_spill] sm:$0xff] %v7876_v19 }
 0x42c   :  { %8929 = vst [vmem:[#allocation9_spill] sm:$0xff] %v7878_v2  ;;  %5589 = vmatmul.msk.f32.gmra.mxu2 %vm2192_vm4, %v7768_v62  ;;  %v8936_v2 = vld [vmem:[#allocation75_spill] sm:$0xff] }
 0x42d   :  { %v1943_v19 = vmul.f32 0.01, %v8936_v2  ;;  %5594 = vmatmul.msk.f32.vlgmr.msra.gmra.mxu0 %vm2192_vm4, %v7665_v35 }
 0x42e   :  { %5598 = vmatmul.msk.f32.vlgmr.msra.gmra.mxu1 %vm2192_vm4, %v7665_v35  ;;  %3273 = vmatpush.msra.mxu0 %v2024_v26  ;;  %v1964_v26 = vmax.f32 %v8937_v54, %v1884_v17  ;;  %v8947_v54 = vld [vmem:[#allocation52_spill] sm:$0xff] }
 0x42f   :  { %3302 = vmatpush.msra.mxu1 %v2025_v38  ;;  %v2023_v57 = vmax.f32 %v8936_v2, %v1943_v19  ;;  %v1965_v38 = vmax.f32 %v8938_v11, %v1885_v50  ;;  %v2003_v2 = vmax.f32 %v8942_v42, %v1923_v56  ;;  %v1886_v50 = vmul.f32 0.01, %v8947_v54 }
 0x430   :  { %v7901_v37 = vpop.f32.mrf.mxu3  ;;  %v7903_v28 = vpop.f32.mrf.mxu2  ;;  %3274 = vmatpush.msra.mxu0 %v2004_v33  ;;  %v2026_v33 = vmax.f32 %v8941_v30, %v1946_v16  ;;  %v2006_v11 = vmax.f32 %v8943_v0, %v1926_v13  ;;  %v1986_v42 = vmax.f32 %v8945_v6, %v1906_v10  ;;  %v8954_v6 = vld [vmem:[#allocation79_spill] sm:$0xff] }
 0x431   :  { %8939 = vst [vmem:[#allocation13_spill] sm:$0xff] %v7901_v37  ;;  %v7906_v5 = vpop.f32.mrf.mxu0  ;;  %v7908_v34 = vpop.f32.mrf.mxu1  ;;  %3303 = vmatpush.msra.mxu1 %v2005_v39  ;;  %5590 = vmatmul.msk.f32.vlgmr.msra.gmra.mxu3 %vm2192_vm4, %v7665_v35  ;;  %v8946_v39 = vld [vmem:[#allocation72_spill] sm:$0xff]  ;;  %v1947_v10 = vmul.f32 0.01, %v8954_v6 }
 0x432   :  { %8940 = vst [vmem:[#allocation14_spill] sm:$0xff] %v7903_v28  ;;  %v8944_v28 = vld [vmem:[#allocation73_spill] sm:$0xff]  ;;  %3275 = vmatpush.msra.mxu0 %v1984_v14  ;;  %3244 = vmatpush.msra.mxu3 %v2023_v57  ;;  %v1883_v19 = vmul.f32 0.01, %v8946_v39 }
 0x433   :  { %v1903_v37 = vmul.f32 0.01, %v8944_v28  ;;  %3304 = vmatpush.msra.mxu1 %v1985_v63 }
 0x434   :  { %5602 = vmatmul.msk.f32.vlgmr.msrb.gmra.mxu2 %vm2192_vm4, %v7665_v35  ;;  %3276 = vmatpush.msra.mxu0 %v1964_v26  ;;  %v1963_v30 = vmax.f32 %v8946_v39, %v1883_v19  ;;  %v8956_v19 = vld [vmem:[#allocation77_spill] sm:$0xff] }
 0x435   :  { %3305 = vmatpush.msra.mxu1 %v1965_v38  ;;  %3331 = vmatpush.msrb.mxu2 %v2026_v33  ;;  %v1983_v63 = vmax.f32 %v8944_v28, %v1903_v37  ;;  %v1966_v37 = vmax.f32 %v8947_v54, %v1886_v50  ;;  %v8955_v33 = vld [vmem:[#allocation78_spill] sm:$0xff]  ;;  %v2027_v54 = vmax.f32 %v8954_v6, %v1947_v10 }
 0x436   :  { %5595 = vmatmul.msk.f32.gmra.mxu0 %vm2192_vm4, %v7710_v40  ;;  %5599 = vmatmul.msk.f32.gmra.mxu1 %vm2192_vm4, %v7710_v40  ;;  %v1927_v39 = vmul.f32 0.01, %v8955_v33 }
 0x437   :  { %3245 = vmatpush.msra.mxu3 %v2003_v2  ;;  %3332 = vmatpush.msrb.mxu2 %v2006_v11  ;;  %v1907_v2 = vmul.f32 0.01, %v8956_v19 }
 0x438   :  { %v7933_v14 = vpop.f32.mrf.mxu3  ;;  %v7935_v17 = vpop.f32.mrf.mxu2 }
 0x439   :  { %8948 = vst [vmem:[#allocation6_spill] sm:$0xff] %v7935_v17  ;;  %v7938_v31 = vpop.f32.mrf.mxu0  ;;  %v7940_v52 = vpop.f32.mrf.mxu1  ;;  %3246 = vmatpush.msra.mxu3 %v1983_v63  ;;  %3333 = vmatpush.msrb.mxu2 %v1986_v42  ;;  %v8959_v63 = vld [vmem:[#allocation76_spill] sm:$0xff] }
 0x43a   :  { %5591 = vmatmul.msk.f32.gmra.mxu3 %vm2192_vm4, %v7710_v40  ;;  %v1887_v42 = vmul.f32 0.01, %v8959_v63 }
 0x43b   :  { %3247 = vmatpush.msra.mxu3 %v1963_v30  ;;  %3334 = vmatpush.msrb.mxu2 %v1966_v37  ;;  %v2007_v30 = vmax.f32 %v8955_v33, %v1927_v39 }
 0x43c   :  { %5603 = vmatmul.msk.f32.gmra.mxu2 %vm2192_vm4, %v7710_v40  ;;  %v1967_v6 = vmax.f32 %v8959_v63, %v1887_v42 }
 0x43e   :  { %5596 = vmatmul.msk.f32.gmra.mxu0 %vm2192_vm4, %v7743_v55  ;;  %5600 = vmatmul.msk.f32.gmra.mxu1 %vm2192_vm4, %v7743_v55 }
 0x440   :  { %v7952_v28 = vpop.f32.mrf.mxu3  ;;  %v7954_v16 = vpop.f32.mrf.mxu2 }
 0x441   :  { %8949 = vst [vmem:[#allocation10_spill] sm:$0xff] %v7954_v16  ;;  %v7956_v56 = vpop.f32.mrf.mxu0  ;;  %v7958_v0 = vpop.f32.mrf.mxu1 }
 0x442   :  { %5592 = vmatmul.msk.f32.gmra.mxu3 %vm2192_vm4, %v7743_v55 }
 0x444   :  { %5604 = vmatmul.msk.f32.gmra.mxu2 %vm2192_vm4, %v7743_v55 }
 0x446   :  { %5597 = vmatmul.msk.f32.gmra.mxu0 %vm2192_vm4, %v7768_v62  ;;  %5601 = vmatmul.msk.f32.gmra.mxu1 %vm2192_vm4, %v7768_v62 }
 0x449   :  { %v7968_v13 = vpop.f32.mrf.mxu0  ;;  %v7970_v57 = vpop.f32.mrf.mxu1 }
 0x44a   :  { %8950 = vst [vmem:[#allocation11_spill] sm:$0xff] %v7968_v13  ;;  %v7972_v26 = vpop.f32.mrf.mxu3  ;;  %5593 = vmatmul.msk.f32.gmra.mxu3 %vm2192_vm4, %v7768_v62  ;;  %v7976_v38 = vpop.f32.mrf.mxu2  ;;  %v1987_v13 = vmax.f32 %v8956_v19, %v1907_v2 }
 0x44b   :  { %8951 = vst [vmem:[#allocation27_spill] sm:$0xff] %v7970_v57 }
 0x44c   :  { %8952 = vst [vmem:[#allocation24_spill] sm:$0xff] %v7972_v26  ;;  %5605 = vmatmul.msk.f32.gmra.mxu2 %vm2192_vm4, %v7768_v62 }
 0x44d   :  { %8953 = vst [vmem:[#allocation21_spill] sm:$0xff] %v7976_v38 }
 0x44e   :  { %5610 = vmatmul.msk.f32.vlgmr.msrb.gmra.mxu0 %vm2192_vm4, %v7665_v35  ;;  %5614 = vmatmul.msk.f32.vlgmr.msrb.gmra.mxu1 %vm2192_vm4, %v7665_v35 }
 0x451   :  { %v7990_v11 = vpop.f32.mrf.mxu1 }
 0x452   :  { %v7988_v50 = vpop.f32.mrf.mxu0  ;;  %8958 = vst [vmem:[#allocation31_spill] sm:$0xff] %v7990_v11  ;;  %5606 = vmatmul.msk.f32.vlgmr.msrb.gmra.mxu3 %vm2192_vm4, %v7665_v35 }
 0x453   :  { %8957 = vst [vmem:[#allocation18_spill] sm:$0xff] %v7988_v50  ;;  %3360 = vmatpush.msrb.mxu3 %v2027_v54 }
 0x454   :  { %v7996_v37 = vpop.f32.mrf.mxu3  ;;  %5618 = vmatmul.msk.f32.vlgmr.msra.gmra.mxu2 %vm2192_vm4, %v7665_v35 }
 0x455   :  { %8960 = vst [vmem:[#allocation32_spill] sm:$0xff] %v7996_v37  ;;  %v7998_v57 = vpop.f32.mrf.mxu2  ;;  %3361 = vmatpush.msrb.mxu3 %v2007_v30 }
 0x456   :  { %8961 = vst [vmem:[#allocation28_spill] sm:$0xff] %v7998_v57  ;;  %5611 = vmatmul.msk.f32.gmra.mxu0 %vm2192_vm4, %v7710_v40  ;;  %5615 = vmatmul.msk.f32.gmra.mxu1 %vm2192_vm4, %v7710_v40 }
 0x457   :  { %3362 = vmatpush.msrb.mxu3 %v1987_v13 }
 0x459   :  { %3363 = vmatpush.msrb.mxu3 %v1967_v6  ;;  %v8010_v33 = vpop.f32.mrf.mxu1 }
 0x45a   :  { %v8008_v10 = vpop.f32.mrf.mxu0  ;;  %8963 = vst [vmem:[#allocation25_spill] sm:$0xff] %v8010_v33  ;;  %5607 = vmatmul.msk.f32.gmra.mxu3 %vm2192_vm4, %v7710_v40 }
 0x45b   :  { %8962 = vst [vmem:[#allocation29_spill] sm:$0xff] %v8008_v10 }
 0x45c   :  { %v8014_v39 = vpop.f32.mrf.mxu3  ;;  %5619 = vmatmul.msk.f32.gmra.mxu2 %vm2192_vm4, %v7710_v40 }
 0x45d   :  { %8964 = vst [vmem:[#allocation26_spill] sm:$0xff] %v8014_v39 }
 0x45e   :  { %5612 = vmatmul.msk.f32.gmra.mxu0 %vm2192_vm4, %v7743_v55  ;;  %v8020_v19 = vpop.f32.mrf.mxu2  ;;  %5616 = vmatmul.msk.f32.gmra.mxu1 %vm2192_vm4, %v7743_v55 }
 0x45f   :  { %8965 = vst [vmem:[#allocation63_spill] sm:$0xff] %v8020_v19 }
 0x461   :  { %v8026_v2 = vpop.f32.mrf.mxu1 }
 0x462   :  { %v8024_v13 = vpop.f32.mrf.mxu0  ;;  %8967 = vst [vmem:[#allocation23_spill] sm:$0xff] %v8026_v2  ;;  %5608 = vmatmul.msk.f32.gmra.mxu3 %vm2192_vm4, %v7743_v55 }
 0x463   :  { %8966 = vst [vmem:[#allocation22_spill] sm:$0xff] %v8024_v13 }
 0x464   :  { %v8030_v54 = vpop.f32.mrf.mxu3  ;;  %5620 = vmatmul.msk.f32.gmra.mxu2 %vm2192_vm4, %v7743_v55 }
 0x465   :  { %8968 = vst [vmem:[#allocation39_spill] sm:$0xff] %v8030_v54 }
 0x466   :  { %5613 = vmatmul.msk.f32.gmra.mxu0 %vm2192_vm4, %v7768_v62  ;;  %v8036_v63 = vpop.f32.mrf.mxu2  ;;  %5617 = vmatmul.msk.f32.gmra.mxu1 %vm2192_vm4, %v7768_v62 }
 0x467   :  { %8969 = vst [vmem:[#allocation36_spill] sm:$0xff] %v8036_v63 }
 0x469   :  { %v2843_v30 = vpop.f32.mrf.mxu1 }
 0x46a   :  { %v2814_v42 = vpop.f32.mrf.mxu0  ;;  %5609 = vmatmul.msk.f32.gmra.mxu3 %vm2192_vm4, %v7768_v62 }
 0x46b   :  { %v2815_v17 = vadd.f32 %v2814_v42, %v7533_v43 }
 0x46c   :  { %v8042_v6 = vpop.f32.mrf.mxu3  ;;  %5621 = vmatmul.msk.f32.gmra.mxu2 %vm2192_vm4, %v7768_v62 }
 0x46d   :  { %8970 = vst [vmem:[#allocation62_spill] sm:$0xff] %v8042_v6 }
 0x46e   :  { %5626 = vmatmul.msk.f32.vlgmr.msra.gmra.mxu0 %vm2192_vm4, %v7665_v35  ;;  %v8048_v57 = vpop.f32.mrf.mxu2  ;;  %5630 = vmatmul.msk.f32.vlgmr.msra.gmra.mxu1 %vm2192_vm4, %v7665_v35 }
 0x46f   :  { %8971 = vst [vmem:[#allocation33_spill] sm:$0xff] %v8048_v57 }
 0x472   :  { %v2817_v19 = vpop.f32.mrf.mxu0  ;;  %v2846_v37 = vpop.f32.mrf.mxu1  ;;  %5622 = vmatmul.msk.f32.vlgmr.msra.gmra.mxu3 %vm2192_vm4, %v7665_v35 }
 0x473   :  { %v2847_v10 = vadd.f32 %v2846_v37, %v7582_v51 }
 0x474   :  { %v8054_v63 = vpop.f32.mrf.mxu3  ;;  %5634 = vmatmul.msk.f32.vlgmr.msrb.gmra.mxu2 %vm2192_vm4, %v7665_v35 }
 0x475   :  { %8972 = vst [vmem:[#allocation61_spill] sm:$0xff] %v8054_v63  ;;  %v3400_v43 = vmul.f32 0.01, %v2847_v10 }
 0x476   :  { %5627 = vmatmul.msk.f32.gmra.mxu0 %vm2192_vm4, %v7710_v40  ;;  %v2872_v6 = vpop.f32.mrf.mxu2  ;;  %5631 = vmatmul.msk.f32.gmra.mxu1 %vm2192_vm4, %v7710_v40 }
 0x47a   :  { %v2820_v57 = vpop.f32.mrf.mxu0  ;;  %5623 = vmatmul.msk.f32.gmra.mxu3 %vm2192_vm4, %v7710_v40  ;;  %v2849_v39 = vpop.f32.mrf.mxu1 }
 0x47b   :  { %v2821_v2 = vadd.f32 %v2820_v57, %v7615_v45  ;;  %v2850_v11 = vadd.f32 %v2849_v39, %v7619_v24  ;;  %v2844_v24 = vadd.f32 %v2843_v30, %v7536_v21 }
 0x47c   :  { %v8064_v54 = vpop.f32.mrf.mxu3  ;;  %5635 = vmatmul.msk.f32.gmra.mxu2 %vm2192_vm4, %v7710_v40 }
 0x47d   :  { %8973 = vst [vmem:[#allocation30_spill] sm:$0xff] %v8064_v54  ;;  %v2818_v54 = vadd.f32 %v2817_v19, %v7577_v20  ;;  %v3419_v16 = vmul.f32 0.01, %v2821_v2  ;;  %v3420_v57 = vmul.f32 0.01, %v2850_v11 }
 0x47e   :  { %5628 = vmatmul.msk.f32.gmra.mxu0 %vm2192_vm4, %v7743_v55  ;;  %v2875_v63 = vpop.f32.mrf.mxu2  ;;  %5632 = vmatmul.msk.f32.gmra.mxu1 %vm2192_vm4, %v7743_v55  ;;  %v3380_v19 = vmul.f32 0.01, %v2844_v24 }
 0x47f   :  { %v3399_v51 = vmul.f32 0.01, %v2818_v54  ;;  %v3499_v39 = vmax.f32 %v2821_v2, %v3419_v16  ;;  %v2876_v2 = vadd.f32 %v2875_v63, %v7611_v1 }
 0x481   :  { %v3479_v42 = vmax.f32 %v2818_v54, %v3399_v51 }
 0x482   :  { %v2823_v13 = vpop.f32.mrf.mxu0  ;;  %5624 = vmatmul.msk.f32.gmra.mxu3 %vm2192_vm4, %v7743_v55  ;;  %v2852_v33 = vpop.f32.mrf.mxu1 }
 0x483   :  { %v2824_v50 = vadd.f32 %v2823_v13, %v7638_v49  ;;  %v2853_v38 = vadd.f32 %v2852_v33, %v7640_v22  ;;  %v3379_v33 = vmul.f32 0.01, %v2815_v17  ;;  %v3500_v13 = vmax.f32 %v2850_v11, %v3420_v57 }
 0x484   :  { %5636 = vmatmul.msk.f32.gmra.mxu2 %vm2192_vm4, %v7743_v55  ;;  %v8083_v45 = vpop.f32.mrf.mxu3 }
 0x485   :  { %v3439_v26 = vmul.f32 0.01, %v2824_v50  ;;  %8974 = vst [vmem:[#allocation60_spill] sm:$0xff] %v8083_v45  ;;  %v3440_v20 = vmul.f32 0.01, %v2853_v38  ;;  %v3480_v45 = vmax.f32 %v2847_v10, %v3400_v43  ;;  %v2873_v10 = vadd.f32 %v2872_v6, %v7566_v27  ;;  %v8111_v43 = vld [vmem:[%s8699_s7] sm:$0xff] }
 0x486   :  { %5629 = vmatmul.msk.f32.gmra.mxu0 %vm2192_vm4, %v7768_v62  ;;  %v2878_v49 = vpop.f32.mrf.mxu2  ;;  %5633 = vmatmul.msk.f32.gmra.mxu1 %vm2192_vm4, %v7768_v62 }
 0x487   :  { %v3519_v37 = vmax.f32 %v2824_v50, %v3439_v26  ;;  %v3520_v22 = vmax.f32 %v2853_v38, %v3440_v20  ;;  %v3459_v26 = vmax.f32 %v2815_v17, %v3379_v33  ;;  %v2879_v50 = vadd.f32 %v2878_v49, %v7635_v46 }
 0x488   :  { %v3460_v38 = vmax.f32 %v2844_v24, %v3380_v19  ;;  %v3401_v46 = vmul.f32 0.01, %v2876_v2  ;;  %v3381_v24 = vmul.f32 0.01, %v2873_v10 }
 0x489   :  { %3557 = vmatpush.msrb.mxu0 %v3519_v37  ;;  %3580 = vmatpush.msrb.mxu1 %v3520_v22  ;;  %v3421_v17 = vmul.f32 0.01, %v2879_v50 }
 0x48a   :  { %v2930_v21 = vpop.f32.mrf.mxu0  ;;  %5625 = vmatmul.msk.f32.gmra.mxu3 %vm2192_vm4, %v7768_v62  ;;  %v2959_v30 = vpop.f32.mrf.mxu1  ;;  %v3461_v63 = vmax.f32 %v2873_v10, %v3381_v24 }
 0x48b   :  { %3558 = vmatpush.msrb.mxu0 %v3499_v39  ;;  %3581 = vmatpush.msrb.mxu1 %v3500_v13 }
 0x48c   :  { %5637 = vmatmul.msk.f32.gmra.mxu2 %vm2192_vm4, %v7768_v62  ;;  %v8095_v16 = vpop.f32.mrf.mxu3 }
 0x48d   :  { %3559 = vmatpush.msrb.mxu0 %v3479_v42  ;;  %3582 = vmatpush.msrb.mxu1 %v3480_v45  ;;  %v3501_v45 = vmax.f32 %v2879_v50, %v3421_v17 }
 0x48e   :  { %v2881_v11 = vpop.f32.mrf.mxu2 }
 0x48f   :  { %v2882_v54 = vadd.f32 %v2881_v11, %v7650_v44  ;;  %3560 = vmatpush.msrb.mxu0 %v3459_v26  ;;  %3583 = vmatpush.msrb.mxu1 %v3460_v38  ;;  %v3481_v44 = vmax.f32 %v2876_v2, %v3401_v46  ;;  %v2931_v38 = vadd.f32 %v2930_v21, %v7652_v12 }
 0x490   :  { %5642 = vmatmul.msk.f32.vlgmr.msrb.gmra.mxu0 %vm2192_vm4, %v8111_v43  ;;  %5644 = vmatmul.msk.f32.vlgmr.msrb.gmra.mxu1 %vm2192_vm4, %v8111_v43  ;;  %v2960_v11 = vadd.f32 %v2959_v30, %v7655_v25 }
 0x491   :  { %v3441_v57 = vmul.f32 0.01, %v2882_v54 }
 0x492   :  { %5638 = vmatmul.msk.f32.vlgmr.msrb.gmra.mxu3 %vm2192_vm4, %v7665_v35  ;;  %v2933_v49 = vpop.f32.mrf.mxu0  ;;  %v3384_v21 = vmul.f32 0.01, %v2960_v11 }
 0x493   :  { %v3521_v20 = vmax.f32 %v2882_v54, %v3441_v57  ;;  %v2962_v51 = vpop.f32.mrf.mxu1  ;;  %v2934_v13 = vadd.f32 %v2933_v49, %v7696_v48 }
 0x494   :  { %v8102_v37 = vpop.f32.mrf.mxu3  ;;  %v2963_v42 = vadd.f32 %v2962_v51, %v7698_v61 }
 0x495   :  { %3603 = vmatpush.msra.mxu2 %v3521_v20  ;;  %v3403_v12 = vmul.f32 0.01, %v2934_v13 }
 0x496   :  { %v8104_v1 = vpop.f32.mrf.mxu2  ;;  %v3404_v61 = vmul.f32 0.01, %v2963_v42 }
 0x497   :  { %3604 = vmatpush.msra.mxu2 %v3501_v45  ;;  %v3483_v20 = vmax.f32 %v2934_v13, %v3403_v12  ;;  %v3464_v45 = vmax.f32 %v2960_v11, %v3384_v21 }
 0x498   :  { %v3484_v49 = vmax.f32 %v2963_v42, %v3404_v61 }
 0x499   :  { %3605 = vmatpush.msra.mxu2 %v3481_v44 }
 0x49a   :  { %5639 = vmatmul.msk.f32.gmra.mxu3 %vm2192_vm4, %v7710_v40  ;;  %v2936_v27 = vpop.f32.mrf.mxu0 }
 0x49b   :  { %v2965_v35 = vpop.f32.mrf.mxu1  ;;  %3606 = vmatpush.msra.mxu2 %v3461_v63  ;;  %v2937_v40 = vadd.f32 %v2936_v27, %v7732_v7 }
 0x49c   :  { %v2904_v6 = vpop.f32.mrf.mxu3  ;;  %5646 = vmatmul.msk.f32.vlgmr.msra.gmra.mxu2 %vm2192_vm4, %v8111_v43  ;;  %v2966_v33 = vadd.f32 %v2965_v35, %v7734_v32 }
 0x49d   :  { %v3423_v7 = vmul.f32 0.01, %v2937_v40  ;;  %v2905_v63 = vadd.f32 %v2904_v6, %v7726_v3  ;;  %v2989_v3 = vadd.f32 %v8104_v1, %v7685_v29 }
 0x49e   :  { %v3424_v2 = vmul.f32 0.01, %v2966_v33 }
 0x49f   :  { %v2991_v22 = vpop.f32.mrf.mxu2  ;;  %v3503_v30 = vmax.f32 %v2937_v40, %v3423_v7  ;;  %v3385_v29 = vmul.f32 0.01, %v2989_v3 }
 0x4a0   :  { %v3504_v17 = vmax.f32 %v2966_v33, %v3424_v2  ;;  %v2992_v33 = vadd.f32 %v2991_v22, %v7728_v4 }
 0x4a1   :  { %v3465_v2 = vmax.f32 %v2989_v3, %v3385_v29  ;;  %v8978_v3 = vld [vmem:[#allocation15_spill] sm:$0xff] }
 0x4a2   :  { %5640 = vmatmul.msk.f32.gmra.mxu3 %vm2192_vm4, %v7743_v55  ;;  %v2939_v39 = vpop.f32.mrf.mxu0  ;;  %v8132_v55 = vld [vmem:[%s8699_s7 + $0x8] sm:$0xff]  ;;  %v3405_v22 = vmul.f32 0.01, %v2992_v33 }
 0x4a3   :  { %v2968_v19 = vpop.f32.mrf.mxu1  ;;  %v2940_v26 = vadd.f32 %v2939_v39, %v7759_v53  ;;  %5643 = vmatmul.msk.f32.gmra.mxu0 %vm2192_vm4, %v8132_v55  ;;  %5645 = vmatmul.msk.f32.gmra.mxu1 %vm2192_vm4, %v8132_v55 }
 0x4a4   :  { %v2969_v50 = vadd.f32 %v2968_v19, %v7761_v36  ;;  %v2907_v32 = vpop.f32.mrf.mxu3  ;;  %5647 = vmatmul.msk.f32.gmra.mxu2 %vm2192_vm4, %v8132_v55  ;;  %v3383_v36 = vmul.f32 0.01, %v2931_v38  ;;  %v3485_v7 = vmax.f32 %v2992_v33, %v3405_v22  ;;  %v8980_v22 = vld [vmem:[#allocation12_spill] sm:$0xff] }
 0x4a5   :  { %v3443_v54 = vmul.f32 0.01, %v2940_v26  ;;  %v2908_v51 = vadd.f32 %v2907_v32, %v7755_v8 }
 0x4a6   :  { %v3444_v10 = vmul.f32 0.01, %v2969_v50  ;;  %v3463_v24 = vmax.f32 %v2931_v38, %v3383_v36 }
 0x4a7   :  { %v2994_v48 = vpop.f32.mrf.mxu2  ;;  %v3523_v25 = vmax.f32 %v2940_v26, %v3443_v54  ;;  %v3422_v8 = vmul.f32 0.01, %v2908_v51 }
 0x4a8   :  { %v3524_v53 = vmax.f32 %v2969_v50, %v3444_v10  ;;  %v2995_v27 = vadd.f32 %v2994_v48, %v7757_v41  ;;  %v3402_v41 = vmul.f32 0.01, %v2905_v63 }
 0x4a9   :  { %3649 = vmatpush.msra.mxu0 %v3523_v25  ;;  %v3502_v13 = vmax.f32 %v2908_v51, %v3422_v8 }
 0x4aa   :  { %3672 = vmatpush.msra.mxu1 %v3524_v53  ;;  %v8140_v57 = vpop.f32.mrf.mxu0  ;;  %5641 = vmatmul.msk.f32.gmra.mxu3 %vm2192_vm4, %v7768_v62  ;;  %v2902_v62 = vadd.f32 %v8102_v37, %v7683_v23  ;;  %v3425_v23 = vmul.f32 0.01, %v2995_v27  ;;  %v3482_v1 = vmax.f32 %v2905_v63, %v3402_v41 }
 0x4ab   :  { %v8142_v46 = vpop.f32.mrf.mxu1  ;;  %3650 = vmatpush.msra.mxu0 %v3503_v30 }
 0x4ac   :  { %3673 = vmatpush.msra.mxu1 %v3504_v17  ;;  %v2910_v44 = vpop.f32.mrf.mxu3  ;;  %v3382_v6 = vmul.f32 0.01, %v2902_v62  ;;  %v3505_v50 = vmax.f32 %v2995_v27, %v3425_v23  ;;  %v8975_v17 = vld [vmem:[#allocation20_spill] sm:$0xff] }
 0x4ad   :  { %3651 = vmatpush.msra.mxu0 %v3483_v20  ;;  %v2911_v35 = vadd.f32 %v2910_v44, %v7776_v58 }
 0x4ae   :  { %3674 = vmatpush.msra.mxu1 %v3484_v49  ;;  %v3462_v11 = vmax.f32 %v2902_v62, %v3382_v6 }
 0x4af   :  { %v2997_v40 = vpop.f32.mrf.mxu2  ;;  %v3442_v39 = vmul.f32 0.01, %v2911_v35  ;;  %3652 = vmatpush.msra.mxu0 %v3463_v24 }
 0x4b0   :  { %v2998_v19 = vadd.f32 %v2997_v40, %v7778_v60  ;;  %3675 = vmatpush.msra.mxu1 %v3464_v45  ;;  %5650 = vmatmul.msk.f32.vlgmr.msra.gmra.mxu0 %vm2192_vm4, %v8111_v43  ;;  %v8977_v45 = vld [vmem:[#allocation8_spill] sm:$0xff] }
 0x4b1   :  { %5652 = vmatmul.msk.f32.vlgmr.msra.gmra.mxu1 %vm2192_vm4, %v8111_v43  ;;  %v3522_v58 = vmax.f32 %v2911_v35, %v3442_v39  ;;  %v3076_v44 = vadd.f32 %v8142_v46, %v8977_v45 }
 0x4b2   :  { %v3445_v37 = vmul.f32 0.01, %v2998_v19 }
 0x4b3   :  { %v3049_v4 = vpop.f32.mrf.mxu0  ;;  %v3078_v42 = vpop.f32.mrf.mxu1  ;;  %3626 = vmatpush.msra.mxu3 %v3522_v58  ;;  %v3388_v8 = vmul.f32 0.01, %v3076_v44 }
 0x4b4   :  { %v3525_v60 = vmax.f32 %v2998_v19, %v3445_v37  ;;  %v8160_v26 = vpop.f32.mrf.mxu3  ;;  %v3050_v53 = vadd.f32 %v3049_v4, %v7811_v15  ;;  %v3079_v30 = vadd.f32 %v3078_v42, %v7813_v9  ;;  %v8979_v4 = vld [vmem:[#allocation2_spill] sm:$0xff]  ;;  %v8981_v42 = vld [vmem:[#allocation19_spill] sm:$0xff] }
 0x4b5   :  { %3627 = vmatpush.msra.mxu3 %v3502_v13 }
 0x4b6   :  { %3695 = vmatpush.msrb.mxu2 %v3525_v60  ;;  %v3408_v9 = vmul.f32 0.01, %v3079_v30  ;;  %v3468_v60 = vmax.f32 %v3076_v44, %v3388_v8 }
 0x4b7   :  { %v8162_v38 = vpop.f32.mrf.mxu2  ;;  %3628 = vmatpush.msra.mxu3 %v3482_v1  ;;  %v8982_v1 = vld [vmem:[#allocation4_spill] sm:$0xff] }
 0x4b8   :  { %3696 = vmatpush.msrb.mxu2 %v3505_v50  ;;  %5651 = vmatmul.msk.f32.gmra.mxu0 %vm2192_vm4, %v8132_v55  ;;  %v3488_v46 = vmax.f32 %v3079_v30, %v3408_v9  ;;  %v3018_v50 = vadd.f32 %v8160_v26, %v8982_v1 }
 0x4b9   :  { %5653 = vmatmul.msk.f32.gmra.mxu1 %vm2192_vm4, %v8132_v55  ;;  %3629 = vmatpush.msra.mxu3 %v3462_v11 }
 0x4ba   :  { %3697 = vmatpush.msrb.mxu2 %v3485_v7  ;;  %5648 = vmatmul.msk.f32.vlgmr.msra.gmra.mxu3 %vm2192_vm4, %v8111_v43 }
 0x4bb   :  { %v3052_v32 = vpop.f32.mrf.mxu0  ;;  %v3081_v54 = vpop.f32.mrf.mxu1 }
 0x4bc   :  { %3698 = vmatpush.msrb.mxu2 %v3465_v2  ;;  %v3053_v12 = vadd.f32 %v3052_v32, %v7842_v18  ;;  %v3082_v61 = vadd.f32 %v3081_v54, %v7844_v59  ;;  %v8976_v18 = vld [vmem:[#allocation7_spill] sm:$0xff] }
 0x4bd   :  { %v3020_v10 = vpop.f32.mrf.mxu3  ;;  %5654 = vmatmul.msk.f32.vlgmr.msrb.gmra.mxu2 %vm2192_vm4, %v8111_v43  ;;  %v3047_v59 = vadd.f32 %v8140_v57, %v8976_v18  ;;  %v8983_v32 = vld [vmem:[#allocation3_spill] sm:$0xff] }
 0x4be   :  { %v3427_v51 = vmul.f32 0.01, %v3053_v12  ;;  %v3428_v15 = vmul.f32 0.01, %v3082_v61  ;;  %v3021_v6 = vadd.f32 %v3020_v10, %v8979_v4 }
 0x4bf   :  { %v3107_v48 = vpop.f32.mrf.mxu2  ;;  %v3387_v40 = vmul.f32 0.01, %v3047_v59 }
 0x4c0   :  { %v3507_v33 = vmax.f32 %v3053_v12, %v3427_v51  ;;  %v3508_v39 = vmax.f32 %v3082_v61, %v3428_v15  ;;  %v3108_v54 = vadd.f32 %v3107_v48, %v8983_v32  ;;  %v8984_v12 = vld [vmem:[#allocation16_spill] sm:$0xff]  ;;  %v3406_v10 = vmul.f32 0.01, %v3021_v6 }
 0x4c1   :  { %v3467_v37 = vmax.f32 %v3047_v59, %v3387_v40 }
 0x4c2   :  { %5649 = vmatmul.msk.f32.gmra.mxu3 %vm2192_vm4, %v8132_v55  ;;  %v3486_v51 = vmax.f32 %v3021_v6, %v3406_v10 }
 0x4c3   :  { %v3055_v25 = vpop.f32.mrf.mxu0  ;;  %v3084_v21 = vpop.f32.mrf.mxu1 }
 0x4c4   :  { %v3056_v36 = vadd.f32 %v3055_v25, %v7860_v47  ;;  %v3085_v20 = vadd.f32 %v3084_v21, %v8975_v17  ;;  %v3407_v47 = vmul.f32 0.01, %v3050_v53  ;;  %v3386_v17 = vmul.f32 0.01, %v3018_v50 }
 0x4c5   :  { %v3023_v49 = vpop.f32.mrf.mxu3  ;;  %5655 = vmatmul.msk.f32.gmra.mxu2 %vm2192_vm4, %v8132_v55 }
 0x4c6   :  { %v3447_v24 = vmul.f32 0.01, %v3056_v36  ;;  %v3448_v63 = vmul.f32 0.01, %v3085_v20  ;;  %v3487_v57 = vmax.f32 %v3050_v53, %v3407_v47  ;;  %v3024_v41 = vadd.f32 %v3023_v49, %v8978_v3  ;;  %v8985_v53 = vld [vmem:[#allocation5_spill] sm:$0xff] }
 0x4c7   :  { %v3110_v35 = vpop.f32.mrf.mxu2  ;;  %v3105_v26 = vadd.f32 %v8162_v38, %v8985_v53  ;;  %v3409_v49 = vmul.f32 0.01, %v3108_v54  ;;  %v3466_v44 = vmax.f32 %v3018_v50, %v3386_v17  ;;  %v8989_v53 = vld [vmem:[#allocation10_spill] sm:$0xff] }
 0x4c8   :  { %v3527_v27 = vmax.f32 %v3056_v36, %v3447_v24  ;;  %v3528_v62 = vmax.f32 %v3085_v20, %v3448_v63  ;;  %v3111_v29 = vadd.f32 %v3110_v35, %v8981_v42  ;;  %v3426_v11 = vmul.f32 0.01, %v3024_v41 }
 0x4c9   :  { %v3389_v24 = vmul.f32 0.01, %v3105_v26  ;;  %v3489_v38 = vmax.f32 %v3108_v54, %v3409_v49  ;;  %v8992_v49 = vld [vmem:[#allocation21_spill] sm:$0xff] }
 0x4ca   :  { %3741 = vmatpush.msrb.mxu0 %v3527_v27  ;;  %3764 = vmatpush.msrb.mxu1 %v3528_v62  ;;  %v3429_v36 = vmul.f32 0.01, %v3111_v29  ;;  %v3506_v20 = vmax.f32 %v3024_v41, %v3426_v11 }
 0x4cb   :  { %v8186_v19 = vpop.f32.mrf.mxu0  ;;  %v8189_v23 = vpop.f32.mrf.mxu1  ;;  %v3469_v63 = vmax.f32 %v3105_v26, %v3389_v24  ;;  %v8993_v24 = vld [vmem:[#allocation14_spill] sm:$0xff] }
 0x4cc   :  { %3742 = vmatpush.msrb.mxu0 %v3507_v33  ;;  %3765 = vmatpush.msrb.mxu1 %v3508_v39  ;;  %v3509_v45 = vmax.f32 %v3111_v29, %v3429_v36  ;;  %v8990_v36 = vld [vmem:[#allocation13_spill] sm:$0xff] }
 0x4cd   :  { %v3026_v58 = vpop.f32.mrf.mxu3 }
 0x4ce   :  { %3743 = vmatpush.msrb.mxu0 %v3487_v57  ;;  %v3027_v13 = vadd.f32 %v3026_v58, %v8980_v22  ;;  %3766 = vmatpush.msrb.mxu1 %v3488_v46  ;;  %v8986_v58 = vld [vmem:[#allocation17_spill] sm:$0xff] }
 0x4cf   :  { %v3113_v2 = vpop.f32.mrf.mxu2 }
 0x4d0   :  { %v3446_v7 = vmul.f32 0.01, %v3027_v13  ;;  %3744 = vmatpush.msrb.mxu0 %v3467_v37  ;;  %v3114_v61 = vadd.f32 %v3113_v2, %v8984_v12  ;;  %3767 = vmatpush.msrb.mxu1 %v3468_v60  ;;  %v3163_v37 = vadd.f32 %v8186_v19, %v8986_v58 }
 0x4d1   :  { %5658 = vmatmul.msk.f32.vlgmr.msrb.gmra.mxu0 %vm2192_vm4, %v8111_v43  ;;  %5660 = vmatmul.msk.f32.vlgmr.msrb.gmra.mxu1 %vm2192_vm4, %v8111_v43 }
 0x4d2   :  { %v3526_v25 = vmax.f32 %v3027_v13, %v3446_v7  ;;  %v3449_v21 = vmul.f32 0.01, %v3114_v61 }
 0x4d3   :  { %v3165_v30 = vpop.f32.mrf.mxu0  ;;  %v3194_v48 = vpop.f32.mrf.mxu1 }
 0x4d4   :  { %3718 = vmatpush.msrb.mxu3 %v3526_v25  ;;  %v3529_v18 = vmax.f32 %v3114_v61, %v3449_v21  ;;  %v3166_v8 = vadd.f32 %v3165_v30, %v7906_v5  ;;  %v3195_v3 = vadd.f32 %v3194_v48, %v7908_v34  ;;  %v8988_v61 = vld [vmem:[#allocation24_spill] sm:$0xff] }
 0x4d5   :  { %v8204_v59 = vpop.f32.mrf.mxu3 }
 0x4d6   :  { %3719 = vmatpush.msrb.mxu3 %v3506_v20  ;;  %3787 = vmatpush.msra.mxu2 %v3529_v18  ;;  %v3412_v34 = vmul.f32 0.01, %v3195_v3  ;;  %v3134_v21 = vadd.f32 %v8204_v59, %v8990_v36  ;;  %v8991_v20 = vld [vmem:[#allocation6_spill] sm:$0xff] }
 0x4d7   :  { %v8206_v15 = vpop.f32.mrf.mxu2 }
 0x4d8   :  { %3720 = vmatpush.msrb.mxu3 %v3486_v51  ;;  %3788 = vmatpush.msra.mxu2 %v3509_v45  ;;  %v3221_v59 = vadd.f32 %v8206_v15, %v8993_v24 }
 0x4d9   :  { %5659 = vmatmul.msk.f32.gmra.mxu0 %vm2192_vm4, %v8132_v55  ;;  %5661 = vmatmul.msk.f32.gmra.mxu1 %vm2192_vm4, %v8132_v55 }
 0x4da   :  { %3721 = vmatpush.msrb.mxu3 %v3466_v44  ;;  %3789 = vmatpush.msra.mxu2 %v3489_v38 }
 0x4db   :  { %v3168_v47 = vpop.f32.mrf.mxu0  ;;  %5656 = vmatmul.msk.f32.vlgmr.msrb.gmra.mxu3 %vm2192_vm4, %v8111_v43  ;;  %v3197_v27 = vpop.f32.mrf.mxu1 }
 0x4dc   :  { %3790 = vmatpush.msra.mxu2 %v3469_v63  ;;  %v3169_v62 = vadd.f32 %v3168_v47, %v7938_v31  ;;  %v3198_v40 = vadd.f32 %v3197_v27, %v7940_v52  ;;  %v8987_v52 = vld [vmem:[#allocation9_spill] sm:$0xff]  ;;  %v3390_v63 = vmul.f32 0.01, %v3134_v21 }
 0x4dd   :  { %v3136_v35 = vpop.f32.mrf.mxu3  ;;  %5662 = vmatmul.msk.f32.vlgmr.msra.gmra.mxu2 %vm2192_vm4, %v8111_v43  ;;  %v3192_v6 = vadd.f32 %v8189_v23, %v8987_v52  ;;  %v3492_v23 = vmax.f32 %v3195_v3, %v3412_v34  ;;  %v8995_v52 = vld [vmem:[#allocation25_spill] sm:$0xff] }
 0x4de   :  { %v3431_v31 = vmul.f32 0.01, %v3169_v62  ;;  %v3432_v5 = vmul.f32 0.01, %v3198_v40  ;;  %v3137_v12 = vadd.f32 %v3136_v35, %v7933_v14 }
 0x4df   :  { %v3223_v9 = vpop.f32.mrf.mxu2  ;;  %v3392_v1 = vmul.f32 0.01, %v3192_v6 }
 0x4e0   :  { %v3511_v29 = vmax.f32 %v3169_v62, %v3431_v31  ;;  %v3512_v19 = vmax.f32 %v3198_v40, %v3432_v5  ;;  %v3224_v48 = vadd.f32 %v3223_v9, %v8991_v20  ;;  %v3410_v14 = vmul.f32 0.01, %v3137_v12  ;;  %v8994_v31 = vld [vmem:[#allocation29_spill] sm:$0xff] }
 0x4e1   :  { %v3472_v25 = vmax.f32 %v3192_v6, %v3392_v1 }
 0x4e2   :  { %v3413_v35 = vmul.f32 0.01, %v3224_v48  ;;  %v3490_v40 = vmax.f32 %v3137_v12, %v3410_v14 }
 0x4e3   :  { %v3171_v33 = vpop.f32.mrf.mxu0  ;;  %5657 = vmatmul.msk.f32.gmra.mxu3 %vm2192_vm4, %v8132_v55  ;;  %v3200_v57 = vpop.f32.mrf.mxu1 }
 0x4e4   :  { %v3172_v39 = vadd.f32 %v3171_v33, %v7956_v56  ;;  %v3201_v41 = vadd.f32 %v3200_v57, %v7958_v0  ;;  %v3411_v56 = vmul.f32 0.01, %v3166_v8  ;;  %v3391_v0 = vmul.f32 0.01, %v3163_v37 }
 0x4e5   :  { %v3139_v46 = vpop.f32.mrf.mxu3  ;;  %5663 = vmatmul.msk.f32.gmra.mxu2 %vm2192_vm4, %v8132_v55  ;;  %v3393_v33 = vmul.f32 0.01, %v3221_v59  ;;  %v3493_v15 = vmax.f32 %v3224_v48, %v3413_v35  ;;  %v9002_v48 = vld [vmem:[#allocation39_spill] sm:$0xff] }
 0x4e6   :  { %v3451_v4 = vmul.f32 0.01, %v3172_v39  ;;  %v3452_v22 = vmul.f32 0.01, %v3201_v41  ;;  %v3491_v11 = vmax.f32 %v3166_v8, %v3411_v56  ;;  %v3140_v7 = vadd.f32 %v3139_v46, %v7952_v28 }
 0x4e7   :  { %v3226_v60 = vpop.f32.mrf.mxu2  ;;  %v3471_v54 = vmax.f32 %v3163_v37, %v3391_v0  ;;  %v3473_v3 = vmax.f32 %v3221_v59, %v3393_v33  ;;  %v9004_v59 = vld [vmem:[#allocation62_spill] sm:$0xff]  ;;  %v9007_v33 = vld [vmem:[#allocation63_spill] sm:$0xff] }
 0x4e8   :  { %v3531_v13 = vmax.f32 %v3172_v39, %v3451_v4  ;;  %v3532_v42 = vmax.f32 %v3201_v41, %v3452_v22  ;;  %v3227_v26 = vadd.f32 %v3226_v60, %v8989_v53  ;;  %v3430_v28 = vmul.f32 0.01, %v3140_v7  ;;  %v8996_v22 = vld [vmem:[#allocation18_spill] sm:$0xff] }
 0x4e9   :  { %v3470_v39 = vmax.f32 %v3134_v21, %v3390_v63 }
 0x4ea   :  { %3833 = vmatpush.msra.mxu0 %v3531_v13  ;;  %3856 = vmatpush.msra.mxu1 %v3532_v42  ;;  %v3433_v45 = vmul.f32 0.01, %v3227_v26  ;;  %v3510_v47 = vmax.f32 %v3140_v7, %v3430_v28  ;;  %v8997_v13 = vld [vmem:[#allocation22_spill] sm:$0xff]  ;;  %v8998_v42 = vld [vmem:[#allocation31_spill] sm:$0xff] }
 0x4eb   :  { %v8230_v50 = vpop.f32.mrf.mxu0  ;;  %v8233_v2 = vpop.f32.mrf.mxu1 }
 0x4ec   :  { %3834 = vmatpush.msra.mxu0 %v3511_v29  ;;  %3857 = vmatpush.msra.mxu1 %v3512_v19  ;;  %v3513_v8 = vmax.f32 %v3227_v26, %v3433_v45  ;;  %v8999_v29 = vld [vmem:[#allocation23_spill] sm:$0xff] }
 0x4ed   :  { %v3142_v32 = vpop.f32.mrf.mxu3 }
 0x4ee   :  { %3835 = vmatpush.msra.mxu0 %v3491_v11  ;;  %v3143_v10 = vadd.f32 %v3142_v32, %v8988_v61  ;;  %3858 = vmatpush.msra.mxu1 %v3492_v23  ;;  %v9000_v11 = vld [vmem:[#allocation11_spill] sm:$0xff] }
 0x4ef   :  { %v3229_v17 = vpop.f32.mrf.mxu2  ;;  %v3279_v7 = vadd.f32 %v8230_v50, %v9000_v11 }
 0x4f0   :  { %v3450_v30 = vmul.f32 0.01, %v3143_v10  ;;  %3836 = vmatpush.msra.mxu0 %v3471_v54  ;;  %v3230_v18 = vadd.f32 %v3229_v17, %v8992_v49  ;;  %3859 = vmatpush.msra.mxu1 %v3472_v25  ;;  %v9001_v54 = vld [vmem:[#allocation27_spill] sm:$0xff] }
 0x4f1   :  { %5666 = vmatmul.msk.f32.vlgmr.msra.gmra.mxu0 %vm2192_vm4, %v8111_v43  ;;  %5668 = vmatmul.msk.f32.vlgmr.msra.gmra.mxu1 %vm2192_vm4, %v8111_v43  ;;  %v3308_v12 = vadd.f32 %v8233_v2, %v9001_v54  ;;  %v3395_v28 = vmul.f32 0.01, %v3279_v7 }
 0x4f2   :  { %v3530_v51 = vmax.f32 %v3143_v10, %v3450_v30  ;;  %v3453_v44 = vmul.f32 0.01, %v3230_v18 }
 0x4f3   :  { %v3281_v38 = vpop.f32.mrf.mxu0  ;;  %v3310_v27 = vpop.f32.mrf.mxu1  ;;  %v3396_v17 = vmul.f32 0.01, %v3308_v12  ;;  %v3475_v14 = vmax.f32 %v3279_v7, %v3395_v28 }
 0x4f4   :  { %3810 = vmatpush.msra.mxu3 %v3530_v51  ;;  %v3533_v9 = vmax.f32 %v3230_v18, %v3453_v44  ;;  %v3282_v56 = vadd.f32 %v3281_v38, %v8996_v22  ;;  %v3311_v0 = vadd.f32 %v3310_v27, %v8998_v42  ;;  %v9003_v51 = vld [vmem:[#allocation26_spill] sm:$0xff]  ;;  %v9005_v38 = vld [vmem:[#allocation36_spill] sm:$0xff] }
 0x4f5   :  { %v8248_v62 = vpop.f32.mrf.mxu3  ;;  %v3476_v44 = vmax.f32 %v3308_v12, %v3396_v17 }
 0x4f6   :  { %3811 = vmatpush.msra.mxu3 %v3510_v47  ;;  %3879 = vmatpush.msrb.mxu2 %v3533_v9  ;;  %v3415_v25 = vmul.f32 0.01, %v3282_v56  ;;  %v3416_v36 = vmul.f32 0.01, %v3311_v0  ;;  %v9006_v47 = vld [vmem:[#allocation32_spill] sm:$0xff] }
 0x4f7   :  { %v8250_v57 = vpop.f32.mrf.mxu2  ;;  %v3250_v27 = vadd.f32 %v8248_v62, %v9006_v47 }
 0x4f8   :  { %3812 = vmatpush.msra.mxu3 %v3490_v40  ;;  %3880 = vmatpush.msrb.mxu2 %v3513_v8  ;;  %v3495_v20 = vmax.f32 %v3282_v56, %v3415_v25  ;;  %v3496_v18 = vmax.f32 %v3311_v0, %v3416_v36  ;;  %v8303_v36 = vld [vmem:[%s8700_s8] sm:$0xff] }
 0x4f9   :  { %5667 = vmatmul.msk.f32.gmra.mxu0 %vm2192_vm4, %v8132_v55  ;;  %5669 = vmatmul.msk.f32.gmra.mxu1 %vm2192_vm4, %v8132_v55 }
 0x4fa   :  { %3813 = vmatpush.msra.mxu3 %v3470_v39  ;;  %3881 = vmatpush.msrb.mxu2 %v3493_v15  ;;  %v9008_v39 = vld [vmem:[#allocation33_spill] sm:$0xff] }
 0x4fb   :  { %v3284_v41 = vpop.f32.mrf.mxu0  ;;  %5664 = vmatmul.msk.f32.vlgmr.msra.gmra.mxu3 %vm2192_vm4, %v8111_v43  ;;  %v3313_v46 = vpop.f32.mrf.mxu1 }
 0x4fc   :  { %3882 = vmatpush.msrb.mxu2 %v3473_v3  ;;  %v3285_v4 = vadd.f32 %v3284_v41, %v8994_v31  ;;  %v3314_v6 = vadd.f32 %v3313_v46, %v8995_v52  ;;  %v9009_v46 = vld [vmem:[#allocation28_spill] sm:$0xff] }
 0x4fd   :  { %v3252_v58 = vpop.f32.mrf.mxu3  ;;  %5670 = vmatmul.msk.f32.vlgmr.msrb.gmra.mxu2 %vm2192_vm4, %v8111_v43  ;;  %v3337_v62 = vadd.f32 %v8250_v57, %v9009_v46 }
 0x4fe   :  { %v3435_v23 = vmul.f32 0.01, %v3285_v4  ;;  %v3436_v61 = vmul.f32 0.01, %v3314_v6  ;;  %v3253_v24 = vadd.f32 %v3252_v58, %v9003_v51 }
 0x4ff   :  { %v3339_v37 = vpop.f32.mrf.mxu2  ;;  %v3397_v56 = vmul.f32 0.01, %v3337_v62 }
 0x500   :  { %v3515_v30 = vmax.f32 %v3285_v4, %v3435_v23  ;;  %v3516_v50 = vmax.f32 %v3314_v6, %v3436_v61  ;;  %v3340_v8 = vadd.f32 %v3339_v37, %v9007_v33  ;;  %v3414_v3 = vmul.f32 0.01, %v3253_v24 }
 0x501   :  { %v3394_v4 = vmul.f32 0.01, %v3250_v27  ;;  %v3477_v57 = vmax.f32 %v3337_v62, %v3397_v56 }
 0x502   :  { %v3417_v37 = vmul.f32 0.01, %v3340_v8  ;;  %v3494_v22 = vmax.f32 %v3253_v24, %v3414_v3  ;;  %v9012_v24 = vld [vmem:[#allocation61_spill] sm:$0xff] }
 0x503   :  { %v3287_v5 = vpop.f32.mrf.mxu0  ;;  %5665 = vmatmul.msk.f32.gmra.mxu3 %vm2192_vm4, %v8132_v55  ;;  %v3316_v34 = vpop.f32.mrf.mxu1 }
 0x504   :  { %v3288_v60 = vadd.f32 %v3287_v5, %v8997_v13  ;;  %v3317_v1 = vadd.f32 %v3316_v34, %v8999_v29  ;;  %v3497_v34 = vmax.f32 %v3340_v8, %v3417_v37 }
 0x505   :  { %v3255_v19 = vpop.f32.mrf.mxu3  ;;  %5671 = vmatmul.msk.f32.gmra.mxu2 %vm2192_vm4, %v8132_v55 }
 0x506   :  { %v3455_v32 = vmul.f32 0.01, %v3288_v60  ;;  %v3456_v10 = vmul.f32 0.01, %v3317_v1  ;;  %v3256_v49 = vadd.f32 %v3255_v19, %v9002_v48 }
 0x507   :  { %v3342_v26 = vpop.f32.mrf.mxu2 }
 0x508   :  { %v3535_v53 = vmax.f32 %v3288_v60, %v3455_v32  ;;  %v3536_v21 = vmax.f32 %v3317_v1, %v3456_v10  ;;  %v3343_v63 = vadd.f32 %v3342_v26, %v9005_v38  ;;  %v3434_v35 = vmul.f32 0.01, %v3256_v49  ;;  %v8316_v38 = vld [vmem:[%s8700_s8 + $0x8] sm:$0xf] }
 0x509   :  { %v3474_v60 = vmax.f32 %v3250_v27, %v3394_v4 }
 0x50a   :  { %3925 = vmatpush.msrb.mxu0 %v3535_v53  ;;  %3948 = vmatpush.msrb.mxu1 %v3536_v21  ;;  %v3437_v58 = vmul.f32 0.01, %v3343_v63  ;;  %v3514_v52 = vmax.f32 %v3256_v49, %v3434_v35 }
 0x50c   :  { %3926 = vmatpush.msrb.mxu0 %v3515_v30  ;;  %3949 = vmatpush.msrb.mxu1 %v3516_v50  ;;  %v3517_v13 = vmax.f32 %v3343_v63, %v3437_v58  ;;  %v9010_v30 = vld [vmem:[#allocation60_spill] sm:$0xff] }
 0x50d   :  { %v3258_v2 = vpop.f32.mrf.mxu3  ;;  %v3562_v42 = vpop.f32.mrf.mxu0 }
 0x50e   :  { %3927 = vmatpush.msrb.mxu0 %v3495_v20  ;;  %v3259_v45 = vadd.f32 %v3258_v2, %v9004_v59  ;;  %3950 = vmatpush.msrb.mxu1 %v3496_v18  ;;  %v3585_v29 = vpop.f32.mrf.mxu1  ;;  %v4007_v19 = vmul.f32 0.01, %v3562_v42  ;;  %v9011_v18 = vld [vmem:[#allocation30_spill] sm:$0xff] }
 0x50f   :  { %v3345_v40 = vpop.f32.mrf.mxu2  ;;  %v4008_v11 = vmul.f32 0.01, %v3585_v29 }
 0x510   :  { %v3454_v9 = vmul.f32 0.01, %v3259_v45  ;;  %3928 = vmatpush.msrb.mxu0 %v3475_v14  ;;  %v3346_v15 = vadd.f32 %v3345_v40, %v9008_v39  ;;  %3951 = vmatpush.msrb.mxu1 %v3476_v44  ;;  %v4047_v61 = vmax.f32 %v3562_v42, %v4007_v19 }
 0x511   :  { %5674 = vmatmul.msk.f32.vlgmr.msrb.gmra.mxu0 %vm2192_vm4, %v8111_v43  ;;  %5676 = vmatmul.msk.f32.vlgmr.msrb.gmra.mxu1 %vm2192_vm4, %v8111_v43  ;;  %v4048_v25 = vmax.f32 %v3585_v29, %v4008_v11 }
 0x512   :  { %v3534_v41 = vmax.f32 %v3259_v45, %v3454_v9  ;;  %v3457_v31 = vmul.f32 0.01, %v3346_v15 }
 0x514   :  { %3902 = vmatpush.msrb.mxu3 %v3534_v41  ;;  %v3537_v6 = vmax.f32 %v3346_v15, %v3457_v31 }
 0x515   :  { %v3365_v5 = vpop.f32.mrf.mxu3 }
 0x516   :  { %3903 = vmatpush.msrb.mxu3 %v3514_v52  ;;  %3971 = vmatpush.msra.mxu2 %v3537_v6  ;;  %v3366_v59 = vadd.f32 %v3365_v5, %v9012_v24 }
 0x518   :  { %3904 = vmatpush.msrb.mxu3 %v3494_v22  ;;  %3972 = vmatpush.msra.mxu2 %v3517_v13 }
 0x519   :  { %5675 = vmatmul.msk.f32.gmra.mxu0 %vm2192_vm4, %v8132_v55  ;;  %5677 = vmatmul.msk.f32.gmra.mxu1 %vm2192_vm4, %v8132_v55 }
 0x51a   :  { %3905 = vmatpush.msrb.mxu3 %v3474_v60  ;;  %3973 = vmatpush.msra.mxu2 %v3497_v34 }
 0x51b   :  { %5672 = vmatmul.msk.f32.vlgmr.msrb.gmra.mxu3 %vm2192_vm4, %v8111_v43 }
 0x51c   :  { %3974 = vmatpush.msra.mxu2 %v3477_v57 }
 0x51d   :  { %v3368_v0 = vpop.f32.mrf.mxu3  ;;  %5678 = vmatmul.msk.f32.vlgmr.msra.gmra.mxu2 %vm2192_vm4, %v8111_v43 }
 0x51e   :  { %v3369_v2 = vadd.f32 %v3368_v0, %v9011_v18 }
 0x51f   :  { %v3608_v1 = vpop.f32.mrf.mxu2 }
 0x520   :  { %v3565_v7 = vpop.f32.mrf.mxu0  ;;  %v3588_v54 = vpop.f32.mrf.mxu1  ;;  %v4009_v26 = vmul.f32 0.01, %v3608_v1  ;;  %v3418_v63 = vmul.f32 0.01, %v3369_v2 }
 0x521   :  { %v4027_v32 = vmul.f32 0.01, %v3565_v7  ;;  %v4028_v12 = vmul.f32 0.01, %v3588_v54 }
 0x522   :  { %v4049_v50 = vmax.f32 %v3608_v1, %v4009_v26  ;;  %v3498_v33 = vmax.f32 %v3369_v2, %v3418_v63 }
 0x523   :  { %5673 = vmatmul.msk.f32.gmra.mxu3 %vm2192_vm4, %v8132_v55  ;;  %v4067_v10 = vmax.f32 %v3565_v7, %v4027_v32  ;;  %v4068_v53 = vmax.f32 %v3588_v54, %v4028_v12 }
 0x525   :  { %v3371_v23 = vpop.f32.mrf.mxu3  ;;  %5679 = vmatmul.msk.f32.gmra.mxu2 %vm2192_vm4, %v8132_v55  ;;  %4107 = vmatpush.msra.mxu0 %v4067_v10 }
 0x526   :  { %4130 = vmatpush.msra.mxu1 %v4068_v53  ;;  %v3372_v17 = vadd.f32 %v3371_v23, %v9010_v30 }
 0x527   :  { %v3611_v21 = vpop.f32.mrf.mxu2  ;;  %4108 = vmatpush.msra.mxu0 %v4047_v61 }
 0x528   :  { %v4029_v28 = vmul.f32 0.01, %v3611_v21  ;;  %4131 = vmatpush.msra.mxu1 %v4048_v25  ;;  %5682 = vmatmul.msk.f32.vlgmr.msra.gmra.mxu0 %vm824_vm3, %v8303_v36  ;;  %v3438_v45 = vmul.f32 0.01, %v3372_v17 }
 0x529   :  { %5684 = vmatmul.msk.f32.vlgmr.msra.gmra.mxu1 %vm824_vm3, %v8303_v36 }
 0x52a   :  { %v4069_v20 = vmax.f32 %v3611_v21, %v4029_v28  ;;  %v3518_v27 = vmax.f32 %v3372_v17, %v3438_v45 }
 0x52c   :  { %4153 = vmatpush.msrb.mxu2 %v4069_v20 }
 0x52d   :  { %v3374_v48 = vpop.f32.mrf.mxu3  ;;  %v3654_v49 = vpop.f32.mrf.mxu0 }
 0x52e   :  { %v3375_v14 = vadd.f32 %v3374_v48, %v8095_v16  ;;  %v3677_v51 = vpop.f32.mrf.mxu1  ;;  %4154 = vmatpush.msrb.mxu2 %v4049_v50  ;;  %v3398_v16 = vmul.f32 0.01, %v3366_v59  ;;  %v4011_v35 = vmul.f32 0.01, %v3654_v49 }
 0x52f   :  { %5686 = vmatmul.msk.f32.vlgmr.msrb.gmra.mxu2 %vm824_vm3, %v8303_v36  ;;  %v4012_v9 = vmul.f32 0.01, %v3677_v51 }
 0x530   :  { %v3458_v44 = vmul.f32 0.01, %v3375_v14  ;;  %5683 = vmatmul.msk.f32.gmra.mxu0 %vm824_vm3, %v8316_v38  ;;  %v3478_v3 = vmax.f32 %v3366_v59, %v3398_v16  ;;  %v4051_v41 = vmax.f32 %v3654_v49, %v4011_v35 }
 0x531   :  { %5685 = vmatmul.msk.f32.gmra.mxu1 %vm824_vm3, %v8316_v38  ;;  %v4052_v62 = vmax.f32 %v3677_v51, %v4012_v9 }
 0x532   :  { %v3538_v47 = vmax.f32 %v3375_v14, %v3458_v44 }
 0x534   :  { %3994 = vmatpush.msra.mxu3 %v3538_v47 }
 0x535   :  { %v3657_v40 = vpop.f32.mrf.mxu0 }
 0x536   :  { %3995 = vmatpush.msra.mxu3 %v3518_v27  ;;  %v4031_v8 = vmul.f32 0.01, %v3657_v40  ;;  %v3680_v39 = vpop.f32.mrf.mxu1 }
 0x537   :  { %v4032_v15 = vmul.f32 0.01, %v3680_v39  ;;  %5687 = vmatmul.msk.f32.gmra.mxu2 %vm824_vm3, %v8316_v38 }
 0x538   :  { %3996 = vmatpush.msra.mxu3 %v3498_v33  ;;  %v4071_v46 = vmax.f32 %v3657_v40, %v4031_v8 }
 0x539   :  { %v4072_v58 = vmax.f32 %v3680_v39, %v4032_v15 }
 0x53a   :  { %3997 = vmatpush.msra.mxu3 %v3478_v3  ;;  %4199 = vmatpush.msrb.mxu0 %v4071_v46 }
 0x53b   :  { %5680 = vmatmul.msk.f32.vlgmr.msra.gmra.mxu3 %vm2192_vm4, %v8111_v43  ;;  %4222 = vmatpush.msrb.mxu1 %v4072_v58 }
 0x53c   :  { %4200 = vmatpush.msrb.mxu0 %v4051_v41 }
 0x53d   :  { %4223 = vmatpush.msrb.mxu1 %v4052_v62  ;;  %5690 = vmatmul.msk.f32.vlgmr.msrb.gmra.mxu0 %vm824_vm3, %v8303_v36  ;;  %v3631_v31 = vpop.f32.mrf.mxu3 }
 0x53e   :  { %5692 = vmatmul.msk.f32.vlgmr.msrb.gmra.mxu1 %vm824_vm3, %v8303_v36  ;;  %v4010_v52 = vmul.f32 0.01, %v3631_v31 }
 0x540   :  { %v3700_v4 = vpop.f32.mrf.mxu2  ;;  %v4050_v56 = vmax.f32 %v3631_v31, %v4010_v52 }
 0x541   :  { %v4013_v43 = vmul.f32 0.01, %v3700_v4 }
 0x543   :  { %5681 = vmatmul.msk.f32.gmra.mxu3 %vm2192_vm4, %v8132_v55  ;;  %v4053_v60 = vmax.f32 %v3700_v4, %v4013_v43 }
 0x545   :  { %5691 = vmatmul.msk.f32.gmra.mxu0 %vm824_vm3, %v8316_v38  ;;  %v3634_v37 = vpop.f32.mrf.mxu3 }
 0x546   :  { %5693 = vmatmul.msk.f32.gmra.mxu1 %vm824_vm3, %v8316_v38  ;;  %v4030_v6 = vmul.f32 0.01, %v3634_v37 }
 0x548   :  { %v3703_v5 = vpop.f32.mrf.mxu2  ;;  %v4070_v13 = vmax.f32 %v3634_v37, %v4030_v6 }
 0x549   :  { %v4033_v22 = vmul.f32 0.01, %v3703_v5 }
 0x54a   :  { %4176 = vmatpush.msrb.mxu3 %v4070_v13 }
 0x54b   :  { %v4073_v34 = vmax.f32 %v3703_v5, %v4033_v22 }
 0x54c   :  { %4177 = vmatpush.msrb.mxu3 %v4050_v56 }
 0x54d   :  { %4245 = vmatpush.msra.mxu2 %v4073_v34  ;;  %5688 = vmatmul.msk.f32.vlgmr.msrb.gmra.mxu3 %vm824_vm3, %v8303_v36 }
 0x54e   :  { %v3746_v55 = vpop.f32.mrf.mxu0  ;;  %v3769_v57 = vpop.f32.mrf.mxu1 }
 0x54f   :  { %4246 = vmatpush.msra.mxu2 %v4053_v60  ;;  %v4015_v42 = vmul.f32 0.01, %v3746_v55  ;;  %v4016_v0 = vmul.f32 0.01, %v3769_v57 }
 0x550   :  { %5694 = vmatmul.msk.f32.vlgmr.msra.gmra.mxu2 %vm824_vm3, %v8303_v36 }
 0x551   :  { %v4055_v7 = vmax.f32 %v3746_v55, %v4015_v42  ;;  %v4056_v32 = vmax.f32 %v3769_v57, %v4016_v0 }
 0x555   :  { %5689 = vmatmul.msk.f32.gmra.mxu3 %vm824_vm3, %v8316_v38 }
 0x556   :  { %v3749_v29 = vpop.f32.mrf.mxu0  ;;  %v3772_v19 = vpop.f32.mrf.mxu1 }
 0x557   :  { %v4035_v1 = vmul.f32 0.01, %v3749_v29  ;;  %v4036_v11 = vmul.f32 0.01, %v3772_v19 }
 0x558   :  { %5695 = vmatmul.msk.f32.gmra.mxu2 %vm824_vm3, %v8316_v38 }
 0x559   :  { %v4075_v23 = vmax.f32 %v3749_v29, %v4035_v1  ;;  %v4076_v54 = vmax.f32 %v3772_v19, %v4036_v11 }
 0x55b   :  { %4291 = vmatpush.msra.mxu0 %v4075_v23  ;;  %4314 = vmatpush.msra.mxu1 %v4076_v54 }
 0x55d   :  { %4292 = vmatpush.msra.mxu0 %v4055_v7  ;;  %4315 = vmatpush.msra.mxu1 %v4056_v32 }
 0x55e   :  { %5698 = vmatmul.msk.f32.vlgmr.msra.gmra.mxu0 %vm824_vm3, %v8303_v36  ;;  %v3723_v12 = vpop.f32.mrf.mxu3  ;;  %5700 = vmatmul.msk.f32.vlgmr.msra.gmra.mxu1 %vm824_vm3, %v8303_v36 }
 0x55f   :  { %v4014_v10 = vmul.f32 0.01, %v3723_v12 }
 0x560   :  { %v3792_v61 = vpop.f32.mrf.mxu2 }
 0x561   :  { %v4017_v26 = vmul.f32 0.01, %v3792_v61  ;;  %v4054_v28 = vmax.f32 %v3723_v12, %v4014_v10 }
 0x563   :  { %v4057_v50 = vmax.f32 %v3792_v61, %v4017_v26 }
 0x566   :  { %5699 = vmatmul.msk.f32.gmra.mxu0 %vm824_vm3, %v8316_v38  ;;  %v3726_v25 = vpop.f32.mrf.mxu3  ;;  %5701 = vmatmul.msk.f32.gmra.mxu1 %vm824_vm3, %v8316_v38 }
 0x567   :  { %v4034_v53 = vmul.f32 0.01, %v3726_v25 }
 0x568   :  { %v3795_v21 = vpop.f32.mrf.mxu2 }
 0x569   :  { %v4074_v30 = vmax.f32 %v3726_v25, %v4034_v53  ;;  %v4037_v17 = vmul.f32 0.01, %v3795_v21 }
 0x56b   :  { %4268 = vmatpush.msra.mxu3 %v4074_v30  ;;  %v4077_v20 = vmax.f32 %v3795_v21, %v4037_v17 }
 0x56d   :  { %4269 = vmatpush.msra.mxu3 %v4054_v28  ;;  %4337 = vmatpush.msrb.mxu2 %v4077_v20 }
 0x56e   :  { %v3838_v48 = vpop.f32.mrf.mxu0  ;;  %5696 = vmatmul.msk.f32.vlgmr.msra.gmra.mxu3 %vm824_vm3, %v8303_v36  ;;  %v3861_v49 = vpop.f32.mrf.mxu1 }
 0x56f   :  { %4338 = vmatpush.msrb.mxu2 %v4057_v50  ;;  %v4019_v18 = vmul.f32 0.01, %v3838_v48  ;;  %v4020_v2 = vmul.f32 0.01, %v3861_v49 }
 0x570   :  { %5702 = vmatmul.msk.f32.vlgmr.msrb.gmra.mxu2 %vm824_vm3, %v8303_v36 }
 0x571   :  { %v4059_v45 = vmax.f32 %v3838_v48, %v4019_v18  ;;  %v4060_v63 = vmax.f32 %v3861_v49, %v4020_v2 }
 0x576   :  { %v3841_v14 = vpop.f32.mrf.mxu0  ;;  %5697 = vmatmul.msk.f32.gmra.mxu3 %vm824_vm3, %v8316_v38  ;;  %v3864_v24 = vpop.f32.mrf.mxu1 }
 0x577   :  { %v4039_v51 = vmul.f32 0.01, %v3841_v14  ;;  %v4040_v59 = vmul.f32 0.01, %v3864_v24 }
 0x578   :  { %5703 = vmatmul.msk.f32.gmra.mxu2 %vm824_vm3, %v8316_v38 }
 0x579   :  { %v4079_v44 = vmax.f32 %v3841_v14, %v4039_v51  ;;  %v4080_v47 = vmax.f32 %v3864_v24, %v4040_v59 }
 0x57b   :  { %4383 = vmatpush.msrb.mxu0 %v4079_v44  ;;  %4406 = vmatpush.msrb.mxu1 %v4080_v47 }
 0x57d   :  { %4384 = vmatpush.msrb.mxu0 %v4059_v45  ;;  %4407 = vmatpush.msrb.mxu1 %v4060_v63 }
 0x57e   :  { %5706 = vmatmul.msk.f32.vlgmr.msrb.gmra.mxu0 %vm824_vm3, %v8303_v36  ;;  %v3815_v16 = vpop.f32.mrf.mxu3  ;;  %5708 = vmatmul.msk.f32.vlgmr.msrb.gmra.mxu1 %vm824_vm3, %v8303_v36 }
 0x57f   :  { %v4018_v35 = vmul.f32 0.01, %v3815_v16 }
 0x580   :  { %v3884_v27 = vpop.f32.mrf.mxu2 }
 0x581   :  { %v4021_v33 = vmul.f32 0.01, %v3884_v27  ;;  %v4058_v8 = vmax.f32 %v3815_v16, %v4018_v35 }
 0x583   :  { %v4061_v41 = vmax.f32 %v3884_v27, %v4021_v33  ;;  %v8429_v33 = vld [vmem:[%s8701_s9] sm:$0xff] }
 0x586   :  { %5707 = vmatmul.msk.f32.gmra.mxu0 %vm824_vm3, %v8316_v38  ;;  %v3818_v9 = vpop.f32.mrf.mxu3  ;;  %5709 = vmatmul.msk.f32.gmra.mxu1 %vm824_vm3, %v8316_v38 }
 0x587   :  { %v4038_v40 = vmul.f32 0.01, %v3818_v9 }
 0x588   :  { %v3887_v15 = vpop.f32.mrf.mxu2 }
 0x589   :  { %v4078_v39 = vmax.f32 %v3818_v9, %v4038_v40  ;;  %v4041_v3 = vmul.f32 0.01, %v3887_v15 }
 0x58b   :  { %4360 = vmatpush.msrb.mxu3 %v4078_v39  ;;  %v4081_v46 = vmax.f32 %v3887_v15, %v4041_v3 }
 0x58d   :  { %4361 = vmatpush.msrb.mxu3 %v4058_v8  ;;  %4429 = vmatpush.msra.mxu2 %v4081_v46 }
 0x58e   :  { %v3930_v62 = vpop.f32.mrf.mxu0  ;;  %5704 = vmatmul.msk.f32.vlgmr.msrb.gmra.mxu3 %vm824_vm3, %v8303_v36  ;;  %v3953_v58 = vpop.f32.mrf.mxu1 }
 0x58f   :  { %4430 = vmatpush.msra.mxu2 %v4061_v41  ;;  %v4023_v31 = vmul.f32 0.01, %v3930_v62  ;;  %v4024_v4 = vmul.f32 0.01, %v3953_v58 }
 0x590   :  { %5710 = vmatmul.msk.f32.vlgmr.msra.gmra.mxu2 %vm824_vm3, %v8303_v36 }
 0x591   :  { %v4063_v5 = vmax.f32 %v3930_v62, %v4023_v31  ;;  %v4064_v56 = vmax.f32 %v3953_v58, %v4024_v4 }
 0x596   :  { %v3933_v52 = vpop.f32.mrf.mxu0  ;;  %5705 = vmatmul.msk.f32.gmra.mxu3 %vm824_vm3, %v8316_v38  ;;  %v3956_v43 = vpop.f32.mrf.mxu1 }
 0x597   :  { %v4043_v37 = vmul.f32 0.01, %v3933_v52  ;;  %v4044_v6 = vmul.f32 0.01, %v3956_v43 }
 0x598   :  { %5711 = vmatmul.msk.f32.gmra.mxu2 %vm824_vm3, %v8316_v38 }
 0x599   :  { %v4083_v22 = vmax.f32 %v3933_v52, %v4043_v37  ;;  %v4084_v13 = vmax.f32 %v3956_v43, %v4044_v6  ;;  %v8449_v37 = vld [vmem:[%s8701_s9 + $0x8] sm:$0xf] }
 0x59b   :  { %4475 = vmatpush.msra.mxu0 %v4083_v22  ;;  %4498 = vmatpush.msra.mxu1 %v4084_v13 }
 0x59d   :  { %4476 = vmatpush.msra.mxu0 %v4063_v5  ;;  %4499 = vmatpush.msra.mxu1 %v4064_v56 }
 0x59e   :  { %5714 = vmatmul.msk.f32.vlgmr.msra.gmra.mxu0 %vm824_vm3, %v8303_v36  ;;  %v3907_v60 = vpop.f32.mrf.mxu3  ;;  %5716 = vmatmul.msk.f32.vlgmr.msra.gmra.mxu1 %vm824_vm3, %v8303_v36 }
 0x59f   :  { %v4022_v55 = vmul.f32 0.01, %v3907_v60 }
 0x5a0   :  { %v3976_v34 = vpop.f32.mrf.mxu2 }
 0x5a1   :  { %v4025_v0 = vmul.f32 0.01, %v3976_v34  ;;  %v4062_v29 = vmax.f32 %v3907_v60, %v4022_v55 }
 0x5a3   :  { %v4065_v7 = vmax.f32 %v3976_v34, %v4025_v0 }
 0x5a5   :  { %v4110_v54 = vpop.f32.mrf.mxu0 }
 0x5a6   :  { %5715 = vmatmul.msk.f32.gmra.mxu0 %vm824_vm3, %v8316_v38  ;;  %v3910_v57 = vpop.f32.mrf.mxu3  ;;  %5717 = vmatmul.msk.f32.gmra.mxu1 %vm824_vm3, %v8316_v38  ;;  %v8394_v12 = vpop.f32.mrf.mxu1 }
 0x5a7   :  { %v4042_v42 = vmul.f32 0.01, %v3910_v57 }
 0x5a8   :  { %v3979_v19 = vpop.f32.mrf.mxu2 }
 0x5a9   :  { %v4082_v1 = vmax.f32 %v3910_v57, %v4042_v42  ;;  %v4045_v11 = vmul.f32 0.01, %v3979_v19 }
 0x5ab   :  { %4452 = vmatpush.msra.mxu3 %v4082_v1  ;;  %v4085_v23 = vmax.f32 %v3979_v19, %v4045_v11 }
 0x5ad   :  { %4453 = vmatpush.msra.mxu3 %v4062_v29  ;;  %4521 = vmatpush.msrb.mxu2 %v4085_v23  ;;  %v4113_v53 = vpop.f32.mrf.mxu0 }
 0x5ae   :  { %5712 = vmatmul.msk.f32.vlgmr.msra.gmra.mxu3 %vm824_vm3, %v8303_v36  ;;  %v8396_v21 = vpop.f32.mrf.mxu1 }
 0x5af   :  { %4522 = vmatpush.msrb.mxu2 %v4065_v7 }
 0x5b0   :  { %5718 = vmatmul.msk.f32.vlgmr.msrb.gmra.mxu2 %vm824_vm3, %v8303_v36 }
 0x5b2   :  { %v4156_v30 = vpop.f32.mrf.mxu2 }
 0x5b6   :  { %5713 = vmatmul.msk.f32.gmra.mxu3 %vm824_vm3, %v8316_v38 }
 0x5b8   :  { %5719 = vmatmul.msk.f32.gmra.mxu2 %vm824_vm3, %v8316_v38 }
 0x5ba   :  { %v8400_v17 = vpop.f32.mrf.mxu0  ;;  %v4159_v20 = vpop.f32.mrf.mxu2 }
 0x5bb   :  { %v8402_v50 = vpop.f32.mrf.mxu1 }
 0x5be   :  { %v3999_v32 = vpop.f32.mrf.mxu3 }
 0x5bf   :  { %v4026_v10 = vmul.f32 0.01, %v3999_v32 }
 0x5c1   :  { %v4066_v28 = vmax.f32 %v3999_v32, %v4026_v10 }
 0x5c2   :  { %v4205_v48 = vpop.f32.mrf.mxu0 }
 0x5c3   :  { %v8406_v49 = vpop.f32.mrf.mxu1 }
 0x5c6   :  { %v4002_v61 = vpop.f32.mrf.mxu3 }
 0x5c7   :  { %v4046_v25 = vmul.f32 0.01, %v4002_v61 }
 0x5c9   :  { %v4086_v26 = vmax.f32 %v4002_v61, %v4046_v25 }
 0x5cb   :  { %4544 = vmatpush.msrb.mxu3 %v4086_v26 }
 0x5cd   :  { %4545 = vmatpush.msrb.mxu3 %v4066_v28 }
 0x5ce   :  { %5720 = vmatmul.msk.f32.vlgmr.msrb.gmra.mxu3 %vm824_vm3, %v8303_v36 }
 0x5d0   :  { %v4179_v51 = vpop.f32.mrf.mxu3 }
 0x5d3   :  { %v8408_v18 = vpop.f32.mrf.mxu2 }
 0x5d6   :  { %5721 = vmatmul.msk.f32.gmra.mxu3 %vm824_vm3, %v8316_v38 }
 0x5d8   :  { %v4182_v45 = vpop.f32.mrf.mxu3 }
 0x5db   :  { %v8410_v2 = vpop.f32.mrf.mxu0  ;;  %v8412_v14 = vpop.f32.mrf.mxu1 }
 0x5dc   :  { %v8414_v24 = vpop.f32.mrf.mxu2 }
 0x5e3   :  { %v8416_v36 = vpop.f32.mrf.mxu0  ;;  %v8418_v59 = vpop.f32.mrf.mxu1 }
 0x5f1   :  { %v4271_v35 = vpop.f32.mrf.mxu3 }
 0x5f3   :  { %v4340_v44 = vpop.f32.mrf.mxu2 }
 0x5f4   :  { %v4553_v63 = vsub.f32 %v4110_v54, %v4340_v44 }
 0x5f6   :  { %v8420_v9 = vand.u32 2147483647, %v4553_v63 }
 0x5f9   :  { %v4274_v52 = vpop.f32.mrf.mxu3 }
 0x5fb   :  { %v4386_v38 = vpop.f32.mrf.mxu0  ;;  %v4343_v47 = vpop.f32.mrf.mxu2 }
 0x5fc   :  { %v4409_v16 = vpop.f32.mrf.mxu1  ;;  %v4563_v27 = vsub.f32 %v4113_v53, %v4343_v47  ;;  %v4555_v8 = vsub.f32 %v4156_v30, %v4386_v38 }
 0x5fd   :  { %v4556_v39 = vsub.f32 %v4179_v51, %v4409_v16 }
 0x5fe   :  { %v8422_v40 = vand.u32 2147483647, %v4563_v27  ;;  %v8434_v62 = vand.u32 2147483647, %v4555_v8 }
 0x5ff   :  { %v8438_v31 = vand.u32 2147483647, %v4556_v39 }
 0x600   :  { %5722 = vmatpush.msk.msrb.mxu0 %vm4602_vm5, %v8422_v40 }
 0x602   :  { %4648 = vmatpush.msrb.mxu0 %v8420_v9 }
 0x603   :  { %v4389_v15 = vpop.f32.mrf.mxu0  ;;  %5723 = vmatmul.msk.f32.vlgmr.msrb.gmra.mxu0 %vm4595_vm6, %v8429_v33 }
 0x604   :  { %v4565_v3 = vsub.f32 %v4159_v20, %v4389_v15  ;;  %v4412_v41 = vpop.f32.mrf.mxu1 }
 0x605   :  { %v4566_v46 = vsub.f32 %v4182_v45, %v4412_v41 }
 0x606   :  { %v8436_v58 = vand.u32 2147483647, %v4565_v3 }
 0x607   :  { %v8440_v4 = vand.u32 2147483647, %v4566_v46 }
 0x608   :  { %5728 = vmatpush.msk.msra.mxu2 %vm4602_vm5, %v8436_v58 }
 0x609   :  { %5731 = vmatpush.msk.msra.mxu3 %vm4602_vm5, %v8440_v4 }
 0x60a   :  { %4694 = vmatpush.msra.mxu2 %v8434_v62 }
 0x60b   :  { %4717 = vmatpush.msra.mxu3 %v8438_v31  ;;  %5729 = vmatmul.msk.f32.vlgmr.msra.gmra.mxu2 %vm4595_vm6, %v8429_v33 }
 0x60c   :  { %5724 = vmatmul.msk.f32.gmra.mxu0 %vm4595_vm6, %v8449_v37  ;;  %5732 = vmatmul.msk.f32.vlgmr.msra.gmra.mxu3 %vm4595_vm6, %v8429_v33 }
 0x611   :  { %v4363_v43 = vpop.f32.mrf.mxu3 }
 0x612   :  { %v4554_v22 = vsub.f32 %v8394_v12, %v4363_v43 }
 0x613   :  { %5730 = vmatmul.msk.f32.gmra.mxu2 %vm4595_vm6, %v8449_v37  ;;  %v4432_v6 = vpop.f32.mrf.mxu2 }
 0x614   :  { %5733 = vmatmul.msk.f32.gmra.mxu3 %vm4595_vm6, %v8449_v37  ;;  %v4557_v57 = vsub.f32 %v8400_v17, %v4432_v6  ;;  %v8468_v0 = vand.u32 2147483647, %v4554_v22 }
 0x616   :  { %v8475_v1 = vand.u32 2147483647, %v4557_v57 }
 0x619   :  { %v4366_v5 = vpop.f32.mrf.mxu3 }
 0x61a   :  { %v4564_v56 = vsub.f32 %v8396_v21, %v4366_v5 }
 0x61b   :  { %v4478_v13 = vpop.f32.mrf.mxu0  ;;  %v4435_v34 = vpop.f32.mrf.mxu2 }
 0x61c   :  { %v8465_v60 = vand.u32 2147483647, %v4564_v56  ;;  %v4501_v55 = vpop.f32.mrf.mxu1  ;;  %v4567_v42 = vsub.f32 %v4205_v48, %v4435_v34  ;;  %v4559_v11 = vsub.f32 %v8408_v18, %v4478_v13 }
 0x61d   :  { %v4560_v32 = vsub.f32 %v4271_v35, %v4501_v55 }
 0x61e   :  { %5725 = vmatpush.msk.msrb.mxu1 %vm4602_vm5, %v8465_v60  ;;  %v8472_v29 = vand.u32 2147483647, %v4567_v42  ;;  %v8490_v10 = vand.u32 2147483647, %v4559_v11 }
 0x61f   :  { %v8494_v25 = vand.u32 2147483647, %v4560_v32 }
 0x620   :  { %4671 = vmatpush.msrb.mxu1 %v8468_v0  ;;  %5734 = vmatpush.msk.msra.mxu0 %vm4602_vm5, %v8472_v29 }
 0x621   :  { %5726 = vmatmul.msk.f32.vlgmr.msrb.gmra.mxu1 %vm4595_vm6, %v8429_v33 }
 0x622   :  { %4740 = vmatpush.msra.mxu0 %v8475_v1 }
 0x623   :  { %v4481_v19 = vpop.f32.mrf.mxu0  ;;  %5735 = vmatmul.msk.f32.vlgmr.msra.gmra.mxu0 %vm4595_vm6, %v8429_v33 }
 0x624   :  { %v4569_v7 = vsub.f32 %v8414_v24, %v4481_v19  ;;  %v4504_v23 = vpop.f32.mrf.mxu1 }
 0x625   :  { %v4570_v54 = vsub.f32 %v4274_v52, %v4504_v23 }
 0x626   :  { %v8486_v12 = vand.u32 2147483647, %v4569_v7 }
 0x627   :  { %v8488_v61 = vand.u32 2147483647, %v4570_v54 }
 0x628   :  { %5740 = vmatpush.msk.msrb.mxu2 %vm4602_vm5, %v8486_v12 }
 0x629   :  { %5743 = vmatpush.msk.msrb.mxu3 %vm4602_vm5, %v8488_v61  ;;  %5727 = vmatmul.msk.f32.gmra.mxu1 %vm4595_vm6, %v8449_v37 }
 0x62a   :  { %4786 = vmatpush.msrb.mxu2 %v8490_v10 }
 0x62b   :  { %4809 = vmatpush.msrb.mxu3 %v8494_v25  ;;  %5741 = vmatmul.msk.f32.vlgmr.msrb.gmra.mxu2 %vm4595_vm6, %v8429_v33 }
 0x62c   :  { %5736 = vmatmul.msk.f32.gmra.mxu0 %vm4595_vm6, %v8449_v37  ;;  %5744 = vmatmul.msk.f32.vlgmr.msrb.gmra.mxu3 %vm4595_vm6, %v8429_v33 }
 0x631   :  { %v4455_v53 = vpop.f32.mrf.mxu3 }
 0x632   :  { %v4558_v28 = vsub.f32 %v8402_v50, %v4455_v53 }
 0x633   :  { %5742 = vmatmul.msk.f32.gmra.mxu2 %vm4595_vm6, %v8449_v37  ;;  %v4524_v26 = vpop.f32.mrf.mxu2 }
 0x634   :  { %5745 = vmatmul.msk.f32.gmra.mxu3 %vm4595_vm6, %v8449_v37  ;;  %v4561_v48 = vsub.f32 %v8410_v2, %v4524_v26  ;;  %v8518_v51 = vand.u32 2147483647, %v4558_v28 }
 0x636   :  { %v8525_v45 = vand.u32 2147483647, %v4561_v48 }
 0x639   :  { %v4458_v21 = vpop.f32.mrf.mxu3 }
 0x63a   :  { %v4568_v30 = vsub.f32 %v8406_v49, %v4458_v21 }
 0x63b   :  { %v4527_v20 = vpop.f32.mrf.mxu2 }
 0x63c   :  { %v8514_v17 = vand.u32 2147483647, %v4568_v30  ;;  %v4571_v18 = vsub.f32 %v8416_v36, %v4527_v20 }
 0x63e   :  { %5737 = vmatpush.msk.msra.mxu1 %vm4602_vm5, %v8514_v17  ;;  %v8522_v24 = vand.u32 2147483647, %v4571_v18 }
 0x640   :  { %4763 = vmatpush.msra.mxu1 %v8518_v51  ;;  %5746 = vmatpush.msk.msrb.mxu0 %vm4602_vm5, %v8522_v24 }
 0x641   :  { %5738 = vmatmul.msk.f32.vlgmr.msra.gmra.mxu1 %vm4595_vm6, %v8429_v33 }
 0x642   :  { %4832 = vmatpush.msrb.mxu0 %v8525_v45 }
 0x643   :  { %5747 = vmatmul.msk.f32.vlgmr.msrb.gmra.mxu0 %vm4595_vm6, %v8429_v33 }
 0x649   :  { %5739 = vmatmul.msk.f32.gmra.mxu1 %vm4595_vm6, %v8449_v37 }
 0x64b   :  { %5748 = vmatmul.msk.f32.gmra.mxu0 %vm4595_vm6, %v8449_v37 }
 0x651   :  { %v4547_v50 = vpop.f32.mrf.mxu3 }
 0x652   :  { %v4562_v2 = vsub.f32 %v8412_v14, %v4547_v50 }
 0x654   :  { %v8542_v63 = vand.u32 2147483647, %v4562_v2 }
 0x659   :  { %v4550_v49 = vpop.f32.mrf.mxu3 }
 0x65a   :  { %v4572_v36 = vsub.f32 %v8418_v59, %v4550_v49 }
 0x65c   :  { %v8540_v44 = vand.u32 2147483647, %v4572_v36 }
 0x65e   :  { %5749 = vmatpush.msk.msrb.mxu1 %vm4602_vm5, %v8540_v44 }
 0x660   :  { %4855 = vmatpush.msrb.mxu1 %v8542_v63 }
 0x661   :  { %5750 = vmatmul.msk.f32.vlgmr.msrb.gmra.mxu1 %vm4595_vm6, %v8429_v33 }
 0x669   :  { %5751 = vmatmul.msk.f32.gmra.mxu1 %vm4595_vm6, %v8449_v37 }
 0x680   :  { %v4650_v38 = vpop.f32.mrf.mxu0 }
 0x681   :  { %v4863_v59 = vmul.f32 %v4650_v38, %v8420_v9 }
 0x689   :  { %v4653_v47 = vpop.f32.mrf.mxu0 }
 0x68a   :  { %v4873_v14 = vmul.f32 %v4653_v47, %v8422_v40 }
 0x68c   :  { %v4883_v16 = vsel %vm4602_vm5, %v4873_v14, 0.0 }
 0x68d   :  { %v4884_v27 = vadd.f32 %v4883_v16, %v4863_v59 }
 0x68e   :  { %v4696_v35 = vpop.f32.mrf.mxu2 }
 0x68f   :  { %v4885_v8 = vrot.slane %v4884_v27, 4  ;;  %v4719_v39 = vpop.f32.mrf.mxu3  ;;  %v4865_v43 = vmul.f32 %v4696_v35, %v8434_v62 }
 0x690   :  { %v4866_v9 = vmul.f32 %v4719_v39, %v8438_v31 }
 0x691   :  { %v4886_v15 = vadd.f32 %v4885_v8, %v4884_v27 }
 0x693   :  { %v4887_v3 = vrot.slane %v4886_v15, 2 }
 0x695   :  { %v4888_v41 = vadd.f32 %v4887_v3, %v4886_v15 }
 0x696   :  { %v4699_v46 = vpop.f32.mrf.mxu2 }
 0x697   :  { %v4889_v33 = vrot.slane %v4888_v41, 1  ;;  %v4875_v52 = vmul.f32 %v4699_v46, %v8436_v58  ;;  %v4722_v37 = vpop.f32.mrf.mxu3 }
 0x698   :  { %v4876_v40 = vmul.f32 %v4722_v37, %v8440_v4 }
 0x699   :  { %v4890_v6 = vadd.f32 %v4889_v33, %v4888_v41  ;;  %v4899_v5 = vsel %vm4602_vm5, %v4875_v52, 0.0 }
 0x69a   :  { %v4900_v22 = vadd.f32 %v4899_v5, %v4865_v43  ;;  %v4907_v56 = vsel %vm4602_vm5, %v4876_v40, 0.0 }
 0x69b   :  { %v8560_v13 = vadd.f32 1e-08, %v4890_v6  ;;  %v4908_v34 = vadd.f32 %v4907_v56, %v4866_v9 }
 0x69c   :  { %v4901_v55 = vrot.slane %v4900_v22, 4 }
 0x69d   :  { %v4909_v57 = vrot.slane %v4908_v34, 4  ;;  %5758 = vrsqrt.f32 %v8560_v13  ;;  %vm4980_vm7 = vcmp.eq.f32.partialorder %v8560_v13, inf  ;;  %vm4982_vm8 = vcmp.eq.f32.partialorder %v8560_v13, 0.0 }
 0x69e   :  { %v4902_v42 = vadd.f32 %v4901_v55, %v4900_v22  ;;  %v4673_v58 = vpop.f32.mrf.mxu1 }
 0x69f   :  { %v4910_v62 = vadd.f32 %v4909_v57, %v4908_v34  ;;  %v4864_v48 = vmul.f32 %v4673_v58, %v8468_v0 }
 0x6a0   :  { %v4903_v19 = vrot.slane %v4902_v42, 2  ;;  %v4742_v11 = vpop.f32.mrf.mxu0 }
 0x6a1   :  { %v4911_v4 = vrot.slane %v4910_v62, 2  ;;  %v4867_v38 = vmul.f32 %v4742_v11, %v8475_v1 }
 0x6a2   :  { %v4904_v7 = vadd.f32 %v4903_v19, %v4902_v42 }
 0x6a3   :  { %v4912_v31 = vadd.f32 %v4911_v4, %v4910_v62  ;;  %v5759_v23 = vpop.eup %5758  ;;  %v5093_v4 = vlaneseq }
 0x6a4   :  { %v4905_v32 = vrot.slane %v4904_v7, 1  ;;  %v4974_v30 = vmul.f32 %v5759_v23, %v8560_v13 }
 0x6a5   :  { %v4913_v54 = vrot.slane %v4912_v31, 1 }
 0x6a6   :  { %v4906_v53 = vadd.f32 %v4905_v32, %v4904_v7  ;;  %v4676_v26 = vpop.f32.mrf.mxu1  ;;  %v4975_v47 = vmul.f32 %v5759_v23, %v4974_v30  ;;  %v4983_v30 = vand.u32 2147483648, %v8560_v13 }
 0x6a7   :  { %v4914_v21 = vadd.f32 %v4913_v54, %v4912_v31  ;;  %v4874_v28 = vmul.f32 %v4676_v26, %v8465_v60  ;;  %v8591_v26 = vand.u32 127, %v5093_v4 }
 0x6a8   :  { %v8565_v20 = vadd.f32 1e-08, %v4906_v53  ;;  %v4976_v8 = vmul.f32 0.5, %v4975_v47 }
 0x6a9   :  { %v8568_v18 = vadd.f32 1e-08, %v4914_v21  ;;  %v4891_v50 = vsel %vm4602_vm5, %v4874_v28, 0.0  ;;  %v4745_v49 = vpop.f32.mrf.mxu0 }
 0x6aa   :  { %v4892_v2 = vadd.f32 %v4891_v50, %v4864_v48  ;;  %v4877_v36 = vmul.f32 %v4745_v49, %v8472_v29  ;;  %5760 = vrsqrt.f32 %v8565_v20  ;;  %v4977_v33 = vsub.f32 1.5, %v4976_v8 }
 0x6ab   :  { %5762 = vrsqrt.f32 %v8568_v18  ;;  %vm5004_vm10 = vcmp.eq.f32.partialorder %v8565_v20, inf  ;;  %vm5006_vm11 = vcmp.eq.f32.partialorder %v8565_v20, 0.0  ;;  %vm5016_vm12 = vcmp.eq.f32.partialorder %v8568_v18, inf }
 0x6ac   :  { %v4893_v60 = vrot.slane %v4892_v2, 4  ;;  %v4915_v14 = vsel %vm4602_vm5, %v4877_v36, 0.0  ;;  %v4978_v22 = vmul.f32 %v5759_v23, %v4977_v33  ;;  %vm5018_vm14 = vcmp.eq.f32.partialorder %v8568_v18, 0.0 }
 0x6ad   :  { %v4916_v59 = vadd.f32 %v4915_v14, %v4867_v38  ;;  %v8599_v14 = vadd.s32 512, %v8591_v26 }
 0x6ae   :  { %v4894_v0 = vadd.f32 %v4893_v60, %v4892_v2  ;;  %v4788_v16 = vpop.f32.mrf.mxu2  ;;  %v4979_v19 = vmul.f32 %v4978_v22, %v8560_v13 }
 0x6af   :  { %v4917_v27 = vrot.slane %v4916_v59, 4  ;;  %v4811_v35 = vpop.f32.mrf.mxu3  ;;  %v4869_v23 = vmul.f32 %v4788_v16, %v8490_v10  ;;  %v5019_v16 = vand.u32 2147483648, %v8568_v18  ;;  %vm5103_vm15 = vcmp.lt.s32.totalorder %v8599_v14, 576 }
 0x6b0   :  { %v5761_v39 = vpop.eup %5760  ;;  %v4895_v15 = vrot.slane %v4894_v0, 2  ;;  %v4981_v53 = vsel %vm4980_vm7, %v8560_v13, %v4979_v19  ;;  %v4870_v48 = vmul.f32 %v4811_v35, %v8494_v25  ;;  %v5007_v13 = vand.u32 2147483648, %v8565_v20 }
 0x6b1   :  { %v5763_v3 = vpop.eup %5762  ;;  %v4918_v29 = vadd.f32 %v4917_v27, %v4916_v59  ;;  %v4998_v46 = vmul.f32 %v5761_v39, %v8565_v20  ;;  %v4984_v49 = vsel %vm4982_vm8, %v4983_v30, %v4981_v53 }
 0x6b2   :  { %v4896_v41 = vadd.f32 %v4895_v15, %v4894_v0  ;;  %v5010_v37 = vmul.f32 %v5763_v3, %v8568_v18 }
 0x6b3   :  { %v4919_v1 = vrot.slane %v4918_v29, 2  ;;  %v4999_v9 = vmul.f32 %v5761_v39, %v4998_v46 }
 0x6b4   :  { %v4897_v52 = vrot.slane %v4896_v41, 1  ;;  %v5011_v55 = vmul.f32 %v5763_v3, %v5010_v37 }
 0x6b5   :  { %v4920_v43 = vadd.f32 %v4919_v1, %v4918_v29  ;;  %v5000_v58 = vmul.f32 0.5, %v4999_v9 }
 0x6b6   :  { %v4898_v40 = vadd.f32 %v4897_v52, %v4896_v41  ;;  %v4791_v6 = vpop.f32.mrf.mxu2  ;;  %v5012_v31 = vmul.f32 0.5, %v5011_v55 }
 0x6b7   :  { %v4921_v5 = vrot.slane %v4920_v43, 1  ;;  %v4879_v34 = vmul.f32 %v4791_v6, %v8486_v12  ;;  %v4814_v42 = vpop.f32.mrf.mxu3  ;;  %v5001_v32 = vsub.f32 1.5, %v5000_v58 }
 0x6b8   :  { %v8578_v56 = vadd.f32 1e-08, %v4898_v40  ;;  %v4880_v7 = vmul.f32 %v4814_v42, %v8488_v61  ;;  %v5013_v61 = vsub.f32 1.5, %v5012_v31 }
 0x6b9   :  { %v4922_v57 = vadd.f32 %v4921_v5, %v4920_v43  ;;  %v4931_v11 = vsel %vm4602_vm5, %v4879_v34, 0.0  ;;  %v5002_v2 = vmul.f32 %v5761_v39, %v5001_v32  ;;  %v5110_v39 = vsel %vm5109_vm9, %v4984_v49, 0.0 }
 0x6ba   :  { %5764 = vrsqrt.f32 %v8578_v56  ;;  %v4932_v54 = vadd.f32 %v4931_v11, %v4869_v23  ;;  %v4939_v28 = vsel %vm4602_vm5, %v4880_v7, 0.0  ;;  %v5014_v59 = vmul.f32 %v5763_v3, %v5013_v61 }
 0x6bb   :  { %v8582_v62 = vadd.f32 1e-08, %v4922_v57  ;;  %v4940_v47 = vadd.f32 %v4939_v28, %v4870_v48  ;;  %vm4992_vm13 = vcmp.eq.f32.partialorder %v8578_v56, inf  ;;  %v5003_v35 = vmul.f32 %v5002_v2, %v8565_v20 }
 0x6bc   :  { %v4933_v38 = vrot.slane %v4932_v54, 4  ;;  %vm4994_vm0 = vcmp.eq.f32.partialorder %v8578_v56, 0.0  ;;  %v5015_v1 = vmul.f32 %v5014_v59, %v8568_v18  ;;  %v4995_v40 = vand.u32 2147483648, %v8578_v56 }
 0x6bd   :  { %5766 = vrsqrt.f32 %v8582_v62  ;;  %v4941_v3 = vrot.slane %v4940_v47, 4  ;;  %vm5028_vm1 = vcmp.eq.f32.partialorder %v8582_v62, inf  ;;  %vm5030_vm2 = vcmp.eq.f32.partialorder %v8582_v62, 0.0 }
 0x6be   :  { %v4765_v12 = vpop.f32.mrf.mxu1  ;;  %v4934_v15 = vadd.f32 %v4933_v38, %v4932_v54  ;;  %v5017_v58 = vsel %vm5016_vm12, %v8568_v18, %v5015_v1  ;;  %v5031_v11 = vand.u32 2147483648, %v8582_v62 }
 0x6bf   :  { %v4868_v46 = vmul.f32 %v4765_v12, %v8518_v51  ;;  %v5005_v51 = vsel %vm5004_vm10, %v8565_v20, %v5003_v35  ;;  %v4942_v22 = vadd.f32 %v4941_v3, %v4940_v47  ;;  %v5020_v54 = vsel %vm5018_vm14, %v5019_v16, %v5017_v58 }
 0x6c0   :  { %v5765_v21 = vpop.eup %5764  ;;  %v4834_v10 = vpop.f32.mrf.mxu0  ;;  %v4935_v5 = vrot.slane %v4934_v15, 2  ;;  %v5008_v31 = vsel %vm5006_vm11, %v5007_v13, %v5005_v51  ;;  %v5115_v2 = vsel %vm5109_vm9, %v5020_v54, 0.0  ;;  %vm5156_vm14 = vcmp.eq.s32.totalorder %v8591_v26, 1 }
 0x6c1   :  { %v4986_v50 = vmul.f32 %v5765_v21, %v8578_v56  ;;  %v4871_v34 = vmul.f32 %v4834_v10, %v8525_v45  ;;  %v4943_v12 = vrot.slane %v4942_v22, 2  ;;  %v5113_v20 = vsel %vm5109_vm9, %v5008_v31, 0.0 }
 0x6c3   :  { %v5767_v36 = vpop.eup %5766  ;;  %v4987_v60 = vmul.f32 %v5765_v21, %v4986_v50  ;;  %v4944_v18 = vadd.f32 %v4943_v12, %v4942_v22 }
 0x6c4   :  { %v5022_v25 = vmul.f32 %v5767_v36, %v8582_v62 }
 0x6c5   :  { %v4988_v0 = vmul.f32 0.5, %v4987_v60  ;;  %v4945_v13 = vrot.slane %v4944_v18, 1 }
 0x6c6   :  { %v4768_v27 = vpop.f32.mrf.mxu1  ;;  %v5023_v8 = vmul.f32 %v5767_v36, %v5022_v25 }
 0x6c7   :  { %v4878_v29 = vmul.f32 %v4768_v27, %v8514_v17  ;;  %v4989_v41 = vsub.f32 1.5, %v4988_v0 }
 0x6c8   :  { %v5024_v33 = vmul.f32 0.5, %v5023_v8  ;;  %v4837_v37 = vpop.f32.mrf.mxu0  ;;  %v4946_v8 = vadd.f32 %v4945_v13, %v4944_v18 }
 0x6c9   :  { %v4923_v52 = vsel %vm4602_vm5, %v4878_v29, 0.0  ;;  %v4990_v43 = vmul.f32 %v5765_v21, %v4989_v41  ;;  %v4881_v17 = vmul.f32 %v4837_v37, %v8522_v24  ;;  %v4936_v21 = vadd.f32 %v4935_v5, %v4934_v15 }
 0x6ca   :  { %v4924_v6 = vadd.f32 %v4923_v52, %v4868_v46  ;;  %v5025_v9 = vsub.f32 1.5, %v5024_v33  ;;  %v8652_v3 = vadd.f32 1e-08, %v4946_v8 }
 0x6cb   :  { %v4991_v55 = vmul.f32 %v4990_v43, %v8578_v56  ;;  %v4947_v42 = vsel %vm4602_vm5, %v4881_v17, 0.0 }
 0x6cc   :  { %v4925_v57 = vrot.slane %v4924_v6, 4  ;;  %v5026_v19 = vmul.f32 %v5767_v36, %v5025_v9  ;;  %v4948_v24 = vadd.f32 %v4947_v42, %v4871_v34  ;;  %v4937_v36 = vrot.slane %v4936_v21, 1 }
 0x6cd   :  { %v4993_v4 = vsel %vm4992_vm13, %v8578_v56, %v4991_v55  ;;  %vm5064_vm7 = vcmp.eq.f32.partialorder %v8652_v3, inf  ;;  %vm5066_vm8 = vcmp.eq.f32.partialorder %v8652_v3, 0.0 }
 0x6ce   :  { %v4926_v45 = vadd.f32 %v4925_v57, %v4924_v6  ;;  %v4996_v7 = vsel %vm4994_vm0, %v4995_v40, %v4993_v4  ;;  %v5027_v23 = vmul.f32 %v5026_v19, %v8582_v62  ;;  %v4949_v32 = vrot.slane %v4948_v24, 4 }
 0x6cf   :  { %v5111_v53 = vsel %vm5109_vm9, %v4996_v7, 0.0  ;;  %v4938_v0 = vadd.f32 %v4937_v36, %v4936_v21 }
 0x6d0   :  { %v4927_v28 = vrot.slane %v4926_v45, 2  ;;  %v5029_v30 = vsel %vm5028_vm1, %v8582_v62, %v5027_v23  ;;  %v5112_v56 = vadd.f32 %v5111_v53, %v5110_v39  ;;  %v4950_v61 = vadd.f32 %v4949_v32, %v4948_v24 }
 0x6d1   :  { %v5032_v48 = vsel %vm5030_vm2, %v5031_v11, %v5029_v30  ;;  %v8650_v35 = vadd.f32 1e-08, %v4938_v0  ;;  %v5067_v0 = vand.u32 2147483648, %v8652_v3 }
 0x6d2   :  { %v4928_v10 = vadd.f32 %v4927_v28, %v4926_v45  ;;  %v5108_v50 = vsel %vm5103_vm15, %v5032_v48, 0.0  ;;  %v5114_v49 = vadd.f32 %v5113_v20, %v5112_v56  ;;  %v4951_v47 = vrot.slane %v4950_v61, 2 }
 0x6d3   :  { %v5117_v59 = vsel %vm5109_vm9, %v5108_v50, 0.0  ;;  %vm5052_vm4 = vcmp.eq.f32.partialorder %v8650_v35, inf  ;;  %v5055_v36 = vand.u32 2147483648, %v8650_v35  ;;  %vm5054_vm6 = vcmp.eq.f32.partialorder %v8650_v35, 0.0 }
 0x6d4   :  { %v4929_v38 = vrot.slane %v4928_v10, 1  ;;  %v5116_v60 = vadd.f32 %v5115_v2, %v5114_v49  ;;  %v4952_v16 = vadd.f32 %v4951_v47, %v4950_v61 }
 0x6d6   :  { %v4930_v62 = vadd.f32 %v4929_v38, %v4928_v10  ;;  %v5118_v25 = vadd.f32 %v5117_v59, %v5116_v60  ;;  %v4953_v39 = vrot.slane %v4952_v16, 1 }
 0x6d8   :  { %5119 = vadd.xlane.f32.xlu0 %v5118_v25  ;;  %v4968_v27 = vadd.f32 1e-08, %v4930_v62  ;;  %v4954_v29 = vadd.f32 %v4953_v39, %v4952_v16 }
 0x6da   :  { %5768 = vrsqrt.f32 %v4968_v27  ;;  %v8655_v46 = vadd.f32 1e-08, %v4954_v29  ;;  %vm5040_vm3 = vcmp.eq.f32.partialorder %v4968_v27, inf  ;;  %v5043_v20 = vand.u32 2147483648, %v4968_v27 }
 0x6db   :  { %5770 = vrsqrt.f32 %v8650_v35 }
 0x6dc   :  { %5772 = vrsqrt.f32 %v8652_v3  ;;  %vm5076_vm10 = vcmp.eq.f32.partialorder %v8655_v46, inf  ;;  %vm5078_vm11 = vcmp.eq.f32.partialorder %v8655_v46, 0.0 }
 0x6dd   :  { %5774 = vrsqrt.f32 %v8655_v46 }
 0x6de   :  { %v4857_v15 = vpop.f32.mrf.mxu1 }
 0x6df   :  { %v4872_v43 = vmul.f32 %v4857_v15, %v8542_v63  ;;  %v5079_v15 = vand.u32 2147483648, %v8655_v46 }
 0x6e0   :  { %v5769_v41 = vpop.eup %5768 }
 0x6e1   :  { %v5771_v1 = vpop.eup %5770  ;;  %v5034_v52 = vmul.f32 %v5769_v41, %v4968_v27 }
 0x6e2   :  { %v5046_v40 = vmul.f32 %v5771_v1, %v8650_v35  ;;  %v5773_v6 = vpop.eup %5772 }
 0x6e3   :  { %v5035_v9 = vmul.f32 %v5769_v41, %v5034_v52  ;;  %v5058_v34 = vmul.f32 %v5773_v6, %v8652_v3  ;;  %v5775_v55 = vpop.eup %5774 }
 0x6e4   :  { %v5047_v22 = vmul.f32 %v5771_v1, %v5046_v40  ;;  %v5070_v24 = vmul.f32 %v5775_v55, %v8655_v46 }
 0x6e5   :  { %v5036_v42 = vmul.f32 0.5, %v5035_v9  ;;  %v5059_v19 = vmul.f32 %v5773_v6, %v5058_v34 }
 0x6e6   :  { %v4860_v33 = vpop.f32.mrf.mxu1  ;;  %v5071_v31 = vmul.f32 %v5775_v55, %v5070_v24 }
 0x6e7   :  { %v4882_v37 = vmul.f32 %v4860_v33, %v8540_v44  ;;  %v5048_v44 = vmul.f32 0.5, %v5047_v22  ;;  %v5037_v4 = vsub.f32 1.5, %v5036_v42  ;;  %v5060_v7 = vmul.f32 0.5, %v5059_v19 }
 0x6e8   :  { %v5072_v21 = vmul.f32 0.5, %v5071_v31 }
 0x6e9   :  { %v4955_v17 = vsel %vm4602_vm5, %v4882_v37, 0.0  ;;  %v5049_v45 = vsub.f32 1.5, %v5048_v44  ;;  %v5038_v12 = vmul.f32 %v5769_v41, %v5037_v4  ;;  %v5061_v53 = vsub.f32 1.5, %v5060_v7 }
 0x6ea   :  { %v4956_v51 = vadd.f32 %v4955_v17, %v4872_v43  ;;  %v5073_v61 = vsub.f32 1.5, %v5072_v21  ;;  %vm5042_vm5 = vcmp.eq.f32.partialorder %v4968_v27, 0.0 }
 0x6eb   :  { %v5050_v54 = vmul.f32 %v5771_v1, %v5049_v45  ;;  %v5039_v28 = vmul.f32 %v5038_v12, %v4968_v27  ;;  %v5062_v56 = vmul.f32 %v5773_v6, %v5061_v53 }
 0x6ec   :  { %v4957_v5 = vrot.slane %v4956_v51, 4  ;;  %v5074_v18 = vmul.f32 %v5775_v55, %v5073_v61 }
 0x6ed   :  { %v5051_v30 = vmul.f32 %v5050_v54, %v8650_v35  ;;  %v5041_v48 = vsel %vm5040_vm3, %v4968_v27, %v5039_v28  ;;  %v5063_v49 = vmul.f32 %v5062_v56, %v8652_v3 }
 0x6ee   :  { %v4958_v57 = vadd.f32 %v4957_v5, %v4956_v51  ;;  %v5044_v2 = vsel %vm5042_vm5, %v5043_v20, %v5041_v48  ;;  %v5075_v62 = vmul.f32 %v5074_v18, %v8655_v46 }
 0x6ef   :  { %v5053_v50 = vsel %vm5052_vm4, %v8650_v35, %v5051_v30  ;;  %v5065_v59 = vsel %vm5064_vm7, %v8652_v3, %v5063_v49  ;;  %v5137_v25 = vsel %vm5109_vm9, %v5044_v2, 0.0 }
 0x6f0   :  { %v4959_v58 = vrot.slane %v4958_v57, 2  ;;  %v5056_v47 = vsel %vm5054_vm6, %v5055_v36, %v5053_v50  ;;  %v5068_v27 = vsel %vm5066_vm8, %v5067_v0, %v5065_v59  ;;  %v5077_v39 = vsel %vm5076_vm10, %v8655_v46, %v5075_v62 }
 0x6f1   :  { %v5138_v16 = vsel %vm5109_vm9, %v5056_v47, 0.0  ;;  %v5140_v41 = vsel %vm5109_vm9, %v5068_v27, 0.0  ;;  %v5080_v1 = vsel %vm5078_vm11, %v5079_v15, %v5077_v39 }
 0x6f2   :  { %v4960_v63 = vadd.f32 %v4959_v58, %v4958_v57  ;;  %v5139_v8 = vadd.f32 %v5138_v16, %v5137_v25  ;;  %v5142_v40 = vsel %vm5109_vm9, %v5080_v1, 0.0 }
 0x6f4   :  { %v4961_v11 = vrot.slane %v4960_v63, 1  ;;  %v5141_v52 = vadd.f32 %v5140_v41, %v5139_v8 }
 0x6f6   :  { %v4962_v23 = vadd.f32 %v4961_v11, %v4960_v63  ;;  %v5143_v17 = vadd.f32 %v5142_v40, %v5141_v52 }
 0x6f8   :  { %v4972_v32 = vadd.f32 1e-08, %v4962_v23 }
 0x6fa   :  { %5776 = vrsqrt.f32 %v4972_v32  ;;  %vm5088_vm12 = vcmp.eq.f32.partialorder %v4972_v32, inf  ;;  %v5091_v3 = vand.u32 2147483648, %v4972_v32  ;;  %vm5090_vm13 = vcmp.eq.f32.partialorder %v4972_v32, 0.0 }
 0x700   :  { %v5777_v10 = vpop.eup %5776 }
 0x701   :  { %v5082_v38 = vmul.f32 %v5777_v10, %v4972_v32 }
 0x703   :  { %v5083_v60 = vmul.f32 %v5777_v10, %v5082_v38 }
 0x705   :  { %v5084_v13 = vmul.f32 0.5, %v5083_v60 }
 0x707   :  { %v5085_v35 = vsub.f32 1.5, %v5084_v13 }
 0x709   :  { %v5086_v29 = vmul.f32 %v5777_v10, %v5085_v35 }
 0x70b   :  { %v5087_v33 = vmul.f32 %v5086_v29, %v4972_v32 }
 0x70d   :  { %v5089_v37 = vsel %vm5088_vm12, %v4972_v32, %v5087_v33 }
 0x70e   :  { %v5092_v43 = vsel %vm5090_vm13, %v5091_v3, %v5089_v37 }
 0x70f   :  { %v5136_v6 = vsel %vm5103_vm15, %v5092_v43, 0.0 }
 0x710   :  { %v5144_v51 = vsel %vm5109_vm9, %v5136_v6, 0.0  ;;  %vm5129_vm9 = vcmp.eq.s32.totalorder %v8591_v26, 0 }
 0x711   :  { %v5145_v9 = vadd.f32 %v5144_v51, %v5143_v17 }
 0x713   :  { %5146 = vadd.xlane.f32.xlu0 %v5145_v9 }
 0x74b   :  { %v5120_v46 = vpop.xlane.xlu0 %5119 }
 0x74c   :  { %v5121_v5 = vrot.slane %v5120_v46, 4 }
 0x74e   :  { %v5122_v22 = vadd.f32 %v5121_v5, %v5120_v46 }
 0x750   :  { %v5123_v34 = vrot.slane %v5122_v22, 2 }
 0x752   :  { %v5124_v55 = vadd.f32 %v5123_v34, %v5122_v22 }
 0x754   :  { %v5125_v57 = vrot.slane %v5124_v55, 1 }
 0x756   :  { %v5126_v42 = vadd.f32 %v5125_v57, %v5124_v55 }
 0x758   :  { %5754 = vpush %v5126_v42 }
 0x786   :  { %v5147_v58 = vpop.xlane.xlu0 %5146 }
 0x787   :  { %v5148_v44 = vrot.slane %v5147_v58, 4 }
 0x789   :  { %v5149_v19 = vadd.f32 %v5148_v44, %v5147_v58  ;;  %s5755_s9 = spop %5754 }
 0x78a   :  { %s5128_s0 = smul.f32 0.0017361111, %s5755_s9 }
 0x78b   :  { %v5150_v24 = vrot.slane %v5149_v19, 2 }
 0x78c   :  { %v5130_v11 = vstv %s5128_s0 }
 0x78d   :  { %v5151_v63 = vadd.f32 %v5150_v24, %v5149_v19  ;;  %v5131_v45 = vsel %vm5129_vm9, %v5130_v11, 0.0 }
 0x78f   :  { %v5152_v14 = vrot.slane %v5151_v63, 1 }
 0x791   :  { %v5153_v4 = vadd.f32 %v5152_v14, %v5151_v63 }
 0x793   :  { %5756 = vpush %v5153_v4 }
 0x7c4   :  { %s5757_s4 = spop %5756 }
 0x7c5   :  { %s5155_s1 = smul.f32 0.0017361111, %s5757_s4 }
 0x7c7   :  { %v5157_v7 = vstv %s5155_s1 }
 0x7c8   :  { %v5158_v31 = vsel %vm5156_vm14, %v5157_v7, %v5131_v45 }
 0x7c9   :  { %5159 = vst [vmem:[%s8702_s10] sm:$0xff] %v5158_v31 }

</bundles_post_ra>
